<compile_context>
chip_gen: v7x
topology: tpu7x:2x2x1
jax: 0.10.0
libtpu: 0.0.40
codegen_flags: <defaults>
</compile_context>

<pallas_src>
import functools

import jax
import jax.numpy as jnp
from jax.experimental import pallas as pl
from jax.experimental.pallas import tpu as pltpu

_LANE = 128


def _conv_kernel(x_ref, w_ref, b_ref, o_ref, *, ksize, stride, th, wo, cin,
                 fuse_taps):
    # x_ref: (1, Hp, We, Cin)    padded NHWC image, resident per batch index
    # w_ref: (K*K*Cin, tn)       flattened-tap weights for this Cout tile
    # b_ref: (1, tn)             f32 bias tile
    # o_ref: (1, th, Wo, tn)     one row-block x Cout-tile of the output
    tn = o_ref.shape[-1]
    h0 = pl.program_id(2) * th * stride          # first padded input row
    if (th * stride) % 8 == 0:
        h0 = pl.multiple_of(h0, 8)

    def load_tap(kh, kw):
        # (th, Wo, Cin) shifted input window for kernel tap (kh, kw).
        if stride == 1:
            return x_ref[0, pl.ds(h0 + kh, th), pl.ds(kw, wo), :]
        # stride > 1: dense load + deinterleave (avoids strided sublane slices).
        xs = x_ref[0, pl.ds(h0 + kh, th, stride), pl.ds(kw, wo * stride), :]
        return xs.reshape(th, wo, stride, cin)[:, :, 0, :]

    if fuse_taps:
        # One wide-contraction matmul: LHS (th*Wo, K*K*Cin) built in VMEM.
        lhs = jnp.concatenate(
            [load_tap(kh, kw) for kh in range(ksize) for kw in range(ksize)],
            axis=-1)
        lhs = lhs.reshape(th * wo, ksize * ksize * cin)
        acc = jnp.dot(lhs, w_ref[...], preferred_element_type=jnp.float32)
    else:
        # Cin already >= 128: per-tap accumulation keeps the LHS temp small.
        acc = jnp.zeros((th * wo, tn), jnp.float32)
        for kh in range(ksize):
            for kw in range(ksize):
                t = kh * ksize + kw
                acc += jnp.dot(load_tap(kh, kw).reshape(th * wo, cin),
                               w_ref[t * cin:(t + 1) * cin, :],
                               preferred_element_type=jnp.float32)

    out = acc + b_ref[...]                       # (th*Wo, tn) + (1, tn)
    o_ref[0] = out.reshape(th, wo, tn).astype(o_ref.dtype)


def conv_layer_forward(x, weight, bias, kernel_size, stride, *,
                       target_rows=512, compute_dtype=None,
                       single_buffer_inputs=True, fuse_taps=None):
    """ReflectionPad2d(K//2) + Conv2d(K, stride).  x: (N, Cin, H, W) NCHW."""
    N, Cin, H, W = x.shape
    Cout = weight.shape[0]
    K = kernel_size
    pad = K // 2
    Ho = (H + 2 * pad - K) // stride + 1
    Wo = (W + 2 * pad - K) // stride + 1

    in_dtype = jnp.dtype(x.dtype if compute_dtype is None else compute_dtype)
    if fuse_taps is None:
        fuse_taps = Cin < 128                    # review: fuse only for narrow Cin

    # NHWC + reflection pad (one fused pass).  The NCHW<->NHWC transposes are
    # kept only to match the PyTorch interface; an NHWC-native caller should
    # feed NHWC directly and skip them.
    x_nhwc = jnp.transpose(x, (0, 2, 3, 1))
    xp = jnp.pad(x_nhwc, ((0, 0), (pad, pad), (pad, pad), (0, 0)),
                 mode="reflect")
    if stride > 1:
        # Extra right-pad so the in-kernel dense-load + deinterleave stays in range.
        xp = jnp.pad(xp, ((0, 0), (0, 0), (0, stride - 1), (0, 0)))
    xp = xp.astype(in_dtype)
    Hp, We = xp.shape[1], xp.shape[2]

    # Lane-dense Cout only when it does not inflate output HBM writeback.
    cout_b = pl.cdiv(Cout, _LANE) * _LANE if Cout >= 64 else Cout
    # Cout tile bounds resident weight + f32 accumulator for large channel counts.
    tn = cout_b
    if cout_b > 512:
        for cand in (512, 256, 128):
            if cout_b % cand == 0:
                tn = cand
                break
    n_cb = cout_b // tn

    # (O, I, Kh, Kw) -> (Kh*Kw*I, cout_b): contraction index (kh*K + kw)*Cin + c.
    w_flat = jnp.transpose(weight, (2, 3, 1, 0)).reshape(K * K * Cin, Cout)
    w_flat = jnp.pad(w_flat, ((0, 0), (0, cout_b - Cout))).astype(in_dtype)
    b_row = jnp.pad(bias.astype(jnp.float32),
                    (0, cout_b - Cout)).reshape(1, cout_b)

    # Output-row block: biggest divisor of Ho with th*Wo <= target_rows,
    # preferring (th*Wo) % 8 == 0 (sublane-aligned M tile, layout-free reshape).
    th, th_aligned = 1, None
    for cand in range(1, Ho + 1):
        if Ho % cand or cand * Wo > max(target_rows, Wo):
            continue
        th = cand
        if (cand * Wo) % 8 == 0:
            th_aligned = cand
    if th_aligned is not None:
        th = th_aligned
    # Keep >= 2 grid steps so both v7x TensorCores get work.
    if N * (Ho // th) * n_cb < 2 and Ho % 2 == 0:
        th = Ho // 2
    n_rb = Ho // th

    # VMEM budget with a per-generation cap (v5e/v6e 128 MiB, v7x 64 MiB/TC).
    isz = in_dtype.itemsize
    osz = jnp.dtype(x.dtype).itemsize
    img_bufs = 1 if single_buffer_inputs else 2
    vmem_needed = (img_bufs * Hp * We * max(Cin, 8) * isz      # resident image
                   + img_bufs * K * K * Cin * tn * isz         # weight tile
                   + 2 * th * Wo * tn * osz                    # output blocks
                   + th * Wo * K * K * Cin * isz               # fused LHS temp
                   + th * Wo * tn * 4                          # f32 accumulator
                   + tn * 4)
    try:
        vmem_cap = int(getattr(pltpu.get_tpu_info(), "vmem_capacity_bytes",
                               64 << 20))
    except Exception:                                          # pragma: no cover
        vmem_cap = 64 << 20                                    # v7x-safe default
    vmem_limit = int(min(max(int(vmem_needed * 1.3), 16 << 20),
                         (vmem_cap * 3) // 4))
    # TODO(synk): once the resident padded image (Hp*We*Cin*isz) exceeds
    # ~20 MiB, switch to a halo-row manual-DMA pipeline (memory_space=pl.ANY +
    # make_async_copy of th*stride+K-1 rows, double-buffered) so VMEM use is
    # O(th) instead of O(Hp) and v7x's two TensorCores don't each hold a copy.

    flops = 2 * N * Ho * Wo * K * K * Cin * cout_b
    bytes_accessed = (xp.size * isz + w_flat.size * isz + b_row.size * 4
                      + N * Ho * Wo * cout_b * osz)
    cost = pl.CostEstimate(flops=int(flops), transcendentals=0,
                           bytes_accessed=int(bytes_accessed))

    kernel = functools.partial(_conv_kernel, ksize=K, stride=stride, th=th,
                               wo=Wo, cin=Cin, fuse_taps=fuse_taps)

    def spec(shape, index_map, single):
        if single and hasattr(pl, "Buffered"):
            # Block index is (nearly) constant across the grid: one buffer is
            # enough; halves VMEM residency (matters most under v7x's 64 MiB).
            return pl.BlockSpec(shape, index_map, pipeline_mode=pl.Buffered(1))
        return pl.BlockSpec(shape, index_map)

    out_nhwc = pl.pallas_call(
        kernel,
        out_shape=jax.ShapeDtypeStruct((N, Ho, Wo, cout_b), x.dtype),
        grid_spec=pltpu.PrefetchScalarGridSpec(
            num_scalar_prefetch=0,
            grid=(N, n_cb, n_rb),            # weight stays put across row blocks
            in_specs=[
                spec((1, Hp, We, Cin), lambda n, c, r: (n, 0, 0, 0),
                     single_buffer_inputs),
                spec((K * K * Cin, tn), lambda n, c, r: (0, c),
                     single_buffer_inputs),
                spec((1, tn), lambda n, c, r: (0, c), single_buffer_inputs),
            ],
            out_specs=pl.BlockSpec((1, th, Wo, tn),
                                   lambda n, c, r: (n, r, 0, c)),
        ),
        compiler_params=pltpu.CompilerParams(
            dimension_semantics=("parallel", "parallel", "parallel"),
            vmem_limit_bytes=vmem_limit),
        cost_estimate=cost,
    )(xp, w_flat, b_row)

    if cout_b != Cout:
        out_nhwc = out_nhwc[..., :Cout]
    return jnp.transpose(out_nhwc, (0, 3, 1, 2))   # NHWC -> NCHW (interface only)


def _reference_conv(x, weight, bias, kernel_size, stride):
    pad = kernel_size // 2
    xp = jnp.pad(x, ((0, 0), (0, 0), (pad, pad), (pad, pad)), mode="reflect")
    out = jax.lax.conv_general_dilated(
        xp, weight, window_strides=(stride, stride), padding="VALID",
        dimension_numbers=("NCHW", "OIHW", "NCHW"))
    return out + bias.reshape(1, -1, 1, 1)


if __name__ == "__main__":
    in_channels, out_channels, kernel_size, stride = 4, 8, 3, 1
    N, H, W = 2, 16, 16

    key = jax.random.PRNGKey(0)
    kx, kw_key, kb_key = jax.random.split(key, 3)
    x = jax.random.normal(kx, (N, in_channels, H, W), dtype=jnp.float32)

    # Conv2d default-style init (kaiming-uniform-ish), deterministic.
    fan_in = in_channels * kernel_size * kernel_size
    bound = 1.0 / (fan_in ** 0.5)
    weight = jax.random.uniform(
        kw_key, (out_channels, in_channels, kernel_size, kernel_size),
        minval=-bound, maxval=bound, dtype=jnp.float32)
    bias = jax.random.uniform(kb_key, (out_channels,), minval=-bound,
                              maxval=bound, dtype=jnp.float32)

    # Preferred configuration first; graceful fallbacks keep the script runnable
    # if a given JAX build rejects single-buffered pipelining or the fused-tap
    # lane concatenation.
    configs = (
        dict(single_buffer_inputs=True, fuse_taps=None),   # full perf plan
        dict(single_buffer_inputs=False, fuse_taps=None),  # default buffering
        dict(single_buffer_inputs=False, fuse_taps=False), # per-tap fallback
    )
    out, last_err = None, None
    for cfg in configs:
        try:
            fwd = jax.jit(functools.partial(conv_layer_forward,
                                            kernel_size=kernel_size,
                                            stride=stride, **cfg))
            out = fwd(x, weight, bias)
            jax.block_until_ready(out)
            break
        except Exception as err:                            # pragma: no cover
            out, last_err = None, err
    if out is None:
        raise last_err

    ref = _reference_conv(x, weight, bias, kernel_size, stride)
    assert out.shape == ref.shape == (N, out_channels, H // stride, W // stride)
    assert jnp.allclose(out, ref, atol=1e-3, rtol=1e-3)
    print("KERNEL_OK")
</pallas_src>

<mosaic_0001>
module attributes {stable_mosaic.version = 11 : i64} {
  func.func @_conv_kernel(%arg0: i32, %arg1: i32, %arg2: i32, %arg3: memref<1x18x18x4xf32, #tpu.memory_space<vmem>>, %arg4: memref<36x8xf32, #tpu.memory_space<vmem>>, %arg5: memref<1x8xf32, #tpu.memory_space<vmem>>, %arg6: memref<1x16x16x8xf32, #tpu.memory_space<vmem>>) attributes {dimension_semantics = [#tpu.dimension_semantics<parallel>, #tpu.dimension_semantics<parallel>, #tpu.dimension_semantics<parallel>], iteration_bounds = array<i64: 2, 1, 1>, scalar_prefetch = 0 : i64, scratch_operands = 0 : i64, tpu.core_type = #tpu.core_type<tc>, window_params = [{pipeline_mode = #tpu.pipeline_mode<synchronous>, transform_indices = @transform_0, window_bounds = array<i64: 1, 18, 18, 4>}, {pipeline_mode = #tpu.pipeline_mode<synchronous>, transform_indices = @transform_1, window_bounds = array<i64: 36, 8>}, {pipeline_mode = #tpu.pipeline_mode<synchronous>, transform_indices = @transform_2, window_bounds = array<i64: 1, 8>}, {transform_indices = @transform_3, window_bounds = array<i64: 1, 16, 16, 8>}]} {
    %c16_i32 = arith.constant 16 : i32
    %0 = arith.muli %arg2, %c16_i32 : i32
    %c1_i32 = arith.constant 1 : i32
    %1 = arith.muli %0, %c1_i32 : i32
    %2 = tpu.assume_multiple %1, 8 : i32
    %c0_i32 = arith.constant 0 : i32
    %3 = arith.addi %2, %c0_i32 : i32
    %c0 = arith.constant 0 : index
    %4 = arith.index_cast %3 : i32 to index
    %c0_0 = arith.constant 0 : index
    %c0_1 = arith.constant 0 : index
    %5 = vector.load %arg3[%c0, %4, %c0_0, %c0_1] : memref<1x18x18x4xf32, #tpu.memory_space<vmem>>, vector<1x16x16x4xf32>
    %6 = vector.shape_cast %5 : vector<1x16x16x4xf32> to vector<16x16x4xf32>
    %c0_i32_2 = arith.constant 0 : i32
    %7 = arith.addi %2, %c0_i32_2 : i32
    %c0_3 = arith.constant 0 : index
    %8 = arith.index_cast %7 : i32 to index
    %c1 = arith.constant 1 : index
    %c0_4 = arith.constant 0 : index
    %9 = vector.load %arg3[%c0_3, %8, %c1, %c0_4] : memref<1x18x18x4xf32, #tpu.memory_space<vmem>>, vector<1x16x16x4xf32>
    %10 = vector.shape_cast %9 : vector<1x16x16x4xf32> to vector<16x16x4xf32>
    %c0_i32_5 = arith.constant 0 : i32
    %11 = arith.addi %2, %c0_i32_5 : i32
    %c0_6 = arith.constant 0 : index
    %12 = arith.index_cast %11 : i32 to index
    %c2 = arith.constant 2 : index
    %c0_7 = arith.constant 0 : index
    %13 = vector.load %arg3[%c0_6, %12, %c2, %c0_7] : memref<1x18x18x4xf32, #tpu.memory_space<vmem>>, vector<1x16x16x4xf32>
    %14 = vector.shape_cast %13 : vector<1x16x16x4xf32> to vector<16x16x4xf32>
    %c1_i32_8 = arith.constant 1 : i32
    %15 = arith.addi %2, %c1_i32_8 : i32
    %c0_9 = arith.constant 0 : index
    %16 = arith.index_cast %15 : i32 to index
    %c0_10 = arith.constant 0 : index
    %c0_11 = arith.constant 0 : index
    %17 = vector.load %arg3[%c0_9, %16, %c0_10, %c0_11] : memref<1x18x18x4xf32, #tpu.memory_space<vmem>>, vector<1x16x16x4xf32>
    %18 = vector.shape_cast %17 : vector<1x16x16x4xf32> to vector<16x16x4xf32>
    %c1_i32_12 = arith.constant 1 : i32
    %19 = arith.addi %2, %c1_i32_12 : i32
    %c0_13 = arith.constant 0 : index
    %20 = arith.index_cast %19 : i32 to index
    %c1_14 = arith.constant 1 : index
    %c0_15 = arith.constant 0 : index
    %21 = vector.load %arg3[%c0_13, %20, %c1_14, %c0_15] : memref<1x18x18x4xf32, #tpu.memory_space<vmem>>, vector<1x16x16x4xf32>
    %22 = vector.shape_cast %21 : vector<1x16x16x4xf32> to vector<16x16x4xf32>
    %c1_i32_16 = arith.constant 1 : i32
    %23 = arith.addi %2, %c1_i32_16 : i32
    %c0_17 = arith.constant 0 : index
    %24 = arith.index_cast %23 : i32 to index
    %c2_18 = arith.constant 2 : index
    %c0_19 = arith.constant 0 : index
    %25 = vector.load %arg3[%c0_17, %24, %c2_18, %c0_19] : memref<1x18x18x4xf32, #tpu.memory_space<vmem>>, vector<1x16x16x4xf32>
    %26 = vector.shape_cast %25 : vector<1x16x16x4xf32> to vector<16x16x4xf32>
    %c2_i32 = arith.constant 2 : i32
    %27 = arith.addi %2, %c2_i32 : i32
    %c0_20 = arith.constant 0 : index
    %28 = arith.index_cast %27 : i32 to index
    %c0_21 = arith.constant 0 : index
    %c0_22 = arith.constant 0 : index
    %29 = vector.load %arg3[%c0_20, %28, %c0_21, %c0_22] : memref<1x18x18x4xf32, #tpu.memory_space<vmem>>, vector<1x16x16x4xf32>
    %30 = vector.shape_cast %29 : vector<1x16x16x4xf32> to vector<16x16x4xf32>
    %c2_i32_23 = arith.constant 2 : i32
    %31 = arith.addi %2, %c2_i32_23 : i32
    %c0_24 = arith.constant 0 : index
    %32 = arith.index_cast %31 : i32 to index
    %c1_25 = arith.constant 1 : index
    %c0_26 = arith.constant 0 : index
    %33 = vector.load %arg3[%c0_24, %32, %c1_25, %c0_26] : memref<1x18x18x4xf32, #tpu.memory_space<vmem>>, vector<1x16x16x4xf32>
    %34 = vector.shape_cast %33 : vector<1x16x16x4xf32> to vector<16x16x4xf32>
    %c2_i32_27 = arith.constant 2 : i32
    %35 = arith.addi %2, %c2_i32_27 : i32
    %c0_28 = arith.constant 0 : index
    %36 = arith.index_cast %35 : i32 to index
    %c2_29 = arith.constant 2 : index
    %c0_30 = arith.constant 0 : index
    %37 = vector.load %arg3[%c0_28, %36, %c2_29, %c0_30] : memref<1x18x18x4xf32, #tpu.memory_space<vmem>>, vector<1x16x16x4xf32>
    %38 = vector.shape_cast %37 : vector<1x16x16x4xf32> to vector<16x16x4xf32>
    %39 = tpu.concatenate %6, %10, %14, %18, %22, %26, %30, %34, %38 in 2 : vector<16x16x4xf32>, vector<16x16x4xf32>, vector<16x16x4xf32>, vector<16x16x4xf32>, vector<16x16x4xf32>, vector<16x16x4xf32>, vector<16x16x4xf32>, vector<16x16x4xf32>, vector<16x16x4xf32> -> vector<16x16x36xf32>
    %40 = vector.shape_cast %39 : vector<16x16x36xf32> to vector<256x36xf32>
    %c0_31 = arith.constant 0 : index
    %c0_32 = arith.constant 0 : index
    %41 = vector.load %arg4[%c0_31, %c0_32] : memref<36x8xf32, #tpu.memory_space<vmem>>, vector<36x8xf32>
    %cst = arith.constant dense<0.000000e+00> : vector<256x8xf32>
    %42 = tpu.matmul %40, %41, %cst {dimension_numbers = #tpu.dot_dimension_numbers<[1], [0], [0], [1], [0, 0, 1, 1], [], []>} : vector<256x36xf32>, vector<36x8xf32>, vector<256x8xf32> -> vector<256x8xf32>
    %c0_33 = arith.constant 0 : index
    %c0_34 = arith.constant 0 : index
    %43 = vector.load %arg5[%c0_33, %c0_34] : memref<1x8xf32, #tpu.memory_space<vmem>>, vector<1x8xf32>
    %44 = vector.broadcast %43 : vector<1x8xf32> to vector<256x8xf32>
    %45 = arith.addf %42, %44 : vector<256x8xf32>
    %46 = vector.shape_cast %45 : vector<256x8xf32> to vector<16x16x8xf32>
    %c0_35 = arith.constant 0 : index
    %c0_36 = arith.constant 0 : index
    %c0_37 = arith.constant 0 : index
    %c0_38 = arith.constant 0 : index
    %47 = vector.load %arg6[%c0_35, %c0_36, %c0_37, %c0_38] : memref<1x16x16x8xf32, #tpu.memory_space<vmem>>, vector<1x16x16x8xf32>
    %48 = vector.shape_cast %47 : vector<1x16x16x8xf32> to vector<16x16x8xf32>
    %49 = vector.shape_cast %46 : vector<16x16x8xf32> to vector<1x16x16x8xf32>
    tpu.vector_store %arg6[%c0_35, %c0_36, %c0_37, %c0_38], %49 {strides = array<i32>} : memref<1x16x16x8xf32, #tpu.memory_space<vmem>>, vector<1x16x16x8xf32>,
    return
  }
  func.func @transform_0(%arg0: i32, %arg1: i32, %arg2: i32) -> (i32, i32, i32, i32) {
    %c0_i32 = arith.constant 0 : i32
    %c0_i32_0 = arith.constant 0 : i32
    %c0_i32_1 = arith.constant 0 : i32
    %c0_i32_2 = arith.constant 0 : i32
    return %arg0, %c0_i32, %c0_i32_0, %c0_i32_1 : i32, i32, i32, i32
  }
  func.func @transform_1(%arg0: i32, %arg1: i32, %arg2: i32) -> (i32, i32) {
    %c0_i32 = arith.constant 0 : i32
    %c0_i32_0 = arith.constant 0 : i32
    return %c0_i32, %arg1 : i32, i32
  }
  func.func @transform_2(%arg0: i32, %arg1: i32, %arg2: i32) -> (i32, i32) {
    %c0_i32 = arith.constant 0 : i32
    %c0_i32_0 = arith.constant 0 : i32
    return %c0_i32, %arg1 : i32, i32
  }
  func.func @transform_3(%arg0: i32, %arg1: i32, %arg2: i32) -> (i32, i32, i32, i32) {
    %c0_i32 = arith.constant 0 : i32
    %c0_i32_0 = arith.constant 0 : i32
    return %arg0, %arg2, %c0_i32, %arg1 : i32, i32, i32, i32
  }
}

module attributes {stable_mosaic.version = 11 : i64} {
  func.func @_conv_kernel(%arg0: i32, %arg1: i32, %arg2: i32, %arg3: memref<1x18x18x4xf32, #tpu.memory_space<vmem>>, %arg4: memref<36x8xf32, #tpu.memory_space<vmem>>, %arg5: memref<1x8xf32, #tpu.memory_space<vmem>>, %arg6: memref<1x16x16x8xf32, #tpu.memory_space<vmem>>) attributes {dimension_semantics = [#tpu.dimension_semantics<parallel>, #tpu.dimension_semantics<parallel>, #tpu.dimension_semantics<parallel>], iteration_bounds = array<i64: 2, 1, 1>, scalar_prefetch = 0 : i64, scratch_operands = 0 : i64, tpu.core_type = #tpu.core_type<tc>, window_params = [{transform_indices = @transform_0, window_bounds = array<i64: 1, 18, 18, 4>}, {transform_indices = @transform_1, window_bounds = array<i64: 36, 8>}, {transform_indices = @transform_2, window_bounds = array<i64: 1, 8>}, {transform_indices = @transform_3, window_bounds = array<i64: 1, 16, 16, 8>}]} {
    %c16_i32 = arith.constant 16 : i32
    %0 = arith.muli %arg2, %c16_i32 : i32
    %c1_i32 = arith.constant 1 : i32
    %1 = arith.muli %0, %c1_i32 : i32
    %2 = tpu.assume_multiple %1, 8 : i32
    %c0_i32 = arith.constant 0 : i32
    %3 = arith.addi %2, %c0_i32 : i32
    %c0 = arith.constant 0 : index
    %4 = arith.index_cast %3 : i32 to index
    %c0_0 = arith.constant 0 : index
    %c0_1 = arith.constant 0 : index
    %5 = vector.load %arg3[%c0, %4, %c0_0, %c0_1] : memref<1x18x18x4xf32, #tpu.memory_space<vmem>>, vector<1x16x16x4xf32>
    %6 = vector.shape_cast %5 : vector<1x16x16x4xf32> to vector<16x16x4xf32>
    %c0_i32_2 = arith.constant 0 : i32
    %7 = arith.addi %2, %c0_i32_2 : i32
    %c0_3 = arith.constant 0 : index
    %8 = arith.index_cast %7 : i32 to index
    %c1 = arith.constant 1 : index
    %c0_4 = arith.constant 0 : index
    %9 = vector.load %arg3[%c0_3, %8, %c1, %c0_4] : memref<1x18x18x4xf32, #tpu.memory_space<vmem>>, vector<1x16x16x4xf32>
    %10 = vector.shape_cast %9 : vector<1x16x16x4xf32> to vector<16x16x4xf32>
    %c0_i32_5 = arith.constant 0 : i32
    %11 = arith.addi %2, %c0_i32_5 : i32
    %c0_6 = arith.constant 0 : index
    %12 = arith.index_cast %11 : i32 to index
    %c2 = arith.constant 2 : index
    %c0_7 = arith.constant 0 : index
    %13 = vector.load %arg3[%c0_6, %12, %c2, %c0_7] : memref<1x18x18x4xf32, #tpu.memory_space<vmem>>, vector<1x16x16x4xf32>
    %14 = vector.shape_cast %13 : vector<1x16x16x4xf32> to vector<16x16x4xf32>
    %c1_i32_8 = arith.constant 1 : i32
    %15 = arith.addi %2, %c1_i32_8 : i32
    %c0_9 = arith.constant 0 : index
    %16 = arith.index_cast %15 : i32 to index
    %c0_10 = arith.constant 0 : index
    %c0_11 = arith.constant 0 : index
    %17 = vector.load %arg3[%c0_9, %16, %c0_10, %c0_11] : memref<1x18x18x4xf32, #tpu.memory_space<vmem>>, vector<1x16x16x4xf32>
    %18 = vector.shape_cast %17 : vector<1x16x16x4xf32> to vector<16x16x4xf32>
    %c1_i32_12 = arith.constant 1 : i32
    %19 = arith.addi %2, %c1_i32_12 : i32
    %c0_13 = arith.constant 0 : index
    %20 = arith.index_cast %19 : i32 to index
    %c1_14 = arith.constant 1 : index
    %c0_15 = arith.constant 0 : index
    %21 = vector.load %arg3[%c0_13, %20, %c1_14, %c0_15] : memref<1x18x18x4xf32, #tpu.memory_space<vmem>>, vector<1x16x16x4xf32>
    %22 = vector.shape_cast %21 : vector<1x16x16x4xf32> to vector<16x16x4xf32>
    %c1_i32_16 = arith.constant 1 : i32
    %23 = arith.addi %2, %c1_i32_16 : i32
    %c0_17 = arith.constant 0 : index
    %24 = arith.index_cast %23 : i32 to index
    %c2_18 = arith.constant 2 : index
    %c0_19 = arith.constant 0 : index
    %25 = vector.load %arg3[%c0_17, %24, %c2_18, %c0_19] : memref<1x18x18x4xf32, #tpu.memory_space<vmem>>, vector<1x16x16x4xf32>
    %26 = vector.shape_cast %25 : vector<1x16x16x4xf32> to vector<16x16x4xf32>
    %c2_i32 = arith.constant 2 : i32
    %27 = arith.addi %2, %c2_i32 : i32
    %c0_20 = arith.constant 0 : index
    %28 = arith.index_cast %27 : i32 to index
    %c0_21 = arith.constant 0 : index
    %c0_22 = arith.constant 0 : index
    %29 = vector.load %arg3[%c0_20, %28, %c0_21, %c0_22] : memref<1x18x18x4xf32, #tpu.memory_space<vmem>>, vector<1x16x16x4xf32>
    %30 = vector.shape_cast %29 : vector<1x16x16x4xf32> to vector<16x16x4xf32>
    %c2_i32_23 = arith.constant 2 : i32
    %31 = arith.addi %2, %c2_i32_23 : i32
    %c0_24 = arith.constant 0 : index
    %32 = arith.index_cast %31 : i32 to index
    %c1_25 = arith.constant 1 : index
    %c0_26 = arith.constant 0 : index
    %33 = vector.load %arg3[%c0_24, %32, %c1_25, %c0_26] : memref<1x18x18x4xf32, #tpu.memory_space<vmem>>, vector<1x16x16x4xf32>
    %34 = vector.shape_cast %33 : vector<1x16x16x4xf32> to vector<16x16x4xf32>
    %c2_i32_27 = arith.constant 2 : i32
    %35 = arith.addi %2, %c2_i32_27 : i32
    %c0_28 = arith.constant 0 : index
    %36 = arith.index_cast %35 : i32 to index
    %c2_29 = arith.constant 2 : index
    %c0_30 = arith.constant 0 : index
    %37 = vector.load %arg3[%c0_28, %36, %c2_29, %c0_30] : memref<1x18x18x4xf32, #tpu.memory_space<vmem>>, vector<1x16x16x4xf32>
    %38 = vector.shape_cast %37 : vector<1x16x16x4xf32> to vector<16x16x4xf32>
    %39 = tpu.concatenate %6, %10, %14, %18, %22, %26, %30, %34, %38 in 2 : vector<16x16x4xf32>, vector<16x16x4xf32>, vector<16x16x4xf32>, vector<16x16x4xf32>, vector<16x16x4xf32>, vector<16x16x4xf32>, vector<16x16x4xf32>, vector<16x16x4xf32>, vector<16x16x4xf32> -> vector<16x16x36xf32>
    %40 = vector.shape_cast %39 : vector<16x16x36xf32> to vector<256x36xf32>
    %c0_31 = arith.constant 0 : index
    %c0_32 = arith.constant 0 : index
    %41 = vector.load %arg4[%c0_31, %c0_32] : memref<36x8xf32, #tpu.memory_space<vmem>>, vector<36x8xf32>
    %cst = arith.constant dense<0.000000e+00> : vector<256x8xf32>
    %42 = tpu.matmul %40, %41, %cst {dimension_numbers = #tpu.dot_dimension_numbers<[1], [0], [0], [1], [0, 0, 1, 1], [], []>} : vector<256x36xf32>, vector<36x8xf32>, vector<256x8xf32> -> vector<256x8xf32>
    %c0_33 = arith.constant 0 : index
    %c0_34 = arith.constant 0 : index
    %43 = vector.load %arg5[%c0_33, %c0_34] : memref<1x8xf32, #tpu.memory_space<vmem>>, vector<1x8xf32>
    %44 = vector.broadcast %43 : vector<1x8xf32> to vector<256x8xf32>
    %45 = arith.addf %42, %44 : vector<256x8xf32>
    %46 = vector.shape_cast %45 : vector<256x8xf32> to vector<16x16x8xf32>
    %c0_35 = arith.constant 0 : index
    %c0_36 = arith.constant 0 : index
    %c0_37 = arith.constant 0 : index
    %c0_38 = arith.constant 0 : index
    %47 = vector.load %arg6[%c0_35, %c0_36, %c0_37, %c0_38] : memref<1x16x16x8xf32, #tpu.memory_space<vmem>>, vector<1x16x16x8xf32>
    %48 = vector.shape_cast %47 : vector<1x16x16x8xf32> to vector<16x16x8xf32>
    %49 = vector.shape_cast %46 : vector<16x16x8xf32> to vector<1x16x16x8xf32>
    tpu.vector_store %arg6[%c0_35, %c0_36, %c0_37, %c0_38], %49 {strides = array<i32>} : memref<1x16x16x8xf32, #tpu.memory_space<vmem>>, vector<1x16x16x8xf32>,
    return
  }
  func.func @transform_0(%arg0: i32, %arg1: i32, %arg2: i32) -> (i32, i32, i32, i32) {
    %c0_i32 = arith.constant 0 : i32
    %c0_i32_0 = arith.constant 0 : i32
    %c0_i32_1 = arith.constant 0 : i32
    %c0_i32_2 = arith.constant 0 : i32
    return %arg0, %c0_i32, %c0_i32_0, %c0_i32_1 : i32, i32, i32, i32
  }
  func.func @transform_1(%arg0: i32, %arg1: i32, %arg2: i32) -> (i32, i32) {
    %c0_i32 = arith.constant 0 : i32
    %c0_i32_0 = arith.constant 0 : i32
    return %c0_i32, %arg1 : i32, i32
  }
  func.func @transform_2(%arg0: i32, %arg1: i32, %arg2: i32) -> (i32, i32) {
    %c0_i32 = arith.constant 0 : i32
    %c0_i32_0 = arith.constant 0 : i32
    return %c0_i32, %arg1 : i32, i32
  }
  func.func @transform_3(%arg0: i32, %arg1: i32, %arg2: i32) -> (i32, i32, i32, i32) {
    %c0_i32 = arith.constant 0 : i32
    %c0_i32_0 = arith.constant 0 : i32
    return %arg0, %arg2, %c0_i32, %arg1 : i32, i32, i32, i32
  }
}

module attributes {stable_mosaic.version = 11 : i64} {
  func.func @_conv_kernel(%arg0: i32, %arg1: i32, %arg2: i32, %arg3: memref<1x18x18x4xf32, #tpu.memory_space<vmem>>, %arg4: memref<36x8xf32, #tpu.memory_space<vmem>>, %arg5: memref<1x8xf32, #tpu.memory_space<vmem>>, %arg6: memref<1x16x16x8xf32, #tpu.memory_space<vmem>>) attributes {dimension_semantics = [#tpu.dimension_semantics<parallel>, #tpu.dimension_semantics<parallel>, #tpu.dimension_semantics<parallel>], iteration_bounds = array<i64: 2, 1, 1>, scalar_prefetch = 0 : i64, scratch_operands = 0 : i64, tpu.core_type = #tpu.core_type<tc>, window_params = [{transform_indices = @transform_0, window_bounds = array<i64: 1, 18, 18, 4>}, {transform_indices = @transform_1, window_bounds = array<i64: 36, 8>}, {transform_indices = @transform_2, window_bounds = array<i64: 1, 8>}, {transform_indices = @transform_3, window_bounds = array<i64: 1, 16, 16, 8>}]} {
    %c16_i32 = arith.constant 16 : i32
    %0 = arith.muli %arg2, %c16_i32 : i32
    %c1_i32 = arith.constant 1 : i32
    %1 = arith.muli %0, %c1_i32 : i32
    %2 = tpu.assume_multiple %1, 8 : i32
    %cst = arith.constant 0.000000e+00 : f32
    %3 = vector.broadcast %cst : f32 to vector<256x8xf32>
    %c0_i32 = arith.constant 0 : i32
    %4 = arith.addi %2, %c0_i32 : i32
    %c0 = arith.constant 0 : index
    %5 = arith.index_cast %4 : i32 to index
    %c0_0 = arith.constant 0 : index
    %c0_1 = arith.constant 0 : index
    %6 = vector.load %arg3[%c0, %5, %c0_0, %c0_1] : memref<1x18x18x4xf32, #tpu.memory_space<vmem>>, vector<1x16x16x4xf32>
    %7 = vector.shape_cast %6 : vector<1x16x16x4xf32> to vector<16x16x4xf32>
    %8 = vector.shape_cast %7 : vector<16x16x4xf32> to vector<256x4xf32>
    %c0_2 = arith.constant 0 : index
    %c0_3 = arith.constant 0 : index
    %9 = vector.load %arg4[%c0_2, %c0_3] : memref<36x8xf32, #tpu.memory_space<vmem>>, vector<4x8xf32>
    %cst_4 = arith.constant dense<0.000000e+00> : vector<256x8xf32>
    %10 = tpu.matmul %8, %9, %cst_4 {dimension_numbers = #tpu.dot_dimension_numbers<[1], [0], [0], [1], [0, 0, 1, 1], [], []>} : vector<256x4xf32>, vector<4x8xf32>, vector<256x8xf32> -> vector<256x8xf32>
    %11 = arith.addf %3, %10 : vector<256x8xf32>
    %c0_i32_5 = arith.constant 0 : i32
    %12 = arith.addi %2, %c0_i32_5 : i32
    %c0_6 = arith.constant 0 : index
    %13 = arith.index_cast %12 : i32 to index
    %c1 = arith.constant 1 : index
    %c0_7 = arith.constant 0 : index
    %14 = vector.load %arg3[%c0_6, %13, %c1, %c0_7] : memref<1x18x18x4xf32, #tpu.memory_space<vmem>>, vector<1x16x16x4xf32>
    %15 = vector.shape_cast %14 : vector<1x16x16x4xf32> to vector<16x16x4xf32>
    %16 = vector.shape_cast %15 : vector<16x16x4xf32> to vector<256x4xf32>
    %c4 = arith.constant 4 : index
    %c0_8 = arith.constant 0 : index
    %17 = vector.load %arg4[%c4, %c0_8] : memref<36x8xf32, #tpu.memory_space<vmem>>, vector<4x8xf32>
    %cst_9 = arith.constant dense<0.000000e+00> : vector<256x8xf32>
    %18 = tpu.matmul %16, %17, %cst_9 {dimension_numbers = #tpu.dot_dimension_numbers<[1], [0], [0], [1], [0, 0, 1, 1], [], []>} : vector<256x4xf32>, vector<4x8xf32>, vector<256x8xf32> -> vector<256x8xf32>
    %19 = arith.addf %11, %18 : vector<256x8xf32>
    %c0_i32_10 = arith.constant 0 : i32
    %20 = arith.addi %2, %c0_i32_10 : i32
    %c0_11 = arith.constant 0 : index
    %21 = arith.index_cast %20 : i32 to index
    %c2 = arith.constant 2 : index
    %c0_12 = arith.constant 0 : index
    %22 = vector.load %arg3[%c0_11, %21, %c2, %c0_12] : memref<1x18x18x4xf32, #tpu.memory_space<vmem>>, vector<1x16x16x4xf32>
    %23 = vector.shape_cast %22 : vector<1x16x16x4xf32> to vector<16x16x4xf32>
    %24 = vector.shape_cast %23 : vector<16x16x4xf32> to vector<256x4xf32>
    %c8 = arith.constant 8 : index
    %c0_13 = arith.constant 0 : index
    %25 = vector.load %arg4[%c8, %c0_13] : memref<36x8xf32, #tpu.memory_space<vmem>>, vector<4x8xf32>
    %cst_14 = arith.constant dense<0.000000e+00> : vector<256x8xf32>
    %26 = tpu.matmul %24, %25, %cst_14 {dimension_numbers = #tpu.dot_dimension_numbers<[1], [0], [0], [1], [0, 0, 1, 1], [], []>} : vector<256x4xf32>, vector<4x8xf32>, vector<256x8xf32> -> vector<256x8xf32>
    %27 = arith.addf %19, %26 : vector<256x8xf32>
    %c1_i32_15 = arith.constant 1 : i32
    %28 = arith.addi %2, %c1_i32_15 : i32
    %c0_16 = arith.constant 0 : index
    %29 = arith.index_cast %28 : i32 to index
    %c0_17 = arith.constant 0 : index
    %c0_18 = arith.constant 0 : index
    %30 = vector.load %arg3[%c0_16, %29, %c0_17, %c0_18] : memref<1x18x18x4xf32, #tpu.memory_space<vmem>>, vector<1x16x16x4xf32>
    %31 = vector.shape_cast %30 : vector<1x16x16x4xf32> to vector<16x16x4xf32>
    %32 = vector.shape_cast %31 : vector<16x16x4xf32> to vector<256x4xf32>
    %c12 = arith.constant 12 : index
    %c0_19 = arith.constant 0 : index
    %33 = vector.load %arg4[%c12, %c0_19] : memref<36x8xf32, #tpu.memory_space<vmem>>, vector<4x8xf32>
    %cst_20 = arith.constant dense<0.000000e+00> : vector<256x8xf32>
    %34 = tpu.matmul %32, %33, %cst_20 {dimension_numbers = #tpu.dot_dimension_numbers<[1], [0], [0], [1], [0, 0, 1, 1], [], []>} : vector<256x4xf32>, vector<4x8xf32>, vector<256x8xf32> -> vector<256x8xf32>
    %35 = arith.addf %27, %34 : vector<256x8xf32>
    %c1_i32_21 = arith.constant 1 : i32
    %36 = arith.addi %2, %c1_i32_21 : i32
    %c0_22 = arith.constant 0 : index
    %37 = arith.index_cast %36 : i32 to index
    %c1_23 = arith.constant 1 : index
    %c0_24 = arith.constant 0 : index
    %38 = vector.load %arg3[%c0_22, %37, %c1_23, %c0_24] : memref<1x18x18x4xf32, #tpu.memory_space<vmem>>, vector<1x16x16x4xf32>
    %39 = vector.shape_cast %38 : vector<1x16x16x4xf32> to vector<16x16x4xf32>
    %40 = vector.shape_cast %39 : vector<16x16x4xf32> to vector<256x4xf32>
    %c16 = arith.constant 16 : index
    %c0_25 = arith.constant 0 : index
    %41 = vector.load %arg4[%c16, %c0_25] : memref<36x8xf32, #tpu.memory_space<vmem>>, vector<4x8xf32>
    %cst_26 = arith.constant dense<0.000000e+00> : vector<256x8xf32>
    %42 = tpu.matmul %40, %41, %cst_26 {dimension_numbers = #tpu.dot_dimension_numbers<[1], [0], [0], [1], [0, 0, 1, 1], [], []>} : vector<256x4xf32>, vector<4x8xf32>, vector<256x8xf32> -> vector<256x8xf32>
    %43 = arith.addf %35, %42 : vector<256x8xf32>
    %c1_i32_27 = arith.constant 1 : i32
    %44 = arith.addi %2, %c1_i32_27 : i32
    %c0_28 = arith.constant 0 : index
    %45 = arith.index_cast %44 : i32 to index
    %c2_29 = arith.constant 2 : index
    %c0_30 = arith.constant 0 : index
    %46 = vector.load %arg3[%c0_28, %45, %c2_29, %c0_30] : memref<1x18x18x4xf32, #tpu.memory_space<vmem>>, vector<1x16x16x4xf32>
    %47 = vector.shape_cast %46 : vector<1x16x16x4xf32> to vector<16x16x4xf32>
    %48 = vector.shape_cast %47 : vector<16x16x4xf32> to vector<256x4xf32>
    %c20 = arith.constant 20 : index
    %c0_31 = arith.constant 0 : index
    %49 = vector.load %arg4[%c20, %c0_31] : memref<36x8xf32, #tpu.memory_space<vmem>>, vector<4x8xf32>
    %cst_32 = arith.constant dense<0.000000e+00> : vector<256x8xf32>
    %50 = tpu.matmul %48, %49, %cst_32 {dimension_numbers = #tpu.dot_dimension_numbers<[1], [0], [0], [1], [0, 0, 1, 1], [], []>} : vector<256x4xf32>, vector<4x8xf32>, vector<256x8xf32> -> vector<256x8xf32>
    %51 = arith.addf %43, %50 : vector<256x8xf32>
    %c2_i32 = arith.constant 2 : i32
    %52 = arith.addi %2, %c2_i32 : i32
    %c0_33 = arith.constant 0 : index
    %53 = arith.index_cast %52 : i32 to index
    %c0_34 = arith.constant 0 : index
    %c0_35 = arith.constant 0 : index
    %54 = vector.load %arg3[%c0_33, %53, %c0_34, %c0_35] : memref<1x18x18x4xf32, #tpu.memory_space<vmem>>, vector<1x16x16x4xf32>
    %55 = vector.shape_cast %54 : vector<1x16x16x4xf32> to vector<16x16x4xf32>
    %56 = vector.shape_cast %55 : vector<16x16x4xf32> to vector<256x4xf32>
    %c24 = arith.constant 24 : index
    %c0_36 = arith.constant 0 : index
    %57 = vector.load %arg4[%c24, %c0_36] : memref<36x8xf32, #tpu.memory_space<vmem>>, vector<4x8xf32>
    %cst_37 = arith.constant dense<0.000000e+00> : vector<256x8xf32>
    %58 = tpu.matmul %56, %57, %cst_37 {dimension_numbers = #tpu.dot_dimension_numbers<[1], [0], [0], [1], [0, 0, 1, 1], [], []>} : vector<256x4xf32>, vector<4x8xf32>, vector<256x8xf32> -> vector<256x8xf32>
    %59 = arith.addf %51, %58 : vector<256x8xf32>
    %c2_i32_38 = arith.constant 2 : i32
    %60 = arith.addi %2, %c2_i32_38 : i32
    %c0_39 = arith.constant 0 : index
    %61 = arith.index_cast %60 : i32 to index
    %c1_40 = arith.constant 1 : index
    %c0_41 = arith.constant 0 : index
    %62 = vector.load %arg3[%c0_39, %61, %c1_40, %c0_41] : memref<1x18x18x4xf32, #tpu.memory_space<vmem>>, vector<1x16x16x4xf32>
    %63 = vector.shape_cast %62 : vector<1x16x16x4xf32> to vector<16x16x4xf32>
    %64 = vector.shape_cast %63 : vector<16x16x4xf32> to vector<256x4xf32>
    %c28 = arith.constant 28 : index
    %c0_42 = arith.constant 0 : index
    %65 = vector.load %arg4[%c28, %c0_42] : memref<36x8xf32, #tpu.memory_space<vmem>>, vector<4x8xf32>
    %cst_43 = arith.constant dense<0.000000e+00> : vector<256x8xf32>
    %66 = tpu.matmul %64, %65, %cst_43 {dimension_numbers = #tpu.dot_dimension_numbers<[1], [0], [0], [1], [0, 0, 1, 1], [], []>} : vector<256x4xf32>, vector<4x8xf32>, vector<256x8xf32> -> vector<256x8xf32>
    %67 = arith.addf %59, %66 : vector<256x8xf32>
    %c2_i32_44 = arith.constant 2 : i32
    %68 = arith.addi %2, %c2_i32_44 : i32
    %c0_45 = arith.constant 0 : index
    %69 = arith.index_cast %68 : i32 to index
    %c2_46 = arith.constant 2 : index
    %c0_47 = arith.constant 0 : index
    %70 = vector.load %arg3[%c0_45, %69, %c2_46, %c0_47] : memref<1x18x18x4xf32, #tpu.memory_space<vmem>>, vector<1x16x16x4xf32>
    %71 = vector.shape_cast %70 : vector<1x16x16x4xf32> to vector<16x16x4xf32>
    %72 = vector.shape_cast %71 : vector<16x16x4xf32> to vector<256x4xf32>
    %c32 = arith.constant 32 : index
    %c0_48 = arith.constant 0 : index
    %73 = vector.load %arg4[%c32, %c0_48] : memref<36x8xf32, #tpu.memory_space<vmem>>, vector<4x8xf32>
    %cst_49 = arith.constant dense<0.000000e+00> : vector<256x8xf32>
    %74 = tpu.matmul %72, %73, %cst_49 {dimension_numbers = #tpu.dot_dimension_numbers<[1], [0], [0], [1], [0, 0, 1, 1], [], []>} : vector<256x4xf32>, vector<4x8xf32>, vector<256x8xf32> -> vector<256x8xf32>
    %75 = arith.addf %67, %74 : vector<256x8xf32>
    %c0_50 = arith.constant 0 : index
    %c0_51 = arith.constant 0 : index
    %76 = vector.load %arg5[%c0_50, %c0_51] : memref<1x8xf32, #tpu.memory_space<vmem>>, vector<1x8xf32>
    %77 = vector.broadcast %76 : vector<1x8xf32> to vector<256x8xf32>
    %78 = arith.addf %75, %77 : vector<256x8xf32>
    %79 = vector.shape_cast %78 : vector<256x8xf32> to vector<16x16x8xf32>
    %c0_52 = arith.constant 0 : index
    %c0_53 = arith.constant 0 : index
    %c0_54 = arith.constant 0 : index
    %c0_55 = arith.constant 0 : index
    %80 = vector.load %arg6[%c0_52, %c0_53, %c0_54, %c0_55] : memref<1x16x16x8xf32, #tpu.memory_space<vmem>>, vector<1x16x16x8xf32>
    %81 = vector.shape_cast %80 : vector<1x16x16x8xf32> to vector<16x16x8xf32>
    %82 = vector.shape_cast %79 : vector<16x16x8xf32> to vector<1x16x16x8xf32>
    tpu.vector_store %arg6[%c0_52, %c0_53, %c0_54, %c0_55], %82 {strides = array<i32>} : memref<1x16x16x8xf32, #tpu.memory_space<vmem>>, vector<1x16x16x8xf32>,
    return
  }
  func.func @transform_0(%arg0: i32, %arg1: i32, %arg2: i32) -> (i32, i32, i32, i32) {
    %c0_i32 = arith.constant 0 : i32
    %c0_i32_0 = arith.constant 0 : i32
    %c0_i32_1 = arith.constant 0 : i32
    %c0_i32_2 = arith.constant 0 : i32
    return %arg0, %c0_i32, %c0_i32_0, %c0_i32_1 : i32, i32, i32, i32
  }
  func.func @transform_1(%arg0: i32, %arg1: i32, %arg2: i32) -> (i32, i32) {
    %c0_i32 = arith.constant 0 : i32
    %c0_i32_0 = arith.constant 0 : i32
    return %c0_i32, %arg1 : i32, i32
  }
  func.func @transform_2(%arg0: i32, %arg1: i32, %arg2: i32) -> (i32, i32) {
    %c0_i32 = arith.constant 0 : i32
    %c0_i32_0 = arith.constant 0 : i32
    return %c0_i32, %arg1 : i32, i32
  }
  func.func @transform_3(%arg0: i32, %arg1: i32, %arg2: i32) -> (i32, i32, i32, i32) {
    %c0_i32 = arith.constant 0 : i32
    %c0_i32_0 = arith.constant 0 : i32
    return %arg0, %arg2, %c0_i32, %arg1 : i32, i32, i32, i32
  }
}

</mosaic_0001>

<bundles_post_ra>
// kernel: conv_layer_forward.1
= control target key start
LH: loop header
LB: loop body
LE: loop exit
PB: predicated region body
PF: predicated region fallthrough
CT: control target
= control target key end

     0   :  { %s2769_s12 = smov 0   ;;  %s2771_s13 = smov 0   ;;  %s4267_s0 = inlined_call_operand.vmem [shape: f32[2,18,18,4], index: 0, kind: input, shape index: {}]   ;;  %s4268_s1 = inlined_call_operand.vmem [shape: f32[36,8], index: 1, kind: input, shape index: {}]   ;;  %s4269_s2 = inlined_call_operand.vmem [shape: f32[1,8], index: 2, kind: input, shape index: {}]   ;;  %s4270_s3 = inlined_call_operand.vmem [shape: f32[2,16,16,8], index: 3, kind: output, shape index: {}]  }
   0x1   :  { %s2773_s14 = smov 0  }
   0x2 LB: > { %s32_s15 = sadd.s32 1, %s2735_s13  ;;  %p2342_p0 = scmp.ge.s32.totalorder %s2739_s14, 1  ;;  %s2739_s14 = sphi %s2773_s14, %s13_s14   ;;  %s2735_s13 = sphi %s2771_s13, %s4420_s13   ;;  %s2731_s12 = sphi %s2769_s12, %s4419_s12  }
   0x3   : > { %p34_p1 = scmp.ge.s32.totalorder %s32_s15, 2  ;;  %p177_p2 = scmp.lt.s32.totalorder %s2739_s14, 3 }
   0x5   : > { %s4422_s15 = smov (%p34_p1, %s32_s15), 0  ;;  %p178_p3 = pnand %p2342_p0, %p177_p2 }
   0x7   : > { %181 = sbr.rel (%p178_p3) target bundleno = 861 (0x35d), region = 32 }
   0xe   : > { %p216_p4 = scmp.lt.s32.totalorder %s2731_s12, 1  ;;  %s2741_s20 = smov 4   ;;  %vm1563_vm0 = vcmask 31744   ;;  %vm1936_vm1 = vcmask 1043456   ;;  %vm1596_vm2 = vcmask 64512   ;;  %vm1629_vm3 = vcmask 97280  }
   0xf   : > { %s2742_s21 = smov 8   ;;  %s2743_s22 = smov 12   ;;  %vm1662_vm4 = vcmask 130048   ;;  %vm1695_vm5 = vcmask 162816   ;;  %vm1728_vm6 = vcmask 195584   ;;  %vm1761_vm7 = vcmask 228352  }
  0x10   : > { %s4424_s12 = smov (!%p216_p4, %s2731_s12), 1  ;;  %s2744_s23 = smov 16   ;;  %vm1794_vm8 = vcmask 261120   ;;  %vm1839_vm9 = vcmask 293888  }
  0x11   : > { %s2684_s16 = smul.u32 432, %s4424_s12  ;;  %s2745_s24 = smov 20  }
  0x12   : > { %s2746_s25 = smov 24   ;;  %s2747_s30 = smov 28  }
  0x13   : > { %s2793_s19 = scalar_lea.vmem %s4267_s0, %s2684_s16  ;;  %s2748_s10 = smov 32  }
  0x14   : > { %v2796_v0 = vld [vmem:[%s2793_s19 + $0x19] sm:$0xff]  ;;  %v277_v1 = vld [vmem:[%s2793_s19 + $0x1] sm:$0xff]  ;;  %v278_v3 = vld [vmem:[%s2793_s19 + $0x9] sm:$0xff]  ;;  %s2574_s11 = sshll.u32 %s4424_s12, 8 }
  0x15   : > { %575 = vrot.lane.b32.xlu1 %v2796_v0, %s2741_s20  ;;  %571 = vrot.lane.b32.xlu0 %v277_v1, %s2741_s20  ;;  %v2803_v2 = vld [vmem:[%s2793_s19 + $0x21] sm:$0xff]  ;;  %v2810_v4 = vld [vmem:[%s2793_s19 + $0x39] sm:$0xff] }
  0x16   : > { %v2813_v5 = vld [vmem:[%s2793_s19 + $0x31] sm:$0xff]  ;;  %v2823_v7 = vld [vmem:[%s2793_s19 + $0x49] sm:$0xff]  ;;  %v2831_v9 = vld [vmem:[%s2793_s19 + $0x61] sm:$0xff] }
  0x17   : > { %v2820_v6 = vld [vmem:[%s2793_s19 + $0x51] sm:$0xff]  ;;  %v286_v8 = vld [vmem:[%s2793_s19 + $0x69] sm:$0xff]  ;;  %4305 = vst [vmem:[#allocation2_spill] sm:$0xff] %v2831_v9  ;;  %v288_v10 = vld [vmem:[%s2793_s19 + $0x81] sm:$0xff] }
  0x18   : > { %v287_v11 = vld [vmem:[%s2793_s19 + $0x79] sm:$0xff]  ;;  %v289_v13 = vld [vmem:[%s2793_s19 + $0x91] sm:$0xff]  ;;  %v291_v15 = vld [vmem:[%s2793_s19 + $0xa9] sm:$0xff] }
  0x19   : > { %577 = vrot.lane.b32.xlu1 %v2803_v2, %s2741_s20  ;;  %573 = vrot.lane.b32.xlu0 %v278_v3, %s2741_s20  ;;  %v290_v12 = vld [vmem:[%s2793_s19 + $0x99] sm:$0xff]  ;;  %v292_v14 = vld [vmem:[%s2793_s19 + $0xb1] sm:$0xff] }
  0x1a   : > { %v294_v16 = vld [vmem:[%s2793_s19 + $0xc9] sm:$0xff]  ;;  %v293_v17 = vld [vmem:[%s2793_s19 + $0xc1] sm:$0xff]  ;;  %v2856_v19 = vld [vmem:[%s2793_s19 + $0xd9] sm:$0xff] }
  0x1b   : > { %v2853_v18 = vld [vmem:[%s2793_s19 + $0xe1] sm:$0xff]  ;;  %v2863_v20 = vld [vmem:[%s2793_s19 + $0xf9] sm:$0xff]  ;;  %v2866_v21 = vld [vmem:[%s2793_s19 + $0xf1] sm:$0xff] }
  0x1c   : > { %v2873_v22 = vld [vmem:[%s2793_s19 + $0x111] sm:$0xff]  ;;  %v2876_v23 = vld [vmem:[%s2793_s19 + $0x109] sm:$0xff]  ;;  %v2886_v25 = vld [vmem:[%s2793_s19 + $0x121] sm:$0xff] }
  0x1d   : > { %581 = vrot.lane.b32.xlu1 %v2810_v4, %s2741_s20  ;;  %579 = vrot.lane.b32.xlu0 %v2813_v5, %s2741_s20  ;;  %v2883_v24 = vld [vmem:[%s2793_s19 + $0x129] sm:$0xff]  ;;  %4307 = vst [vmem:[#allocation4_spill] sm:$0xff] %v2886_v25  ;;  %v304_v26 = vld [vmem:[%s2793_s19 + $0x141] sm:$0xff] }
  0x1e   : > { %4306 = vst [vmem:[#allocation3_spill] sm:$0xff] %v2883_v24  ;;  %v303_v27 = vld [vmem:[%s2793_s19 + $0x139] sm:$0xff]  ;;  %v305_v29 = vld [vmem:[%s2793_s19 + $0x151] sm:$0xff]  ;;  %v307_v31 = vld [vmem:[%s2793_s19 + $0x169] sm:$0xff] }
  0x1f   : > { %v306_v28 = vld [vmem:[%s2793_s19 + $0x159] sm:$0xff]  ;;  %v308_v30 = vld [vmem:[%s2793_s19 + $0x171] sm:$0xff]  ;;  %v309_v33 = vld [vmem:[%s2793_s19 + $0x2] sm:$0xff] }
  0x20   : > { %v310_v32 = vld [vmem:[%s2793_s19 + $0xa] sm:$0xff]  ;;  %v2909_v34 = vld [vmem:[%s2793_s19 + $0x22] sm:$0xff]  ;;  %v2912_v35 = vld [vmem:[%s2793_s19 + $0x1a] sm:$0xff] }
  0x21   : > { %585 = vrot.lane.b32.xlu1 %v2820_v6, %s2741_s20  ;;  %583 = vrot.lane.b32.xlu0 %v2823_v7, %s2741_s20  ;;  %v2919_v36 = vld [vmem:[%s2793_s19 + $0x3a] sm:$0xff]  ;;  %v2922_v37 = vld [vmem:[%s2793_s19 + $0x32] sm:$0xff] }
  0x22   : > { %v2929_v38 = vld [vmem:[%s2793_s19 + $0x52] sm:$0xff]  ;;  %v2932_v39 = vld [vmem:[%s2793_s19 + $0x4a] sm:$0xff]  ;;  %v2942_v41 = vld [vmem:[%s2793_s19 + $0x62] sm:$0xff] }
  0x23   : > { %v2939_v40 = vld [vmem:[%s2793_s19 + $0x6a] sm:$0xff]  ;;  %4309 = vst [vmem:[#allocation6_spill] sm:$0xff] %v2942_v41  ;;  %v320_v42 = vld [vmem:[%s2793_s19 + $0x82] sm:$0xff]  ;;  %v319_v43 = vld [vmem:[%s2793_s19 + $0x7a] sm:$0xff] }
  0x24   : > { %4308 = vst [vmem:[#allocation5_spill] sm:$0xff] %v2939_v40  ;;  %v322_v44 = vld [vmem:[%s2793_s19 + $0x9a] sm:$0xff]  ;;  %v321_v45 = vld [vmem:[%s2793_s19 + $0x92] sm:$0xff]  ;;  %v323_v47 = vld [vmem:[%s2793_s19 + $0xaa] sm:$0xff] }
  0x25   : > { %589 = vrot.lane.b32.xlu1 %v286_v8, %s2741_s20  ;;  %587 = vrot.lane.b32.xlu0 %v2831_v9, %s2741_s20  ;;  %v324_v46 = vld [vmem:[%s2793_s19 + $0xb2] sm:$0xff]  ;;  %v326_v48 = vld [vmem:[%s2793_s19 + $0xca] sm:$0xff] }
  0x26   : > { %v325_v49 = vld [vmem:[%s2793_s19 + $0xc2] sm:$0xff]  ;;  %v2968_v51 = vld [vmem:[%s2793_s19 + $0xda] sm:$0xff]  ;;  %v2978_v53 = vld [vmem:[%s2793_s19 + $0xf2] sm:$0xff] }
  0x27   : > { %v2965_v50 = vld [vmem:[%s2793_s19 + $0xe2] sm:$0xff]  ;;  %v2975_v52 = vld [vmem:[%s2793_s19 + $0xfa] sm:$0xff]  ;;  %v2985_v54 = vld [vmem:[%s2793_s19 + $0x112] sm:$0xff] }
  0x28   : > { %v2988_v55 = vld [vmem:[%s2793_s19 + $0x10a] sm:$0xff]  ;;  %v2998_v57 = vld [vmem:[%s2793_s19 + $0x122] sm:$0xff]  ;;  %v3006_v59 = vld [vmem:[%s2793_s19 + $0x13a] sm:$0xff] }
  0x29   : > { %593 = vrot.lane.b32.xlu1 %v288_v10, %s2741_s20  ;;  %591 = vrot.lane.b32.xlu0 %v287_v11, %s2741_s20  ;;  %v2995_v56 = vld [vmem:[%s2793_s19 + $0x12a] sm:$0xff]  ;;  %4311 = vst [vmem:[#allocation8_spill] sm:$0xff] %v2998_v57  ;;  %v336_v58 = vld [vmem:[%s2793_s19 + $0x142] sm:$0xff]  ;;  %4312 = vst [vmem:[#allocation9_spill] sm:$0xff] %v3006_v59 }
  0x2a   : > { %4310 = vst [vmem:[#allocation7_spill] sm:$0xff] %v2995_v56  ;;  %v338_v62 = vld [vmem:[%s2793_s19 + $0x15a] sm:$0xff]  ;;  %v337_v63 = vld [vmem:[%s2793_s19 + $0x152] sm:$0xff]  ;;  %v339_v10 = vld [vmem:[%s2793_s19 + $0x16a] sm:$0xff] }
  0x2b   : > { %v340_v8 = vld [vmem:[%s2793_s19 + $0x172] sm:$0xff] }
  0x2d   : > { %597 = vrot.lane.b32.xlu1 %v290_v12, %s2741_s20  ;;  %595 = vrot.lane.b32.xlu0 %v289_v13, %s2741_s20 }
  0x31   : > { %601 = vrot.lane.b32.xlu1 %v292_v14, %s2741_s20  ;;  %599 = vrot.lane.b32.xlu0 %v291_v15, %s2741_s20  ;;  %v3036_v15 = vld [vmem:[%s2793_s19 + $0x18] sm:$0xff] }
  0x32   : > { %4317 = vst [vmem:[#allocation14_spill] sm:$0xff] %v3036_v15 }
  0x35   : > { %605 = vrot.lane.b32.xlu1 %v294_v16, %s2741_s20  ;;  %603 = vrot.lane.b32.xlu0 %v293_v17, %s2741_s20  ;;  %v3039_v16 = vld [vmem:[%s2793_s19 + $0x20] sm:$0xff] }
  0x36   : > { %4318 = vst [vmem:[#allocation15_spill] sm:$0xff] %v3039_v16 }
  0x39   : > { %609 = vrot.lane.b32.xlu1 %v2853_v18, %s2741_s20  ;;  %607 = vrot.lane.b32.xlu0 %v2856_v19, %s2741_s20 }
  0x3d   : > { %613 = vrot.lane.b32.xlu1 %v2863_v20, %s2741_s20  ;;  %611 = vrot.lane.b32.xlu0 %v2866_v21, %s2741_s20 }
  0x41   : > { %617 = vrot.lane.b32.xlu1 %v2873_v22, %s2741_s20  ;;  %615 = vrot.lane.b32.xlu0 %v2876_v23, %s2741_s20 }
  0x45   : > { %621 = vrot.lane.b32.xlu1 %v2883_v24, %s2741_s20  ;;  %619 = vrot.lane.b32.xlu0 %v2886_v25, %s2741_s20 }
  0x49   : > { %625 = vrot.lane.b32.xlu1 %v304_v26, %s2741_s20  ;;  %623 = vrot.lane.b32.xlu0 %v303_v27, %s2741_s20  ;;  %v3050_v27 = vld [vmem:[%s2793_s19 + $0x38] sm:$0xff] }
  0x4d   : > { %629 = vrot.lane.b32.xlu1 %v306_v28, %s2741_s20  ;;  %627 = vrot.lane.b32.xlu0 %v305_v29, %s2741_s20  ;;  %v3053_v28 = vld [vmem:[%s2793_s19 + $0x30] sm:$0xff] }
  0x51   : > { %633 = vrot.lane.b32.xlu1 %v308_v30, %s2741_s20  ;;  %631 = vrot.lane.b32.xlu0 %v307_v31, %s2741_s20  ;;  %v3064_v31 = vld [vmem:[%s2793_s19 + $0x50] sm:$0xff]  ;;  %s4096_s20 = scalar_lea.vmem %s4270_s3, %s2574_s11 }
  0x55   : > { %701 = vrot.lane.b32.xlu1 %v310_v32, %s2742_s21  ;;  %699 = vrot.lane.b32.xlu0 %v309_v33, %s2742_s21  ;;  %v3067_v32 = vld [vmem:[%s2793_s19 + $0x48] sm:$0xff]  ;;  %v258_v33 = vld [vmem:[%s2793_s19 + $0x98] sm:$0xff] }
  0x59   : > { %705 = vrot.lane.b32.xlu1 %v2909_v34, %s2742_s21  ;;  %703 = vrot.lane.b32.xlu0 %v2912_v35, %s2742_s21 }
  0x5d   : > { %709 = vrot.lane.b32.xlu1 %v2919_v36, %s2742_s21  ;;  %707 = vrot.lane.b32.xlu0 %v2922_v37, %s2742_s21 }
  0x61   : > { %713 = vrot.lane.b32.xlu1 %v2929_v38, %s2742_s21  ;;  %711 = vrot.lane.b32.xlu0 %v2932_v39, %s2742_s21 }
  0x65   : > { %717 = vrot.lane.b32.xlu1 %v2939_v40, %s2742_s21  ;;  %715 = vrot.lane.b32.xlu0 %v2942_v41, %s2742_s21  ;;  %v3185_v41 = vld [vmem:[%s2793_s19 + $0x120] sm:$0xff] }
  0x66   : > { %4335 = vst [vmem:[#allocation32_spill] sm:$0xff] %v3185_v41 }
  0x69   : > { %721 = vrot.lane.b32.xlu1 %v320_v42, %s2742_s21  ;;  %719 = vrot.lane.b32.xlu0 %v319_v43, %s2742_s21  ;;  %v257_v42 = vld [vmem:[%s2793_s19 + $0x90] sm:$0xff] }
  0x6d   : > { %725 = vrot.lane.b32.xlu1 %v322_v44, %s2742_s21  ;;  %723 = vrot.lane.b32.xlu0 %v321_v45, %s2742_s21  ;;  %v3076_v45 = vld [vmem:[%s2793_s19 + $0x68] sm:$0xff] }
  0x71   : > { %729 = vrot.lane.b32.xlu1 %v324_v46, %s2742_s21  ;;  %727 = vrot.lane.b32.xlu0 %v323_v47, %s2742_s21  ;;  %v3079_v46 = vld [vmem:[%s2793_s19 + $0x60] sm:$0xff] }
  0x75   : > { %733 = vrot.lane.b32.xlu1 %v326_v48, %s2742_s21  ;;  %731 = vrot.lane.b32.xlu0 %v325_v49, %s2742_s21  ;;  %v260_v49 = vld [vmem:[%s2793_s19 + $0xb0] sm:$0xff] }
  0x79   : > { %737 = vrot.lane.b32.xlu1 %v2965_v50, %s2742_s21  ;;  %735 = vrot.lane.b32.xlu0 %v2968_v51, %s2742_s21 }
  0x7d   : > { %741 = vrot.lane.b32.xlu1 %v2975_v52, %s2742_s21  ;;  %739 = vrot.lane.b32.xlu0 %v2978_v53, %s2742_s21 }
  0x81   : > { %745 = vrot.lane.b32.xlu1 %v2985_v54, %s2742_s21  ;;  %743 = vrot.lane.b32.xlu0 %v2988_v55, %s2742_s21 }
  0x85   : > { %749 = vrot.lane.b32.xlu1 %v2995_v56, %s2742_s21  ;;  %747 = vrot.lane.b32.xlu0 %v2998_v57, %s2742_s21  ;;  %v3182_v56 = vld [vmem:[%s2793_s19 + $0x128] sm:$0xff]  ;;  %v276_v57 = vld [vmem:[%s2793_s19 + $0x170] sm:$0xff] }
  0x86   : > { %4334 = vst [vmem:[#allocation31_spill] sm:$0xff] %v3182_v56 }
  0x87   : > { %v3008_v60 = vpop.permute.xlu1 %575  ;;  %v3010_v61 = vpop.permute.xlu0 %571 }
  0x88   : > { %4313 = vst [vmem:[#allocation10_spill] sm:$0xff] %v3008_v60  ;;  %4314 = vst [vmem:[#allocation11_spill] sm:$0xff] %v3010_v61 }
  0x89   : > { %753 = vrot.lane.b32.xlu1 %v336_v58, %s2742_s21  ;;  %751 = vrot.lane.b32.xlu0 %v3006_v59, %s2742_s21  ;;  %v259_v58 = vld [vmem:[%s2793_s19 + $0xa8] sm:$0xff]  ;;  %v3157_v59 = vld [vmem:[%s2793_s19 + $0xf0] sm:$0xff] }
  0x8b   : > { %v3017_v1 = vpop.permute.xlu1 %577  ;;  %v3019_v3 = vpop.permute.xlu0 %573 }
  0x8c   : > { %4315 = vst [vmem:[#allocation12_spill] sm:$0xff] %v3017_v1  ;;  %4316 = vst [vmem:[#allocation13_spill] sm:$0xff] %v3019_v3  ;;  %v3129_v3 = vld [vmem:[%s2793_s19 + $0xc0] sm:$0xff] }
  0x8d   : > { %757 = vrot.lane.b32.xlu1 %v338_v62, %s2742_s21  ;;  %755 = vrot.lane.b32.xlu0 %v337_v63, %s2742_s21  ;;  %4324 = vst [vmem:[#allocation21_spill] sm:$0xff] %v3129_v3 }
  0x8f   : > { %v3025_v11 = vpop.permute.xlu1 %581  ;;  %v3027_v12 = vpop.permute.xlu0 %579 }
  0x91   : > { %761 = vrot.lane.b32.xlu1 %v340_v8, %s2742_s21  ;;  %759 = vrot.lane.b32.xlu0 %v339_v10, %s2742_s21  ;;  %v3094_v8 = vld [vmem:[%s2793_s19 + $0x80] sm:$0xff]  ;;  %v3097_v10 = vld [vmem:[%s2793_s19 + $0x78] sm:$0xff] }
  0x93   : > { %v3031_v13 = vpop.permute.xlu1 %585  ;;  %v3033_v14 = vpop.permute.xlu0 %583 }
  0x95   : > { %829 = vrot.lane.b32.xlu1 %v3039_v16, %s2743_s22  ;;  %827 = vrot.lane.b32.xlu0 %v3036_v15, %s2743_s22 }
  0x97   : > { %v3045_v17 = vpop.permute.xlu1 %589  ;;  %v3047_v26 = vpop.permute.xlu0 %587 }
  0x99   : > { %833 = vrot.lane.b32.xlu1 %v3050_v27, %s2743_s22  ;;  %831 = vrot.lane.b32.xlu0 %v3053_v28, %s2743_s22 }
  0x9b   : > { %v3059_v29 = vpop.permute.xlu1 %593  ;;  %v3061_v30 = vpop.permute.xlu0 %591 }
  0x9d   : > { %837 = vrot.lane.b32.xlu1 %v3064_v31, %s2743_s22  ;;  %835 = vrot.lane.b32.xlu0 %v3067_v32, %s2743_s22 }
  0x9f   : > { %v598_v43 = vpop.permute.xlu1 %597  ;;  %v596_v44 = vpop.permute.xlu0 %595 }
  0xa0   : > { %v3082_v47 = vsel %vm1563_vm0, %v258_v33, %v598_v43  ;;  %v3085_v48 = vsel %vm1563_vm0, %v257_v42, %v596_v44 }
  0xa1   : > { %841 = vrot.lane.b32.xlu1 %v3076_v45, %s2743_s22  ;;  %839 = vrot.lane.b32.xlu0 %v3079_v46, %s2743_s22 }
  0xa3   : > { %v602_v62 = vpop.permute.xlu1 %601  ;;  %v600_v63 = vpop.permute.xlu0 %599 }
  0xa4   : > { %v3100_v43 = vsel %vm1563_vm0, %v260_v49, %v602_v62  ;;  %v3103_v44 = vsel %vm1563_vm0, %v259_v58, %v600_v63 }
  0xa5   : > { %845 = vrot.lane.b32.xlu1 %v3094_v8, %s2743_s22  ;;  %843 = vrot.lane.b32.xlu0 %v3097_v10, %s2743_s22 }
  0xa7   : > { %v3109_v16 = vpop.permute.xlu1 %605  ;;  %v3111_v1 = vpop.permute.xlu0 %603 }
  0xa8   : > { %4319 = vst [vmem:[#allocation16_spill] sm:$0xff] %v3109_v16  ;;  %4320 = vst [vmem:[#allocation17_spill] sm:$0xff] %v3111_v1  ;;  %v3126_v16 = vld [vmem:[%s2793_s19 + $0xc8] sm:$0xff] }
  0xa9   : > { %849 = vrot.lane.b32.xlu1 %v258_v33, %s2743_s22  ;;  %847 = vrot.lane.b32.xlu0 %v257_v42, %s2743_s22  ;;  %4323 = vst [vmem:[#allocation20_spill] sm:$0xff] %v3126_v16  ;;  %v3171_v1 = vld [vmem:[%s2793_s19 + $0x108] sm:$0xff] }
  0xab   : > { %v3115_v62 = vpop.permute.xlu1 %609  ;;  %v3117_v63 = vpop.permute.xlu0 %607 }
  0xac   : > { %4321 = vst [vmem:[#allocation18_spill] sm:$0xff] %v3115_v62  ;;  %4322 = vst [vmem:[#allocation19_spill] sm:$0xff] %v3117_v63 }
  0xad   : > { %853 = vrot.lane.b32.xlu1 %v260_v49, %s2743_s22  ;;  %851 = vrot.lane.b32.xlu0 %v259_v58, %s2743_s22  ;;  %v3140_v49 = vld [vmem:[%s2793_s19 + $0xe0] sm:$0xff]  ;;  %v3143_v58 = vld [vmem:[%s2793_s19 + $0xd8] sm:$0xff] }
  0xae   : > { %4326 = vst [vmem:[#allocation23_spill] sm:$0xff] %v3140_v49  ;;  %4327 = vst [vmem:[#allocation24_spill] sm:$0xff] %v3143_v58 }
  0xaf   : > { %v3121_v15 = vpop.permute.xlu1 %613  ;;  %v3123_v60 = vpop.permute.xlu0 %611 }
  0xb1   : > { %857 = vrot.lane.b32.xlu1 %v3126_v16, %s2743_s22  ;;  %855 = vrot.lane.b32.xlu0 %v3129_v3, %s2743_s22  ;;  %v3154_v16 = vld [vmem:[%s2793_s19 + $0xf8] sm:$0xff]  ;;  %v3168_v3 = vld [vmem:[%s2793_s19 + $0x110] sm:$0xff] }
  0xb3   : > { %v3135_v33 = vpop.permute.xlu1 %617  ;;  %v3137_v42 = vpop.permute.xlu0 %615 }
  0xb4   : > { %4325 = vst [vmem:[#allocation22_spill] sm:$0xff] %v3137_v42 }
  0xb5   : > { %861 = vrot.lane.b32.xlu1 %v3140_v49, %s2743_s22  ;;  %859 = vrot.lane.b32.xlu0 %v3143_v58, %s2743_s22 }
  0xb7   : > { %v3149_v62 = vpop.permute.xlu1 %621  ;;  %v3151_v63 = vpop.permute.xlu0 %619 }
  0xb8   : > { %4328 = vst [vmem:[#allocation25_spill] sm:$0xff] %v3149_v62  ;;  %4329 = vst [vmem:[#allocation26_spill] sm:$0xff] %v3151_v63  ;;  %v3215_v63 = vld [vmem:[%s2793_s19 + $0x150] sm:$0xff] }
  0xb9   : > { %865 = vrot.lane.b32.xlu1 %v3154_v16, %s2743_s22  ;;  %863 = vrot.lane.b32.xlu0 %v3157_v59, %s2743_s22  ;;  %4343 = vst [vmem:[#allocation40_spill] sm:$0xff] %v3215_v63 }
  0xbb   : > { %v3163_v49 = vpop.permute.xlu1 %625  ;;  %v3165_v58 = vpop.permute.xlu0 %623 }
  0xbc   : > { %4330 = vst [vmem:[#allocation27_spill] sm:$0xff] %v3163_v49  ;;  %4331 = vst [vmem:[#allocation28_spill] sm:$0xff] %v3165_v58 }
  0xbd   : > { %869 = vrot.lane.b32.xlu1 %v3168_v3, %s2743_s22  ;;  %867 = vrot.lane.b32.xlu0 %v3171_v1, %s2743_s22 }
  0xbf   : > { %v3177_v61 = vpop.permute.xlu1 %629  ;;  %v3179_v40 = vpop.permute.xlu0 %627 }
  0xc0   : > { %4332 = vst [vmem:[#allocation29_spill] sm:$0xff] %v3177_v61  ;;  %4333 = vst [vmem:[#allocation30_spill] sm:$0xff] %v3179_v40  ;;  %v3195_v61 = vld [vmem:[%s2793_s19 + $0x140] sm:$0xff]  ;;  %v3198_v40 = vld [vmem:[%s2793_s19 + $0x138] sm:$0xff] }
  0xc1   : > { %873 = vrot.lane.b32.xlu1 %v3182_v56, %s2743_s22  ;;  %871 = vrot.lane.b32.xlu0 %v3185_v41, %s2743_s22  ;;  %4337 = vst [vmem:[#allocation34_spill] sm:$0xff] %v3195_v61  ;;  %4338 = vst [vmem:[#allocation35_spill] sm:$0xff] %v3198_v40 }
  0xc3   : > { %v634_v24 = vpop.permute.xlu1 %633  ;;  %v3192_v25 = vpop.permute.xlu0 %631 }
  0xc4   : > { %4336 = vst [vmem:[#allocation33_spill] sm:$0xff] %v3192_v25  ;;  %v3201_v58 = vsel %vm1563_vm0, %v276_v57, %v634_v24  ;;  %v3212_v25 = vld [vmem:[%s2793_s19 + $0x158] sm:$0xff] }
  0xc5   : > { %4339 = vst [vmem:[#allocation36_spill] sm:$0xff] %v3201_v58  ;;  %877 = vrot.lane.b32.xlu1 %v3195_v61, %s2743_s22  ;;  %875 = vrot.lane.b32.xlu0 %v3198_v40, %s2743_s22  ;;  %4342 = vst [vmem:[#allocation39_spill] sm:$0xff] %v3212_v25  ;;  %v3226_v61 = vld [vmem:[%s2793_s19 + $0x168] sm:$0xff] }
  0xc6   : > { %4346 = vst [vmem:[#allocation43_spill] sm:$0xff] %v3226_v61 }
  0xc7   : > { %v3207_v49 = vpop.permute.xlu1 %701  ;;  %v3209_v41 = vpop.permute.xlu0 %699 }
  0xc8   : > { %4340 = vst [vmem:[#allocation37_spill] sm:$0xff] %v3207_v49  ;;  %4341 = vst [vmem:[#allocation38_spill] sm:$0xff] %v3209_v41  ;;  %v2377_v49 = vld [vmem:[%s2793_s19 + $0x188] sm:$0xff]  ;;  %v2376_v41 = vld [vmem:[%s2793_s19 + $0x180] sm:$0xff] }
  0xc9   : > { %881 = vrot.lane.b32.xlu1 %v3212_v25, %s2743_s22  ;;  %879 = vrot.lane.b32.xlu0 %v3215_v63, %s2743_s22 }
  0xcb   : > { %v3221_v24 = vpop.permute.xlu1 %705  ;;  %v3223_v58 = vpop.permute.xlu0 %703 }
  0xcc   : > { %4344 = vst [vmem:[#allocation41_spill] sm:$0xff] %v3221_v24  ;;  %4345 = vst [vmem:[#allocation42_spill] sm:$0xff] %v3223_v58 }
  0xcd   : > { %885 = vrot.lane.b32.xlu1 %v276_v57, %s2743_s22  ;;  %883 = vrot.lane.b32.xlu0 %v3226_v61, %s2743_s22 }
  0xcf   : > { %v3233_v40 = vpop.permute.xlu1 %709  ;;  %v3235_v56 = vpop.permute.xlu0 %707 }
  0xd1   : > { %889 = vrot.lane.b32.xlu1 %v2377_v49, %s2743_s22  ;;  %887 = vrot.lane.b32.xlu0 %v2376_v41, %s2743_s22 }
  0xd3   : > { %v3239_v24 = vpop.permute.xlu1 %713  ;;  %v3241_v58 = vpop.permute.xlu0 %711 }
  0xd5   : > { %957 = vrot.lane.b32.xlu1 %v2803_v2, %s2744_s23  ;;  %955 = vrot.lane.b32.xlu0 %v2796_v0, %s2744_s23 }
  0xd7   : > { %v3247_v57 = vpop.permute.xlu1 %717  ;;  %v3249_v61 = vpop.permute.xlu0 %715 }
  0xd9   : > { %961 = vrot.lane.b32.xlu1 %v2810_v4, %s2744_s23  ;;  %959 = vrot.lane.b32.xlu0 %v2813_v5, %s2744_s23 }
  0xdb   : > { %v3255_v41 = vpop.permute.xlu1 %721  ;;  %v3257_v49 = vpop.permute.xlu0 %719 }
  0xdd   : > { %965 = vrot.lane.b32.xlu1 %v2820_v6, %s2744_s23  ;;  %963 = vrot.lane.b32.xlu0 %v2823_v7, %s2744_s23 }
  0xdf   : > { %v3263_v0 = vpop.permute.xlu1 %725  ;;  %v3265_v2 = vpop.permute.xlu0 %723 }
  0xe1   : > { %987 = vrot.lane.b32.xlu1 %v2856_v19, %s2744_s23  ;;  %967 = vrot.lane.b32.xlu0 %v2831_v9, %s2744_s23 }
  0xe3   : > { %v3271_v63 = vpop.permute.xlu1 %729  ;;  %v3273_v25 = vpop.permute.xlu0 %727 }
  0xe5   : > { %1083 = vrot.lane.b32.xlu1 %v2912_v35, %s2745_s24  ;;  %989 = vrot.lane.b32.xlu0 %v2853_v18, %s2744_s23 }
  0xe7   : > { %v3279_v62 = vpop.permute.xlu1 %733  ;;  %v3281_v42 = vpop.permute.xlu0 %731 }
  0xe8   : > { %4347 = vst [vmem:[#allocation44_spill] sm:$0xff] %v3279_v62  ;;  %4348 = vst [vmem:[#allocation45_spill] sm:$0xff] %v3281_v42  ;;  %v1829_v62 = vld [vmem:[%s4268_s1 + $0x10] sm:$0xff] }
  0xe9   : > { %1085 = vrot.lane.b32.xlu1 %v2909_v34, %s2745_s24  ;;  %1115 = vrot.lane.b32.xlu0 %v2968_v51, %s2745_s24  ;;  %v1827_v34 = vld [vmem:[%s4268_s1] sm:$0xff]  ;;  %v1828_v51 = vld [vmem:[%s4268_s1 + $0x8] sm:$0xff] }
  0xeb   : > { %v3287_v19 = vpop.permute.xlu1 %737  ;;  %v3289_v9 = vpop.permute.xlu0 %735 }
  0xec   : > { %4349 = vst [vmem:[#allocation46_spill] sm:$0xff] %v3287_v19  ;;  %4350 = vst [vmem:[#allocation47_spill] sm:$0xff] %v3289_v9  ;;  %v2670_v19 = vpack.c.bf16 %v1828_v51, %v1827_v34  ;;  %v1830_v34 = vld [vmem:[%s4268_s1 + $0x18] sm:$0xff] }
  0xed   : > { %1211 = vrot.lane.b32.xlu1 %v3053_v28, %s2746_s25  ;;  %1117 = vrot.lane.b32.xlu0 %v2965_v50, %s2745_s24  ;;  %v2674_v51 = vpack.c.bf16 %v1830_v34, %v1829_v62 }
  0xee   : > { %2671 = vmatprep.subr.bf16.mxu0 %v2670_v19  ;;  %2678 = vmatprep.subr.bf16.mxu1 %v2670_v19 }
  0xef   : > { %v3295_v18 = vpop.permute.xlu1 %741  ;;  %v3297_v35 = vpop.permute.xlu0 %739  ;;  %2673 = vmatpush3.bf16.msra.mxu0 %v2670_v19  ;;  %2681 = vmatpush3.bf16.msra.mxu1 %v2670_v19 }
  0xf0   : > { %2675 = vmatprep.subr.bf16.mxu0 %v2674_v51  ;;  %2679 = vmatprep.subr.bf16.mxu1 %v2674_v51 }
  0xf1   : > { %1213 = vrot.lane.b32.xlu1 %v3050_v27, %s2746_s25  ;;  %1243 = vrot.lane.b32.xlu0 %v3157_v59, %s2746_s25 }
  0xf3   : > { %v3309_v50 = vpop.permute.xlu1 %745  ;;  %v3311_v9 = vpop.permute.xlu0 %743  ;;  %2677 = vmatpush3.bf16.msra.mxu0 %v2674_v51  ;;  %2682 = vmatpush3.bf16.msra.mxu1 %v2674_v51 }
  0xf4   : > { %4351 = vst [vmem:[#allocation48_spill] sm:$0xff] %v3311_v9 }
  0xf5   : > { %1339 = vrot.lane.b32.xlu1 %v2813_v5, %s2747_s30  ;;  %1245 = vrot.lane.b32.xlu0 %v3154_v16, %s2746_s25  ;;  %v1831_v5 = vld [vmem:[%s4268_s1 + $0x20] sm:$0xf] }
  0xf6   : > { %2620 = vmatprep.subr.msk.mxu0 %vm1936_vm1, %v1831_v5  ;;  %2680 = vmatprep.subr.msk.mxu1 %vm1936_vm1, %v1831_v5 }
  0xf7   : > { %v3323_v42 = vpop.permute.xlu1 %749  ;;  %v3325_v9 = vpop.permute.xlu0 %747  ;;  %2621 = vmatpush3.msk.msra.mxu0 %vm1936_vm1, %v1831_v5  ;;  %2683 = vmatpush3.msk.msra.mxu1 %vm1936_vm1, %v1831_v5 }
  0xf9   : > { %991 = vrot.lane.b32.xlu1 %v2866_v21, %s2744_s23  ;;  %1371 = vrot.lane.b32.xlu0 %v2866_v21, %s2747_s30 }
  0xfb   : > { %v3334_v62 = vpop.permute.xlu1 %753  ;;  %v3336_v19 = vpop.permute.xlu0 %751 }
  0xfc   : > { %4352 = vst [vmem:[#allocation49_spill] sm:$0xff] %v3336_v19 }
  0xfd   : > { %1373 = vrot.lane.b32.xlu1 %v2863_v20, %s2747_s30  ;;  %1341 = vrot.lane.b32.xlu0 %v2810_v4, %s2747_s30 }
  0xff   : > { %v3342_v21 = vpop.permute.xlu1 %757  ;;  %v3344_v34 = vpop.permute.xlu0 %755 }
 0x100   : > { %4353 = vst [vmem:[#allocation50_spill] sm:$0xff] %v3344_v34 }
 0x101   : > { %1499 = vrot.lane.b32.xlu1 %v2978_v53, %s2748_s10  ;;  %1467 = vrot.lane.b32.xlu0 %v2922_v37, %s2748_s10 }
 0x103   : > { %v3350_v51 = vpop.permute.xlu1 %761  ;;  %v3352_v19 = vpop.permute.xlu0 %759 }
 0x104   : > { %4354 = vst [vmem:[#allocation51_spill] sm:$0xff] %v3350_v51 }
 0x105   : > { %1087 = vrot.lane.b32.xlu1 %v2922_v37, %s2745_s24  ;;  %993 = vrot.lane.b32.xlu0 %v2863_v20, %s2744_s23  ;;  %v1569_v20 = vsel %vm1563_vm0, %v3050_v27, %v3025_v11  ;;  %v1568_v37 = vsel %vm1563_vm0, %v3053_v28, %v3027_v12 }
 0x107   : > { %v3358_v4 = vpop.permute.xlu1 %829  ;;  %v3360_v5 = vpop.permute.xlu0 %827 }
 0x108   : > { %4355 = vst [vmem:[#allocation52_spill] sm:$0xff] %v3358_v4  ;;  %4356 = vst [vmem:[#allocation53_spill] sm:$0xff] %v3360_v5 }
 0x109   : > { %1469 = vrot.lane.b32.xlu1 %v2919_v36, %s2748_s10  ;;  %1119 = vrot.lane.b32.xlu0 %v2978_v53, %s2745_s24  ;;  %v1602_v53 = vsel %vm1596_vm2, %v1569_v20, %v3233_v40  ;;  %v1571_v40 = vsel %vm1563_vm0, %v3064_v31, %v3031_v13  ;;  %v1573_v13 = vsel %vm1563_vm0, %v3076_v45, %v3045_v17 }
 0x10a   : > { %v1604_v11 = vsel %vm1596_vm2, %v1571_v40, %v3239_v24  ;;  %v1575_v17 = vsel %vm1563_vm0, %v3094_v8, %v3059_v29  ;;  %v1610_v29 = vsel %vm1596_vm2, %v3082_v47, %v3263_v0  ;;  %v1611_v47 = vsel %vm1596_vm2, %v3103_v44, %v3273_v25 }
 0x10b   : > { %v3366_v34 = vpop.permute.xlu1 %833  ;;  %v3368_v51 = vpop.permute.xlu0 %831 }
 0x10c   : > { %4357 = vst [vmem:[#allocation54_spill] sm:$0xff] %v3366_v34  ;;  %4358 = vst [vmem:[#allocation55_spill] sm:$0xff] %v3368_v51  ;;  %v1601_v34 = vsel %vm1596_vm2, %v1568_v37, %v3235_v56  ;;  %v1570_v56 = vsel %vm1563_vm0, %v3067_v32, %v3033_v14  ;;  %v1572_v14 = vsel %vm1563_vm0, %v3079_v46, %v3047_v26 }
 0x10d   : > { %1089 = vrot.lane.b32.xlu1 %v2919_v36, %s2745_s24  ;;  %1501 = vrot.lane.b32.xlu0 %v2975_v52, %s2748_s10  ;;  %v1603_v12 = vsel %vm1596_vm2, %v1570_v56, %v3241_v58  ;;  %v1605_v58 = vsel %vm1596_vm2, %v1572_v14, %v3249_v61  ;;  %v1574_v61 = vsel %vm1563_vm0, %v3097_v10, %v3061_v30 }
 0x10e   : > { %v1608_v26 = vsel %vm1596_vm2, %v1575_v17, %v3255_v41  ;;  %v1609_v30 = vsel %vm1596_vm2, %v3085_v48, %v3265_v2 }
 0x10f   : > { %v838_v36 = vpop.permute.xlu1 %837  ;;  %v836_v51 = vpop.permute.xlu0 %835 }
 0x110   : > { %v3385_v4 = vsel %vm1629_vm3, %v1602_v53, %v838_v36  ;;  %v3388_v5 = vsel %vm1629_vm3, %v1601_v34, %v836_v51 }
 0x111   : > { %1215 = vrot.lane.b32.xlu1 %v3067_v32, %s2746_s25  ;;  %1121 = vrot.lane.b32.xlu0 %v2975_v52, %s2745_s24  ;;  %v1606_v32 = vsel %vm1596_vm2, %v1573_v13, %v3247_v57  ;;  %v1607_v57 = vsel %vm1596_vm2, %v1574_v61, %v3257_v49 }
 0x113   : > { %v842_v27 = vpop.permute.xlu1 %841  ;;  %v840_v28 = vpop.permute.xlu0 %839 }
 0x114   : > { %v3405_v34 = vsel %vm1629_vm3, %v1604_v11, %v842_v27  ;;  %v3408_v52 = vsel %vm1629_vm3, %v1603_v12, %v840_v28 }
 0x115   : > { %1217 = vrot.lane.b32.xlu1 %v3064_v31, %s2746_s25  ;;  %1247 = vrot.lane.b32.xlu0 %v3171_v1, %s2746_s25 }
 0x117   : > { %v846_v24 = vpop.permute.xlu1 %845  ;;  %v844_v51 = vpop.permute.xlu0 %843 }
 0x118   : > { %v3425_v31 = vsel %vm1629_vm3, %v1606_v32, %v846_v24  ;;  %v3428_v20 = vsel %vm1629_vm3, %v1605_v58, %v844_v51  ;;  %v4366_v24 = vld [vmem:[#allocation32_spill] sm:$0xff] }
 0x119   : > { %1343 = vrot.lane.b32.xlu1 %v2823_v7, %s2747_s30  ;;  %1249 = vrot.lane.b32.xlu0 %v3168_v3, %s2746_s25 }
 0x11b   : > { %v850_v37 = vpop.permute.xlu1 %849  ;;  %v848_v53 = vpop.permute.xlu0 %847 }
 0x11c   : > { %v3445_v7 = vsel %vm1629_vm3, %v1608_v26, %v850_v37  ;;  %v3448_v36 = vsel %vm1629_vm3, %v1607_v57, %v848_v53  ;;  %v4367_v37 = vld [vmem:[#allocation27_spill] sm:$0xff]  ;;  %v4368_v53 = vld [vmem:[#allocation34_spill] sm:$0xff] }
 0x11d   : > { %995 = vrot.lane.b32.xlu1 %v2876_v23, %s2744_s23  ;;  %1375 = vrot.lane.b32.xlu0 %v2876_v23, %s2747_s30  ;;  %v1612_v23 = vsel %vm1596_vm2, %v3100_v43, %v3271_v63  ;;  %v1585_v63 = vsel %vm1563_vm0, %v3154_v16, %v3121_v15 }
 0x11f   : > { %v854_v41 = vpop.permute.xlu1 %853  ;;  %v852_v49 = vpop.permute.xlu0 %851 }
 0x120   : > { %v3461_v40 = vsel %vm1629_vm3, %v1610_v29, %v854_v41  ;;  %v3464_v56 = vsel %vm1629_vm3, %v1609_v30, %v852_v49  ;;  %v4369_v29 = vld [vmem:[#allocation28_spill] sm:$0xff]  ;;  %v4371_v49 = vld [vmem:[#allocation49_spill] sm:$0xff] }
 0x121   : > { %1377 = vrot.lane.b32.xlu1 %v2873_v22, %s2747_s30  ;;  %1345 = vrot.lane.b32.xlu0 %v2820_v6, %s2747_s30 }
 0x123   : > { %v858_v48 = vpop.permute.xlu1 %857  ;;  %v856_v0 = vpop.permute.xlu0 %855 }
 0x124   : > { %v3477_v2 = vsel %vm1629_vm3, %v1612_v23, %v858_v48  ;;  %v3480_v11 = vsel %vm1629_vm3, %v1611_v47, %v856_v0 }
 0x125   : > { %4359 = vst [vmem:[#allocation56_spill] sm:$0xff] %v3477_v2  ;;  %4360 = vst [vmem:[#allocation57_spill] sm:$0xff] %v3480_v11  ;;  %1503 = vrot.lane.b32.xlu1 %v2988_v55, %s2748_s10  ;;  %1471 = vrot.lane.b32.xlu0 %v2932_v39, %s2748_s10  ;;  %v4394_v2 = vld [vmem:[#allocation53_spill] sm:$0xff] }
 0x127   : > { %v3486_v6 = vpop.permute.xlu1 %861  ;;  %v3488_v43 = vpop.permute.xlu0 %859 }
 0x129   : > { %1091 = vrot.lane.b32.xlu1 %v2932_v39, %s2745_s24  ;;  %997 = vrot.lane.b32.xlu0 %v2873_v22, %s2744_s23  ;;  %v1584_v39 = vsel %vm1563_vm0, %v3157_v59, %v3123_v60  ;;  %v1618_v22 = vsel %vm1596_vm2, %v1585_v63, %v3295_v18  ;;  %v1587_v59 = vsel %vm1563_vm0, %v3168_v3, %v3135_v33  ;;  %v4361_v60 = vld [vmem:[#allocation22_spill] sm:$0xff]  ;;  %v4362_v18 = vld [vmem:[#allocation48_spill] sm:$0xff]  ;;  %v4364_v3 = vld [vmem:[#allocation31_spill] sm:$0xff] }
 0x12a   : > { %v1617_v12 = vsel %vm1596_vm2, %v1584_v39, %v3297_v35  ;;  %v1586_v15 = vsel %vm1563_vm0, %v3171_v1, %v4361_v60  ;;  %v1620_v16 = vsel %vm1596_vm2, %v1587_v59, %v3309_v50  ;;  %v4363_v1 = vld [vmem:[#allocation25_spill] sm:$0xff]  ;;  %v4365_v50 = vld [vmem:[#allocation26_spill] sm:$0xff] }
 0x12b   : > { %v3494_v25 = vpop.permute.xlu1 %865  ;;  %v3496_v44 = vpop.permute.xlu0 %863  ;;  %v1619_v35 = vsel %vm1596_vm2, %v1586_v15, %v4362_v18  ;;  %v1589_v33 = vsel %vm1563_vm0, %v4364_v3, %v4363_v1  ;;  %v1588_v51 = vsel %vm1563_vm0, %v4366_v24, %v4365_v50  ;;  %v4372_v63 = vld [vmem:[#allocation2_spill] sm:$0xff]  ;;  %v4373_v39 = vld [vmem:[#allocation29_spill] sm:$0xff]  ;;  %v4381_v50 = vld [vmem:[#allocation51_spill] sm:$0xff] }
 0x12c   : > { %v1622_v17 = vsel %vm1596_vm2, %v1589_v33, %v3323_v42  ;;  %v1621_v61 = vsel %vm1596_vm2, %v1588_v51, %v3325_v9  ;;  %v1591_v42 = vsel %vm1563_vm0, %v4368_v53, %v4367_v37  ;;  %v4370_v9 = vld [vmem:[#allocation35_spill] sm:$0xff]  ;;  %v4377_v60 = vld [vmem:[#allocation50_spill] sm:$0xff]  ;;  %v4379_v1 = vld [vmem:[#allocation33_spill] sm:$0xff] }
 0x12d   : > { %1473 = vrot.lane.b32.xlu1 %v2929_v38, %s2748_s10  ;;  %1123 = vrot.lane.b32.xlu0 %v2988_v55, %s2745_s24  ;;  %v1590_v30 = vsel %vm1563_vm0, %v4370_v9, %v4369_v29  ;;  %v1624_v41 = vsel %vm1596_vm2, %v1591_v42, %v3334_v62  ;;  %v4374_v62 = vld [vmem:[#allocation39_spill] sm:$0xff] }
 0x12e   : > { %v1623_v23 = vsel %vm1596_vm2, %v1590_v30, %v4371_v49  ;;  %v2479_v33 = vld [vmem:[%s2793_s19 + $0x69] sm:$0xff] }
 0x12f   : > { %v870_v27 = vpop.permute.xlu1 %869  ;;  %v868_v28 = vpop.permute.xlu0 %867  ;;  %v4384_v42 = vld [vmem:[#allocation3_spill] sm:$0xff] }
 0x130   : > { %v3513_v13 = vsel %vm1629_vm3, %v1618_v22, %v870_v27  ;;  %v3516_v55 = vsel %vm1629_vm3, %v1617_v12, %v868_v28  ;;  %v1593_v22 = vsel %vm1563_vm0, %v4374_v62, %v4373_v39  ;;  %v4375_v12 = vld [vmem:[#allocation30_spill] sm:$0xff]  ;;  %v4376_v27 = vld [vmem:[#allocation40_spill] sm:$0xff] }
 0x131   : > { %1093 = vrot.lane.b32.xlu1 %v2929_v38, %s2745_s24  ;;  %1505 = vrot.lane.b32.xlu0 %v2985_v54, %s2748_s10  ;;  %v1592_v28 = vsel %vm1563_vm0, %v4376_v27, %v4375_v12  ;;  %v1626_v59 = vsel %vm1596_vm2, %v1593_v22, %v3342_v21  ;;  %v4387_v22 = vld [vmem:[#allocation7_spill] sm:$0xff]  ;;  %v4388_v12 = vld [vmem:[#allocation5_spill] sm:$0xff] }
 0x132   : > { %v1625_v15 = vsel %vm1596_vm2, %v1592_v28, %v4377_v60 }
 0x133   : > { %v874_v14 = vpop.permute.xlu1 %873  ;;  %v872_v32 = vpop.permute.xlu0 %871 }
 0x134   : > { %v3533_v38 = vsel %vm1629_vm3, %v1620_v16, %v874_v14  ;;  %v3536_v58 = vsel %vm1629_vm3, %v1619_v35, %v872_v32  ;;  %v4378_v32 = vld [vmem:[#allocation4_spill] sm:$0xff] }
 0x135   : > { %1219 = vrot.lane.b32.xlu1 %v3079_v46, %s2746_s25  ;;  %1125 = vrot.lane.b32.xlu0 %v2985_v54, %s2745_s24 }
 0x137   : > { %v878_v26 = vpop.permute.xlu1 %877  ;;  %v876_v57 = vpop.permute.xlu0 %875 }
 0x138   : > { %v3553_v46 = vsel %vm1629_vm3, %v1622_v17, %v878_v26  ;;  %v3556_v54 = vsel %vm1629_vm3, %v1621_v61, %v876_v57 }
 0x139   : > { %1221 = vrot.lane.b32.xlu1 %v3076_v45, %s2746_s25  ;;  %1251 = vrot.lane.b32.xlu0 %v4366_v24, %s2746_s25  ;;  %v4382_v24 = vld [vmem:[#allocation36_spill] sm:$0xff] }
 0x13a   : > { %v1628_v51 = vsel %vm1596_vm2, %v4382_v24, %v4381_v50  ;;  %v2497_v50 = vld [vmem:[%s2793_s19 + $0x141] sm:$0xff] }
 0x13b   : > { %v882_v47 = vpop.permute.xlu1 %881  ;;  %v880_v48 = vpop.permute.xlu0 %879  ;;  %v2481_v24 = vld [vmem:[%s2793_s19 + $0x81] sm:$0xff] }
 0x13c   : > { %v3573_v45 = vsel %vm1629_vm3, %v1624_v41, %v882_v47  ;;  %v3576_v0 = vsel %vm1629_vm3, %v1623_v23, %v880_v48  ;;  %v4385_v41 = vld [vmem:[#allocation8_spill] sm:$0xff] }
 0x13d   : > { %1347 = vrot.lane.b32.xlu1 %v4372_v63, %s2747_s30  ;;  %1253 = vrot.lane.b32.xlu0 %v4364_v3, %s2746_s25  ;;  %v4380_v3 = vld [vmem:[#allocation43_spill] sm:$0xff] }
 0x13e   : > { %v1594_v21 = vsel %vm1563_vm0, %v4380_v3, %v4379_v1  ;;  %v2480_v1 = vld [vmem:[%s2793_s19 + $0x79] sm:$0xff] }
 0x13f   : > { %v886_v16 = vpop.permute.xlu1 %885  ;;  %v884_v18 = vpop.permute.xlu0 %883  ;;  %v1627_v17 = vsel %vm1596_vm2, %v1594_v21, %v3352_v19  ;;  %v4386_v19 = vld [vmem:[#allocation6_spill] sm:$0xff] }
 0x140   : > { %v3593_v35 = vsel %vm1629_vm3, %v1626_v59, %v886_v16  ;;  %v3596_v14 = vsel %vm1629_vm3, %v1625_v15, %v884_v18 }
 0x141   : > { %999 = vrot.lane.b32.xlu1 %v4378_v32, %s2744_s23  ;;  %1379 = vrot.lane.b32.xlu0 %v4378_v32, %s2747_s30  ;;  %v2496_v32 = vld [vmem:[%s2793_s19 + $0x139] sm:$0xff] }
 0x143   : > { %v890_v61 = vpop.permute.xlu1 %889  ;;  %v888_v26 = vpop.permute.xlu0 %887 }
 0x144   : > { %v3612_v57 = vsel %vm1629_vm3, %v1628_v51, %v890_v61  ;;  %v3615_v37 = vsel %vm1629_vm3, %v1627_v17, %v888_v26  ;;  %v4389_v17 = vld [vmem:[#allocation11_spill] sm:$0xff]  ;;  %v4390_v26 = vld [vmem:[#allocation17_spill] sm:$0xff] }
 0x145   : > { %4383 = vst [vmem:[#allocation22_spill] sm:$0xff] %v3612_v57  ;;  %1381 = vrot.lane.b32.xlu1 %v4384_v42, %s2747_s30  ;;  %1349 = vrot.lane.b32.xlu0 %v2479_v33, %s2747_s30 }
 0x147   : > { %v3620_v29 = vpop.permute.xlu1 %957  ;;  %v956_v30 = vpop.permute.xlu0 %955 }
 0x149   : > { %1507 = vrot.lane.b32.xlu1 %v4385_v41, %s2748_s10  ;;  %1475 = vrot.lane.b32.xlu0 %v4386_v19, %s2748_s10 }
 0x14b   : > { %v3626_v49 = vpop.permute.xlu1 %961  ;;  %v3628_v23 = vpop.permute.xlu0 %959 }
 0x14d   : > { %1001 = vrot.lane.b32.xlu1 %v4384_v42, %s2744_s23  ;;  %969 = vrot.lane.b32.xlu0 %v2479_v33, %s2744_s23  ;;  %v4391_v42 = vld [vmem:[#allocation21_spill] sm:$0xff] }
 0x14f   : > { %v3633_v47 = vpop.permute.xlu1 %965  ;;  %v3635_v48 = vpop.permute.xlu0 %963 }
 0x151   : > { %1127 = vrot.lane.b32.xlu1 %v4385_v41, %s2745_s24  ;;  %1095 = vrot.lane.b32.xlu0 %v4386_v19, %s2745_s24  ;;  %v1580_v41 = vsel %vm1563_vm0, %v4391_v42, %v4390_v26  ;;  %v4392_v19 = vld [vmem:[#allocation38_spill] sm:$0xff] }
 0x153   : > { %v988_v63 = vpop.permute.xlu1 %987  ;;  %v3641_v39 = vpop.permute.xlu0 %967 }
 0x155   : > { %1509 = vrot.lane.b32.xlu1 %v4387_v22, %s2748_s10  ;;  %1477 = vrot.lane.b32.xlu0 %v4388_v12, %s2748_s10 }
 0x157   : > { %v1084_v28 = vpop.permute.xlu1 %1083  ;;  %v3647_v59 = vpop.permute.xlu0 %989 }
 0x159   : > { %1129 = vrot.lane.b32.xlu1 %v4387_v22, %s2745_s24  ;;  %1097 = vrot.lane.b32.xlu0 %v4388_v12, %s2745_s24  ;;  %v4393_v12 = vld [vmem:[#allocation45_spill] sm:$0xff] }
 0x15b   : > { %v3653_v60 = vpop.permute.xlu1 %1085  ;;  %v1116_v15 = vpop.permute.xlu0 %1115 }
 0x15d   : > { %1255 = vrot.lane.b32.xlu1 %v4370_v9, %s2746_s25  ;;  %1223 = vrot.lane.b32.xlu0 %v3097_v10, %s2746_s25 }
 0x15f   : > { %v1212_v16 = vpop.permute.xlu1 %1211  ;;  %v3659_v18 = vpop.permute.xlu0 %1117 }
 0x161   : > { %1257 = vrot.lane.b32.xlu1 %v4368_v53, %s2746_s25  ;;  %1225 = vrot.lane.b32.xlu0 %v3094_v8, %s2746_s25  ;;  %v245_v53 = vld [vmem:[%s2793_s19] sm:$0xff] }
 0x162   : > { %v1564_v61 = vsel %vm1563_vm0, %v245_v53, %v4389_v17 }
 0x163   : > { %v1214_v21 = vpop.permute.xlu1 %1213  ;;  %v1244_v33 = vpop.permute.xlu0 %1243  ;;  %v1597_v22 = vsel %vm1596_vm2, %v1564_v61, %v4392_v19  ;;  %v4395_v19 = vld [vmem:[#allocation9_spill] sm:$0xff] }
 0x164   : > { %v1630_v53 = vsel %vm1629_vm3, %v1597_v22, %v4394_v2  ;;  %v246_v2 = vld [vmem:[%s2793_s19 + $0x8] sm:$0xff] }
 0x165   : > { %1383 = vrot.lane.b32.xlu1 %v2496_v32, %s2747_s30  ;;  %1351 = vrot.lane.b32.xlu0 %v2480_v1, %s2747_s30  ;;  %v1663_v57 = vsel %vm1662_vm4, %v1630_v53, %v956_v30 }
 0x166   : > { %v1696_v61 = vsel %vm1695_vm5, %v1663_v57, %v1084_v28 }
 0x167   : > { %v1340_v10 = vpop.permute.xlu1 %1339  ;;  %v3669_v9 = vpop.permute.xlu0 %1245 }
 0x169   : > { %1003 = vrot.lane.b32.xlu1 %v2496_v32, %s2744_s23  ;;  %971 = vrot.lane.b32.xlu0 %v2480_v1, %s2744_s23  ;;  %v1613_v32 = vsel %vm1596_vm2, %v1580_v41, %v4393_v12  ;;  %v2512_v1 = vld [vmem:[%s2793_s19 + $0x7a] sm:$0xff] }
 0x16a   : > { %v1646_v17 = vsel %vm1629_vm3, %v1613_v32, %v3488_v43  ;;  %v1729_v43 = vsel %vm1728_vm6, %v1696_v61, %v1212_v16  ;;  %v4397_v16 = vld [vmem:[#allocation37_spill] sm:$0xff] }
 0x16b   : > { %v3676_v8 = vpop.permute.xlu1 %991  ;;  %v1372_v51 = vpop.permute.xlu0 %1371  ;;  %v1679_v11 = vsel %vm1662_vm4, %v1646_v17, %v988_v63  ;;  %v1762_v30 = vsel %vm1761_vm7, %v1729_v43, %v1340_v10  ;;  %v2434_v10 = vld [vmem:[%s2793_s19 + $0x13a] sm:$0xff]  ;;  %v4401_v43 = vld [vmem:[#allocation44_spill] sm:$0xff] }
 0x16c   : > { %v1712_v41 = vsel %vm1695_vm5, %v1679_v11, %v1116_v15  ;;  %v4396_v15 = vld [vmem:[#allocation13_spill] sm:$0xff] }
 0x16d   : > { %1385 = vrot.lane.b32.xlu1 %v2497_v50, %s2747_s30  ;;  %1353 = vrot.lane.b32.xlu0 %v2481_v24, %s2747_s30  ;;  %v1745_v22 = vsel %vm1728_vm6, %v1712_v41, %v1244_v33  ;;  %v1565_v32 = vsel %vm1563_vm0, %v246_v2, %v4396_v15  ;;  %v4399_v41 = vld [vmem:[#allocation16_spill] sm:$0xff] }
 0x16e   : > { %v1778_v63 = vsel %vm1761_vm7, %v1745_v22, %v1372_v51  ;;  %v1598_v33 = vsel %vm1596_vm2, %v1565_v32, %v4397_v16  ;;  %v4398_v51 = vld [vmem:[#allocation52_spill] sm:$0xff] }
 0x16f   : > { %v1374_v26 = vpop.permute.xlu1 %1373  ;;  %v1342_v42 = vpop.permute.xlu0 %1341  ;;  %v1631_v53 = vsel %vm1629_vm3, %v1598_v33, %v4398_v51  ;;  %v2498_v51 = vld [vmem:[%s2793_s19 + $0x151] sm:$0xff] }
 0x171   : > { %1511 = vrot.lane.b32.xlu1 %v4395_v19, %s2748_s10  ;;  %1479 = vrot.lane.b32.xlu0 %v2512_v1, %s2748_s10 }
 0x173   : > { %v1500_v12 = vpop.permute.xlu1 %1499  ;;  %v1468_v57 = vpop.permute.xlu0 %1467 }
 0x174   : > { %v1795_v11 = vsel %vm1794_vm8, %v1762_v30, %v1468_v57  ;;  %v1811_v28 = vsel %vm1794_vm8, %v1778_v63, %v1500_v12  ;;  %v2529_v63 = vld [vmem:[%s2793_s19 + $0x142] sm:$0xff] }
 0x175   : > { %1005 = vrot.lane.b32.xlu1 %v2497_v50, %s2744_s23  ;;  %973 = vrot.lane.b32.xlu0 %v2481_v24, %s2744_s23  ;;  %v1664_v50 = vsel %vm1662_vm4, %v1631_v53, %v3620_v29  ;;  %v4400_v24 = vld [vmem:[#allocation20_spill] sm:$0xff]  ;;  %v2513_v12 = vld [vmem:[%s2793_s19 + $0x82] sm:$0xff] }
 0x176   : > { %2622 = vmatprep.mubr.msk.f32.mxu0 %vm1839_vm9, %v1795_v11  ;;  %2646 = vmatprep.mubr.msk.f32.mxu1 %vm1839_vm9, %v1811_v28  ;;  %v1581_v19 = vsel %vm1563_vm0, %v4400_v24, %v4399_v41  ;;  %v1697_v2 = vsel %vm1695_vm5, %v1664_v50, %v3653_v60  ;;  %v2482_v53 = vld [vmem:[%s2793_s19 + $0x91] sm:$0xff] }
 0x177   : > { %v1088_v17 = vpop.permute.xlu1 %1087  ;;  %v3719_v61 = vpop.permute.xlu0 %993  ;;  %v1614_v22 = vsel %vm1596_vm2, %v1581_v19, %v4401_v43  ;;  %v1730_v30 = vsel %vm1728_vm6, %v1697_v2, %v1214_v21  ;;  %v4402_v19 = vld [vmem:[#allocation10_spill] sm:$0xff] }
 0x178   : > { %v1647_v29 = vsel %vm1629_vm3, %v1614_v22, %v3486_v6  ;;  %v1763_v57 = vsel %vm1761_vm7, %v1730_v30, %v1342_v42  ;;  %v4403_v2 = vld [vmem:[#allocation14_spill] sm:$0xff]  ;;  %v4405_v22 = vld [vmem:[#allocation24_spill] sm:$0xff] }
 0x179   : > { %1131 = vrot.lane.b32.xlu1 %v2434_v10, %s2745_s24  ;;  %1099 = vrot.lane.b32.xlu0 %v2512_v1, %s2745_s24  ;;  %v1680_v60 = vsel %vm1662_vm4, %v1647_v29, %v3647_v59  ;;  %v1566_v43 = vsel %vm1563_vm0, %v4403_v2, %v4402_v19  ;;  %v4407_v29 = vld [vmem:[#allocation47_spill] sm:$0xff]  ;;  %v2530_v19 = vld [vmem:[%s2793_s19 + $0x152] sm:$0xff] }
 0x17a   : > { %v1713_v15 = vsel %vm1695_vm5, %v1680_v60, %v3659_v18  ;;  %v2450_v18 = vld [vmem:[%s2793_s19 + $0x90] sm:$0xff]  ;;  %v2483_v60 = vld [vmem:[%s2793_s19 + $0x99] sm:$0xff] }
 0x17b   : > { %v1470_v11 = vpop.permute.xlu1 %1469  ;;  %v1120_v28 = vpop.permute.xlu0 %1119  ;;  %v1746_v6 = vsel %vm1728_vm6, %v1713_v15, %v3669_v9  ;;  %v2514_v2 = vld [vmem:[%s2793_s19 + $0x92] sm:$0xff] }
 0x17c   : > { %v1796_v1 = vsel %vm1794_vm8, %v1763_v57, %v1470_v11  ;;  %v1779_v21 = vsel %vm1761_vm7, %v1746_v6, %v1374_v26  ;;  %v2451_v26 = vld [vmem:[%s2793_s19 + $0x98] sm:$0xff] }
 0x17d   : > { %1513 = vrot.lane.b32.xlu1 %v2529_v63, %s2748_s10  ;;  %1481 = vrot.lane.b32.xlu0 %v2513_v12, %s2748_s10  ;;  %v2499_v11 = vld [vmem:[%s2793_s19 + $0x159] sm:$0xff] }
 0x17e   : > { %2623 = vmatmul.mubr.msk.f32.vlgmr.msra.gmra.mrb[0].mxu0 %vm1839_vm9, %v1796_v1  ;;  %v4408_v1 = vld [vmem:[#allocation55_spill] sm:$0xff] }
 0x17f   : > { %v3749_v42 = vpop.permute.xlu1 %1089  ;;  %v1502_v59 = vpop.permute.xlu0 %1501 }
 0x180   : > { %v1812_v32 = vsel %vm1794_vm8, %v1779_v21, %v1502_v59 }
 0x181   : > { %1133 = vrot.lane.b32.xlu1 %v2529_v63, %s2745_s24  ;;  %1101 = vrot.lane.b32.xlu0 %v2513_v12, %s2745_s24  ;;  %v4406_v63 = vld [vmem:[#allocation42_spill] sm:$0xff] }
 0x182   : > { %2647 = vmatmul.mubr.msk.f32.vlgmr.msra.gmra.mrb[0].mxu1 %vm1839_vm9, %v1812_v32  ;;  %v1599_v12 = vsel %vm1596_vm2, %v1566_v43, %v4406_v63 }
 0x183   : > { %v1216_v16 = vpop.permute.xlu1 %1215  ;;  %v3756_v9 = vpop.permute.xlu0 %1121  ;;  %v1632_v15 = vsel %vm1629_vm3, %v1599_v12, %v4408_v1  ;;  %v4413_v1 = vld [vmem:[#allocation18_spill] sm:$0xff] }
 0x184   : > { %v1665_v32 = vsel %vm1662_vm4, %v1632_v15, %v3628_v23  ;;  %v4414_v15 = vld [vmem:[#allocation23_spill] sm:$0xff] }
 0x185   : > { %1259 = vrot.lane.b32.xlu1 %v4376_v27, %s2746_s25  ;;  %1227 = vrot.lane.b32.xlu0 %v2450_v18, %s2746_s25 }
 0x187   : > { %v1218_v33 = vpop.permute.xlu1 %1217  ;;  %v1248_v10 = vpop.permute.xlu0 %1247 }
 0x189   : > { %1261 = vrot.lane.b32.xlu1 %v4374_v62, %s2746_s25  ;;  %1229 = vrot.lane.b32.xlu0 %v2451_v26, %s2746_s25  ;;  %v4404_v62 = vld [vmem:[#allocation19_spill] sm:$0xff]  ;;  %v1698_v26 = vsel %vm1695_vm5, %v1665_v32, %v1088_v17 }
 0x18a   : > { %v1582_v30 = vsel %vm1563_vm0, %v4405_v22, %v4404_v62  ;;  %v4409_v22 = vld [vmem:[#allocation12_spill] sm:$0xff] }
 0x18b   : > { %v1344_v50 = vpop.permute.xlu1 %1343  ;;  %v1250_v41 = vpop.permute.xlu0 %1249  ;;  %v1615_v57 = vsel %vm1596_vm2, %v1582_v30, %v4407_v29  ;;  %v4410_v30 = vld [vmem:[#allocation15_spill] sm:$0xff] }
 0x18c   : > { %v1648_v6 = vsel %vm1629_vm3, %v1615_v57, %v3496_v44  ;;  %v1567_v63 = vsel %vm1563_vm0, %v4410_v30, %v4409_v22 }
 0x18d   : > { %1387 = vrot.lane.b32.xlu1 %v2498_v51, %s2747_s30  ;;  %1355 = vrot.lane.b32.xlu0 %v2482_v53, %s2747_s30  ;;  %v1681_v18 = vsel %vm1662_vm4, %v1648_v6, %v3676_v8  ;;  %v1583_v6 = vsel %vm1563_vm0, %v4414_v15, %v4413_v1 }
 0x18f   : > { %v3769_v27 = vpop.permute.xlu1 %995  ;;  %v1376_v24 = vpop.permute.xlu0 %1375 }
 0x190   : > { %v1683_v1 = vsel %vm1662_vm4, %v3516_v55, %v3769_v27 }
 0x191   : > { %1007 = vrot.lane.b32.xlu1 %v2498_v51, %s2744_s23  ;;  %975 = vrot.lane.b32.xlu0 %v2482_v53, %s2744_s23  ;;  %v1714_v51 = vsel %vm1695_vm5, %v1681_v18, %v1120_v28  ;;  %v1731_v53 = vsel %vm1728_vm6, %v1698_v26, %v1216_v16  ;;  %v4411_v16 = vld [vmem:[#allocation41_spill] sm:$0xff]  ;;  %v4415_v18 = vld [vmem:[#allocation46_spill] sm:$0xff] }
 0x192   : > { %v1747_v44 = vsel %vm1728_vm6, %v1714_v51, %v1248_v10  ;;  %v1764_v43 = vsel %vm1761_vm7, %v1731_v53, %v1344_v50  ;;  %v1600_v10 = vsel %vm1596_vm2, %v1567_v63, %v4411_v16  ;;  %v4412_v50 = vld [vmem:[#allocation54_spill] sm:$0xff]  ;;  %v1616_v26 = vsel %vm1596_vm2, %v1583_v6, %v4415_v18  ;;  %v2500_v63 = vld [vmem:[%s2793_s19 + $0x169] sm:$0xff] }
 0x193   : > { %v1378_v21 = vpop.permute.xlu1 %1377  ;;  %v1346_v59 = vpop.permute.xlu0 %1345  ;;  %v1780_v23 = vsel %vm1761_vm7, %v1747_v44, %v1376_v24  ;;  %v1633_v24 = vsel %vm1629_vm3, %v1600_v10, %v4412_v50  ;;  %v2484_v16 = vld [vmem:[%s2793_s19 + $0xa9] sm:$0xff] }
 0x194   : > { %v1666_v57 = vsel %vm1662_vm4, %v1633_v24, %v3626_v49  ;;  %v1649_v49 = vsel %vm1629_vm3, %v1616_v26, %v3494_v25  ;;  %v2531_v25 = vld [vmem:[%s2793_s19 + $0x15a] sm:$0xff]  ;;  %v2501_v26 = vld [vmem:[%s2793_s19 + $0x171] sm:$0xff] }
 0x195   : > { %1389 = vrot.lane.b32.xlu1 %v2499_v11, %s2747_s30  ;;  %1357 = vrot.lane.b32.xlu0 %v2483_v60, %s2747_s30  ;;  %v1699_v32 = vsel %vm1695_vm5, %v1666_v57, %v3749_v42  ;;  %v1682_v42 = vsel %vm1662_vm4, %v1649_v49, %v3719_v61  ;;  %v1667_v57 = vsel %vm1662_vm4, %v3388_v5, %v3635_v48  ;;  %v2485_v5 = vld [vmem:[%s2793_s19 + $0xb1] sm:$0xff] }
 0x196   : > { %v1732_v51 = vsel %vm1728_vm6, %v1699_v32, %v1218_v33 }
 0x197   : > { %v1504_v62 = vpop.permute.xlu1 %1503  ;;  %v1472_v8 = vpop.permute.xlu0 %1471  ;;  %v1765_v53 = vsel %vm1761_vm7, %v1732_v51, %v1346_v59  ;;  %v2515_v59 = vld [vmem:[%s2793_s19 + $0x9a] sm:$0xff] }
 0x198   : > { %v1813_v17 = vsel %vm1794_vm8, %v1780_v23, %v1504_v62  ;;  %v1797_v28 = vsel %vm1794_vm8, %v1764_v43, %v1472_v8 }
 0x199   : > { %1515 = vrot.lane.b32.xlu1 %v2530_v19, %s2748_s10  ;;  %1483 = vrot.lane.b32.xlu0 %v2514_v2, %s2748_s10 }
 0x19a   : > { %2625 = vmatprep.mubr.msk.f32.mxu0 %vm1839_vm9, %v1797_v28  ;;  %2649 = vmatprep.mubr.msk.f32.mxu1 %vm1839_vm9, %v1813_v17  ;;  %v2469_v17 = vld [vmem:[%s2793_s19 + $0x170] sm:$0xff] }
 0x19b   : > { %v1092_v12 = vpop.permute.xlu1 %1091  ;;  %v3816_v29 = vpop.permute.xlu0 %997  ;;  %v2453_v28 = vld [vmem:[%s2793_s19 + $0xb0] sm:$0xff] }
 0x19c   : > { %v1700_v15 = vsel %vm1695_vm5, %v1667_v57, %v1092_v12 }
 0x19d   : > { %1009 = vrot.lane.b32.xlu1 %v2499_v11, %s2744_s23  ;;  %977 = vrot.lane.b32.xlu0 %v2483_v60, %s2744_s23  ;;  %v1715_v60 = vsel %vm1695_vm5, %v1682_v42, %v3756_v9 }
 0x19e   : > { %v1748_v33 = vsel %vm1728_vm6, %v1715_v60, %v1250_v41 }
 0x19f   : > { %v1474_v44 = vpop.permute.xlu1 %1473  ;;  %v1124_v43 = vpop.permute.xlu0 %1123  ;;  %v1781_v23 = vsel %vm1761_vm7, %v1748_v33, %v1378_v21  ;;  %v2452_v21 = vld [vmem:[%s2793_s19 + $0xa8] sm:$0xff]  ;;  %v1668_v33 = vsel %vm1662_vm4, %v3385_v4, %v3633_v47 }
 0x1a0   : > { %v1798_v11 = vsel %vm1794_vm8, %v1765_v53, %v1474_v44  ;;  %v1716_v6 = vsel %vm1695_vm5, %v1683_v1, %v1124_v43  ;;  %v2532_v53 = vld [vmem:[%s2793_s19 + $0x16a] sm:$0xff]  ;;  %v2502_v1 = vld [vmem:[%s2793_s19 + $0x181] sm:$0xff] }
 0x1a1   : > { %1135 = vrot.lane.b32.xlu1 %v2530_v19, %s2745_s24  ;;  %1103 = vrot.lane.b32.xlu0 %v2514_v2, %s2745_s24  ;;  %v2516_v44 = vld [vmem:[%s2793_s19 + $0xaa] sm:$0xff] }
 0x1a2   : > { %2626 = vmatmul.mubr.msk.f32.gmra.mrb[2].mxu0 %vm1839_vm9, %v1798_v11 }
 0x1a3   : > { %v1094_v61 = vpop.permute.xlu1 %1093  ;;  %v1506_v62 = vpop.permute.xlu0 %1505 }
 0x1a4   : > { %v1814_v8 = vsel %vm1794_vm8, %v1781_v23, %v1506_v62 }
 0x1a5   : > { %1517 = vrot.lane.b32.xlu1 %v2531_v25, %s2748_s10  ;;  %1485 = vrot.lane.b32.xlu0 %v2515_v59, %s2748_s10 }
 0x1a6   : > { %2650 = vmatmul.mubr.msk.f32.gmra.mrb[2].mxu1 %vm1839_vm9, %v1814_v8 }
 0x1a7   : > { %v1220_v9 = vpop.permute.xlu1 %1219  ;;  %v1126_v41 = vpop.permute.xlu0 %1125 }
 0x1a8   : > { %v1733_v32 = vsel %vm1728_vm6, %v1700_v15, %v1220_v9  ;;  %v2486_v15 = vld [vmem:[%s2793_s19 + $0xc1] sm:$0xff] }
 0x1a9   : > { %1137 = vrot.lane.b32.xlu1 %v2531_v25, %s2745_s24  ;;  %1105 = vrot.lane.b32.xlu0 %v2515_v59, %s2745_s24  ;;  %v1684_v25 = vsel %vm1662_vm4, %v3513_v13, %v3816_v29  ;;  %v1701_v59 = vsel %vm1695_vm5, %v1668_v33, %v1094_v61  ;;  %v2518_v33 = vld [vmem:[%s2793_s19 + $0xc2] sm:$0xff] }
 0x1aa   : > { %v1717_v23 = vsel %vm1695_vm5, %v1684_v25, %v1126_v41  ;;  %v2533_v41 = vld [vmem:[%s2793_s19 + $0x172] sm:$0xff] }
 0x1ab   : > { %v1222_v19 = vpop.permute.xlu1 %1221  ;;  %v1252_v2 = vpop.permute.xlu0 %1251 }
 0x1ac   : > { %v1749_v18 = vsel %vm1728_vm6, %v1716_v6, %v1252_v2  ;;  %v1734_v62 = vsel %vm1728_vm6, %v1701_v59, %v1222_v19 }
 0x1ad   : > { %1263 = vrot.lane.b32.xlu1 %v4380_v3, %s2746_s25  ;;  %1231 = vrot.lane.b32.xlu0 %v2452_v21, %s2746_s25  ;;  %v2517_v21 = vld [vmem:[%s2793_s19 + $0xb2] sm:$0xff] }
 0x1af   : > { %v1348_v22 = vpop.permute.xlu1 %1347  ;;  %v1254_v30 = vpop.permute.xlu0 %1253 }
 0x1b0   : > { %v1766_v48 = vsel %vm1761_vm7, %v1733_v32, %v1348_v22  ;;  %v1750_v8 = vsel %vm1728_vm6, %v1717_v23, %v1254_v30  ;;  %v2470_v22 = vld [vmem:[%s2793_s19 + $0x180] sm:$0xff] }
 0x1b1   : > { %1265 = vrot.lane.b32.xlu1 %v2469_v17, %s2746_s25  ;;  %1233 = vrot.lane.b32.xlu0 %v2453_v28, %s2746_s25  ;;  %v2454_v30 = vld [vmem:[%s2793_s19 + $0xc0] sm:$0xff] }
 0x1b3   : > { %v3861_v10 = vpop.permute.xlu1 %999  ;;  %v1380_v50 = vpop.permute.xlu0 %1379 }
 0x1b4   : > { %v1782_v55 = vsel %vm1761_vm7, %v1749_v18, %v1380_v50  ;;  %v2471_v50 = vld [vmem:[%s2793_s19 + $0x188] sm:$0xff] }
 0x1b5   : > { %1391 = vrot.lane.b32.xlu1 %v2500_v63, %s2747_s30  ;;  %1359 = vrot.lane.b32.xlu0 %v2484_v16, %s2747_s30 }
 0x1b7   : > { %v1382_v3 = vpop.permute.xlu1 %1381  ;;  %v1350_v24 = vpop.permute.xlu0 %1349 }
 0x1b8   : > { %v1783_v4 = vsel %vm1761_vm7, %v1750_v8, %v1382_v3  ;;  %v1767_v47 = vsel %vm1761_vm7, %v1734_v62, %v1350_v24  ;;  %v2455_v3 = vld [vmem:[%s2793_s19 + $0xc8] sm:$0xff] }
 0x1b9   : > { %1011 = vrot.lane.b32.xlu1 %v2500_v63, %s2744_s23  ;;  %979 = vrot.lane.b32.xlu0 %v2484_v16, %s2744_s23 }
 0x1bb   : > { %v1508_v27 = vpop.permute.xlu1 %1507  ;;  %v1476_v12 = vpop.permute.xlu0 %1475 }
 0x1bc   : > { %v1815_v51 = vsel %vm1794_vm8, %v1782_v55, %v1508_v27  ;;  %v1799_v49 = vsel %vm1794_vm8, %v1766_v48, %v1476_v12  ;;  %v1685_v48 = vsel %vm1662_vm4, %v3536_v58, %v3861_v10 }
 0x1bd   : > { %1393 = vrot.lane.b32.xlu1 %v2501_v26, %s2747_s30  ;;  %1361 = vrot.lane.b32.xlu0 %v2485_v5, %s2747_s30 }
 0x1be   : > { %2628 = vmatprep.mubr.msk.f32.mxu0 %vm1839_vm9, %v1799_v49  ;;  %2652 = vmatprep.mubr.msk.f32.mxu1 %vm1839_vm9, %v1815_v51  ;;  %v2503_v49 = vld [vmem:[%s2793_s19 + $0x189] sm:$0xff] }
 0x1bf   : > { %v3889_v43 = vpop.permute.xlu1 %1001  ;;  %v3891_v42 = vpop.permute.xlu0 %969 }
 0x1c0   : > { %v1686_v8 = vsel %vm1662_vm4, %v3533_v38, %v3889_v43 }
 0x1c1   : > { %1519 = vrot.lane.b32.xlu1 %v2532_v53, %s2748_s10  ;;  %1487 = vrot.lane.b32.xlu0 %v2516_v44, %s2748_s10 }
 0x1c3   : > { %v1128_v11 = vpop.permute.xlu1 %1127  ;;  %v1096_v60 = vpop.permute.xlu0 %1095 }
 0x1c4   : > { %v1718_v55 = vsel %vm1695_vm5, %v1685_v48, %v1128_v11  ;;  %v2505_v48 = vld [vmem:[%s2793_s19 + $0x1a1] sm:$0xff] }
 0x1c5   : > { %1013 = vrot.lane.b32.xlu1 %v2501_v26, %s2744_s23  ;;  %981 = vrot.lane.b32.xlu0 %v2485_v5, %s2744_s23  ;;  %v1669_v5 = vsel %vm1662_vm4, %v3408_v52, %v3641_v39  ;;  %v2487_v52 = vld [vmem:[%s2793_s19 + $0xc9] sm:$0xff] }
 0x1c6   : > { %v1702_v27 = vsel %vm1695_vm5, %v1669_v5, %v1096_v60  ;;  %v2534_v60 = vld [vmem:[%s2793_s19 + $0x182] sm:$0xff] }
 0x1c7   : > { %v1510_v9 = vpop.permute.xlu1 %1509  ;;  %v1478_v13 = vpop.permute.xlu0 %1477 }
 0x1c8   : > { %v1816_v29 = vsel %vm1794_vm8, %v1783_v4, %v1510_v9  ;;  %v1800_v61 = vsel %vm1794_vm8, %v1767_v47, %v1478_v13  ;;  %v1670_v4 = vsel %vm1662_vm4, %v3405_v34, %v3891_v42 }
 0x1c9   : > { %1139 = vrot.lane.b32.xlu1 %v2532_v53, %s2745_s24  ;;  %1107 = vrot.lane.b32.xlu0 %v2516_v44, %s2745_s24 }
 0x1ca   : > { %2629 = vmatmul.mubr.msk.f32.gmra.mrb[4].mxu0 %vm1839_vm9, %v1800_v61  ;;  %2653 = vmatmul.mubr.msk.f32.gmra.mrb[4].mxu1 %vm1839_vm9, %v1816_v29 }
 0x1cb   : > { %v1130_v19 = vpop.permute.xlu1 %1129  ;;  %v1098_v2 = vpop.permute.xlu0 %1097 }
 0x1cc   : > { %v1719_v47 = vsel %vm1695_vm5, %v1686_v8, %v1130_v19  ;;  %v1703_v9 = vsel %vm1695_vm5, %v1670_v4, %v1098_v2  ;;  %v2519_v19 = vld [vmem:[%s2793_s19 + $0xca] sm:$0xff] }
 0x1cd   : > { %1521 = vrot.lane.b32.xlu1 %v2533_v41, %s2748_s10  ;;  %1489 = vrot.lane.b32.xlu0 %v2517_v21, %s2748_s10 }
 0x1cf   : > { %v1256_v17 = vpop.permute.xlu1 %1255  ;;  %v1224_v28 = vpop.permute.xlu0 %1223 }
 0x1d0   : > { %v1751_v12 = vsel %vm1728_vm6, %v1718_v55, %v1256_v17  ;;  %v1735_v51 = vsel %vm1728_vm6, %v1702_v27, %v1224_v28  ;;  %v2489_v55 = vld [vmem:[%s2793_s19 + $0xe1] sm:$0xff] }
 0x1d1   : > { %1141 = vrot.lane.b32.xlu1 %v2533_v41, %s2745_s24  ;;  %1109 = vrot.lane.b32.xlu0 %v2517_v21, %s2745_s24  ;;  %v2535_v21 = vld [vmem:[%s2793_s19 + $0x18a] sm:$0xff] }
 0x1d3   : > { %v1258_v63 = vpop.permute.xlu1 %1257  ;;  %v1226_v16 = vpop.permute.xlu0 %1225 }
 0x1d4   : > { %v1752_v13 = vsel %vm1728_vm6, %v1719_v47, %v1258_v63  ;;  %v1736_v29 = vsel %vm1728_vm6, %v1703_v9, %v1226_v16  ;;  %v2456_v63 = vld [vmem:[%s2793_s19 + $0xd8] sm:$0xff] }
 0x1d5   : > { %1267 = vrot.lane.b32.xlu1 %v2470_v22, %s2746_s25  ;;  %1235 = vrot.lane.b32.xlu0 %v2454_v30, %s2746_s25  ;;  %v2472_v30 = vld [vmem:[%s2793_s19 + $0x198] sm:$0xff] }
 0x1d7   : > { %v1384_v24 = vpop.permute.xlu1 %1383  ;;  %v1352_v57 = vpop.permute.xlu0 %1351 }
 0x1d8   : > { %v1784_v39 = vsel %vm1761_vm7, %v1751_v12, %v1384_v24  ;;  %v1768_v58 = vsel %vm1761_vm7, %v1735_v51, %v1352_v57  ;;  %v2457_v24 = vld [vmem:[%s2793_s19 + $0xe0] sm:$0xff] }
 0x1d9   : > { %1269 = vrot.lane.b32.xlu1 %v2471_v50, %s2746_s25  ;;  %1237 = vrot.lane.b32.xlu0 %v2455_v3, %s2746_s25  ;;  %v2473_v3 = vld [vmem:[%s2793_s19 + $0x1a0] sm:$0xff] }
 0x1db   : > { %v3931_v6 = vpop.permute.xlu1 %1003  ;;  %v3933_v32 = vpop.permute.xlu0 %971 }
 0x1dc   : > { %v1687_v51 = vsel %vm1662_vm4, %v3556_v54, %v3931_v6  ;;  %v2520_v54 = vld [vmem:[%s2793_s19 + $0xda] sm:$0xff] }
 0x1dd   : > { %1395 = vrot.lane.b32.xlu1 %v2502_v1, %s2747_s30  ;;  %1363 = vrot.lane.b32.xlu0 %v2486_v15, %s2747_s30 }
 0x1df   : > { %v1386_v18 = vpop.permute.xlu1 %1385  ;;  %v1354_v26 = vpop.permute.xlu0 %1353 }
 0x1e0   : > { %v1785_v38 = vsel %vm1761_vm7, %v1752_v13, %v1386_v18  ;;  %v1769_v43 = vsel %vm1761_vm7, %v1736_v29, %v1354_v26  ;;  %v2488_v18 = vld [vmem:[%s2793_s19 + $0xd9] sm:$0xff] }
 0x1e1   : > { %1015 = vrot.lane.b32.xlu1 %v2502_v1, %s2744_s23  ;;  %983 = vrot.lane.b32.xlu0 %v2486_v15, %s2744_s23  ;;  %v2504_v15 = vld [vmem:[%s2793_s19 + $0x199] sm:$0xff] }
 0x1e3   : > { %v1512_v10 = vpop.permute.xlu1 %1511  ;;  %v1480_v53 = vpop.permute.xlu0 %1479 }
 0x1e4   : > { %v1817_v44 = vsel %vm1794_vm8, %v1784_v39, %v1512_v10  ;;  %v1801_v11 = vsel %vm1794_vm8, %v1768_v58, %v1480_v53  ;;  %v2536_v53 = vld [vmem:[%s2793_s19 + $0x19a] sm:$0xff] }
 0x1e5   : > { %1397 = vrot.lane.b32.xlu1 %v2503_v49, %s2747_s30  ;;  %1365 = vrot.lane.b32.xlu0 %v2487_v52, %s2747_s30 }
 0x1e6   : > { %2631 = vmatprep.mubr.msk.f32.mxu0 %vm1839_vm9, %v1801_v11  ;;  %2655 = vmatprep.mubr.msk.f32.mxu1 %vm1839_vm9, %v1817_v44 }
 0x1e7   : > { %v3961_v25 = vpop.permute.xlu1 %1005  ;;  %v3963_v59 = vpop.permute.xlu0 %973 }
 0x1e8   : > { %v1688_v9 = vsel %vm1662_vm4, %v3553_v46, %v3961_v25  ;;  %v1672_v13 = vsel %vm1662_vm4, %v3425_v31, %v3963_v59 }
 0x1e9   : > { %1523 = vrot.lane.b32.xlu1 %v2534_v60, %s2748_s10  ;;  %1491 = vrot.lane.b32.xlu0 %v2518_v33, %s2748_s10 }
 0x1eb   : > { %v1132_v23 = vpop.permute.xlu1 %1131  ;;  %v1100_v62 = vpop.permute.xlu0 %1099 }
 0x1ed   : > { %1017 = vrot.lane.b32.xlu1 %v2503_v49, %s2744_s23  ;;  %985 = vrot.lane.b32.xlu0 %v2487_v52, %s2744_s23  ;;  %v1671_v49 = vsel %vm1662_vm4, %v3428_v20, %v3933_v32  ;;  %v1720_v52 = vsel %vm1695_vm5, %v1687_v51, %v1132_v23  ;;  %v2521_v23 = vld [vmem:[%s2793_s19 + $0xe2] sm:$0xff] }
 0x1ee   : > { %v1704_v39 = vsel %vm1695_vm5, %v1671_v49, %v1100_v62 }
 0x1ef   : > { %v1514_v61 = vpop.permute.xlu1 %1513  ;;  %v1482_v34 = vpop.permute.xlu0 %1481 }
 0x1f0   : > { %v1818_v42 = vsel %vm1794_vm8, %v1785_v38, %v1514_v61  ;;  %v1802_v41 = vsel %vm1794_vm8, %v1769_v43, %v1482_v34 }
 0x1f1   : > { %1143 = vrot.lane.b32.xlu1 %v2534_v60, %s2745_s24  ;;  %1111 = vrot.lane.b32.xlu0 %v2518_v33, %s2745_s24  ;;  %v2537_v33 = vld [vmem:[%s2793_s19 + $0x1a2] sm:$0xff] }
 0x1f2   : > { %2632 = vmatmul.mubr.msk.f32.gmra.mrb[6].mxu0 %vm1839_vm9, %v1802_v41  ;;  %2656 = vmatmul.mubr.msk.f32.gmra.mrb[6].mxu1 %vm1839_vm9, %v1818_v42 }
 0x1f3   : > { %v1134_v2 = vpop.permute.xlu1 %1133  ;;  %v1102_v17 = vpop.permute.xlu0 %1101 }
 0x1f4   : > { %v1721_v29 = vsel %vm1695_vm5, %v1688_v9, %v1134_v2  ;;  %v1705_v38 = vsel %vm1695_vm5, %v1672_v13, %v1102_v17  ;;  %v4091_v13 = vld [vmem:[%s4269_s2] ss:$0 sm:$0xff] }
 0x1f5   : > { %1525 = vrot.lane.b32.xlu1 %v2535_v21, %s2748_s10  ;;  %1493 = vrot.lane.b32.xlu0 %v2519_v19, %s2748_s10 }
 0x1f7   : > { %v1260_v28 = vpop.permute.xlu1 %1259  ;;  %v1228_v22 = vpop.permute.xlu0 %1227 }
 0x1f8   : > { %v1753_v58 = vsel %vm1728_vm6, %v1720_v52, %v1260_v28  ;;  %v1737_v10 = vsel %vm1728_vm6, %v1704_v39, %v1228_v22 }
 0x1f9   : > { %1145 = vrot.lane.b32.xlu1 %v2535_v21, %s2745_s24  ;;  %1113 = vrot.lane.b32.xlu0 %v2519_v19, %s2745_s24 }
 0x1fb   : > { %v1262_v16 = vpop.permute.xlu1 %1261  ;;  %v1230_v50 = vpop.permute.xlu0 %1229 }
 0x1fc   : > { %v1754_v43 = vsel %vm1728_vm6, %v1721_v29, %v1262_v16  ;;  %v1738_v61 = vsel %vm1728_vm6, %v1705_v38, %v1230_v50 }
 0x1fd   : > { %1271 = vrot.lane.b32.xlu1 %v2472_v30, %s2746_s25  ;;  %1239 = vrot.lane.b32.xlu0 %v2456_v63, %s2746_s25 }
 0x1ff   : > { %v1388_v57 = vpop.permute.xlu1 %1387  ;;  %v1356_v1 = vpop.permute.xlu0 %1355 }
 0x200   : > { %v1786_v6 = vsel %vm1761_vm7, %v1753_v58, %v1388_v57  ;;  %v1770_v20 = vsel %vm1761_vm7, %v1737_v10, %v1356_v1 }
 0x201   : > { %1273 = vrot.lane.b32.xlu1 %v2473_v3, %s2746_s25  ;;  %1241 = vrot.lane.b32.xlu0 %v2457_v24, %s2746_s25 }
 0x203   : > { %v4003_v26 = vpop.permute.xlu1 %1007  ;;  %v4005_v5 = vpop.permute.xlu0 %975 }
 0x204   : > { %v1689_v24 = vsel %vm1662_vm4, %v3576_v0, %v4003_v26  ;;  %v1673_v57 = vsel %vm1662_vm4, %v3448_v36, %v4005_v5 }
 0x205   : > { %1399 = vrot.lane.b32.xlu1 %v2504_v15, %s2747_s30  ;;  %1367 = vrot.lane.b32.xlu0 %v2488_v18, %s2747_s30 }
 0x207   : > { %v1390_v27 = vpop.permute.xlu1 %1389  ;;  %v1358_v12 = vpop.permute.xlu0 %1357 }
 0x208   : > { %v1787_v34 = vsel %vm1761_vm7, %v1754_v43, %v1390_v27  ;;  %v1771_v42 = vsel %vm1761_vm7, %v1738_v61, %v1358_v12 }
 0x209   : > { %1401 = vrot.lane.b32.xlu1 %v2505_v48, %s2747_s30  ;;  %1369 = vrot.lane.b32.xlu0 %v2489_v55, %s2747_s30 }
 0x20b   : > { %v1516_v32 = vpop.permute.xlu1 %1515  ;;  %v1484_v44 = vpop.permute.xlu0 %1483 }
 0x20c   : > { %v1819_v11 = vsel %vm1794_vm8, %v1786_v6, %v1516_v32  ;;  %v1803_v60 = vsel %vm1794_vm8, %v1770_v20, %v1484_v44 }
 0x20d   : > { %1527 = vrot.lane.b32.xlu1 %v2536_v53, %s2748_s10  ;;  %1495 = vrot.lane.b32.xlu0 %v2520_v54, %s2748_s10 }
 0x20e   : > { %2634 = vmatprep.mubr.msk.f32.mxu0 %vm1839_vm9, %v1803_v60  ;;  %2658 = vmatprep.mubr.msk.f32.mxu1 %vm1839_vm9, %v1819_v11 }
 0x20f   : > { %v1010_v62 = vpop.permute.xlu1 %1009  ;;  %v978_v8 = vpop.permute.xlu0 %977 }
 0x210   : > { %v1690_v39 = vsel %vm1662_vm4, %v3573_v45, %v1010_v62  ;;  %v1674_v58 = vsel %vm1662_vm4, %v3445_v7, %v978_v8 }
 0x211   : > { %1529 = vrot.lane.b32.xlu1 %v2537_v33, %s2748_s10  ;;  %1497 = vrot.lane.b32.xlu0 %v2521_v23, %s2748_s10 }
 0x213   : > { %v1136_v4 = vpop.permute.xlu1 %1135  ;;  %v1104_v47 = vpop.permute.xlu0 %1103 }
 0x214   : > { %v1722_v1 = vsel %vm1695_vm5, %v1689_v24, %v1136_v4  ;;  %v1706_v15 = vsel %vm1695_vm5, %v1673_v57, %v1104_v47 }
 0x217   : > { %v1518_v41 = vpop.permute.xlu1 %1517  ;;  %v1486_v21 = vpop.permute.xlu0 %1485 }
 0x218   : > { %v1820_v46 = vsel %vm1794_vm8, %v1787_v34, %v1518_v41  ;;  %v1804_v25 = vsel %vm1794_vm8, %v1771_v42, %v1486_v21 }
 0x219   : > { %2635 = vmatmul.mubr.msk.f32.gmra.mrb[8].mxu0 %vm1839_vm9, %v1804_v25  ;;  %2659 = vmatmul.mubr.msk.f32.gmra.mrb[8].mxu1 %vm1839_vm9, %v1820_v46 }
 0x21b   : > { %v1138_v31 = vpop.permute.xlu1 %1137  ;;  %v1106_v59 = vpop.permute.xlu0 %1105 }
 0x21c   : > { %v1723_v10 = vsel %vm1695_vm5, %v1690_v39, %v1138_v31  ;;  %v1707_v53 = vsel %vm1695_vm5, %v1674_v58, %v1106_v59 }
 0x21f   : > { %v1264_v19 = vpop.permute.xlu1 %1263  ;;  %v1232_v2 = vpop.permute.xlu0 %1231 }
 0x220   : > { %v1755_v18 = vsel %vm1728_vm6, %v1722_v1, %v1264_v19  ;;  %v1739_v48 = vsel %vm1728_vm6, %v1706_v15, %v1232_v2 }
 0x223   : > { %v1266_v17 = vpop.permute.xlu1 %1265  ;;  %v1234_v28 = vpop.permute.xlu0 %1233 }
 0x224   : > { %v1756_v54 = vsel %vm1728_vm6, %v1723_v10, %v1266_v17  ;;  %v1740_v6 = vsel %vm1728_vm6, %v1707_v53, %v1234_v28 }
 0x227   : > { %v1392_v22 = vpop.permute.xlu1 %1391  ;;  %v1360_v30 = vpop.permute.xlu0 %1359 }
 0x228   : > { %v1788_v55 = vsel %vm1761_vm7, %v1755_v18, %v1392_v22  ;;  %v1772_v27 = vsel %vm1761_vm7, %v1739_v48, %v1360_v30 }
 0x22b   : > { %v1012_v63 = vpop.permute.xlu1 %1011  ;;  %v980_v16 = vpop.permute.xlu0 %979 }
 0x22c   : > { %v1691_v19 = vsel %vm1662_vm4, %v3596_v14, %v1012_v63  ;;  %v1675_v2 = vsel %vm1662_vm4, %v3464_v56, %v980_v16 }
 0x22f   : > { %v1394_v50 = vpop.permute.xlu1 %1393  ;;  %v1362_v3 = vpop.permute.xlu0 %1361 }
 0x230   : > { %v1789_v20 = vsel %vm1761_vm7, %v1756_v54, %v1394_v50  ;;  %v1773_v32 = vsel %vm1761_vm7, %v1740_v6, %v1362_v3 }
 0x233   : > { %v1520_v12 = vpop.permute.xlu1 %1519  ;;  %v1488_v51 = vpop.permute.xlu0 %1487 }
 0x234   : > { %v1821_v0 = vsel %vm1794_vm8, %v1788_v55, %v1520_v12  ;;  %v1805_v26 = vsel %vm1794_vm8, %v1772_v27, %v1488_v51 }
 0x235   : > { %2637 = vmatprep.mubr.msk.f32.mxu0 %vm1839_vm9, %v1805_v26  ;;  %2661 = vmatprep.mubr.msk.f32.mxu1 %vm1839_vm9, %v1821_v0 }
 0x237   : > { %v4069_v36 = vpop.permute.xlu1 %1013  ;;  %v4071_v5 = vpop.permute.xlu0 %981 }
 0x238   : > { %v1692_v18 = vsel %vm1662_vm4, %v3593_v35, %v4069_v36  ;;  %v1676_v48 = vsel %vm1662_vm4, %v3461_v40, %v4071_v5 }
 0x23b   : > { %v1140_v49 = vpop.permute.xlu1 %1139  ;;  %v1108_v52 = vpop.permute.xlu0 %1107 }
 0x23c   : > { %v1724_v17 = vsel %vm1695_vm5, %v1691_v19, %v1140_v49  ;;  %v1708_v28 = vsel %vm1695_vm5, %v1675_v2, %v1108_v52 }
 0x23f   : > { %v1522_v44 = vpop.permute.xlu1 %1521  ;;  %v1490_v11 = vpop.permute.xlu0 %1489 }
 0x240   : > { %v1822_v45 = vsel %vm1794_vm8, %v1789_v20, %v1522_v44  ;;  %v1806_v60 = vsel %vm1794_vm8, %v1773_v32, %v1490_v11 }
 0x241   : > { %2638 = vmatmul.mubr.msk.f32.gmra.mrb[10].mxu0 %vm1839_vm9, %v1806_v60  ;;  %2662 = vmatmul.mubr.msk.f32.gmra.mrb[10].mxu1 %vm1839_vm9, %v1822_v45 }
 0x243   : > { %v1142_v7 = vpop.permute.xlu1 %1141  ;;  %v1110_v33 = vpop.permute.xlu0 %1109 }
 0x244   : > { %v1725_v55 = vsel %vm1695_vm5, %v1692_v18, %v1142_v7  ;;  %v1709_v27 = vsel %vm1695_vm5, %v1676_v48, %v1110_v33 }
 0x247   : > { %v1268_v23 = vpop.permute.xlu1 %1267  ;;  %v1236_v62 = vpop.permute.xlu0 %1235 }
 0x248   : > { %v1757_v22 = vsel %vm1728_vm6, %v1724_v17, %v1268_v23  ;;  %v1741_v30 = vsel %vm1728_vm6, %v1708_v28, %v1236_v62 }
 0x24b   : > { %v1270_v8 = vpop.permute.xlu1 %1269  ;;  %v1238_v4 = vpop.permute.xlu0 %1237 }
 0x24c   : > { %v1758_v12 = vsel %vm1728_vm6, %v1725_v55, %v1270_v8  ;;  %v1742_v51 = vsel %vm1728_vm6, %v1709_v27, %v1238_v4  ;;  %v4416_v4 = vld [vmem:[#allocation57_spill] sm:$0xff] }
 0x24f   : > { %v1396_v47 = vpop.permute.xlu1 %1395  ;;  %v1364_v9 = vpop.permute.xlu0 %1363 }
 0x250   : > { %v1790_v50 = vsel %vm1761_vm7, %v1757_v22, %v1396_v47  ;;  %v1774_v3 = vsel %vm1761_vm7, %v1741_v30, %v1364_v9 }
 0x251   : > { %v2624_v29 = vpop.f32.mrb[0].mxu0 }
 0x252   : > { %v2012_v38 = vadd.f32 %v2624_v29, %v4091_v13  ;;  %v2006_v43 = vpop.f32.mrb[1].mxu0 }
 0x253   : > { %v2007_v61 = vadd.f32 %v4091_v13, %v2006_v43  ;;  %v4100_v34 = vpop.permute.xlu1 %1015  ;;  %v4102_v42 = vpop.permute.xlu0 %983 }
 0x254   : > { %2166 = vst.msk [vmem:[%s4096_s20 + $0x8] sm:$0xff] %vm1596_vm2, %v2012_v38  ;;  %v1693_v8 = vsel %vm1662_vm4, %v3615_v37, %v4100_v34  ;;  %v1677_v47 = vsel %vm1662_vm4, %v4416_v4, %v4102_v42 }
 0x255   : > { %2165 = vst.msk [vmem:[%s4096_s20] sm:$0xff] %vm1596_vm2, %v2007_v61  ;;  %v2648_v41 = vpop.f32.mrb[0].mxu1 }
 0x256   : > { %v2092_v21 = vadd.f32 %v2648_v41, %v4091_v13  ;;  %v2086_v46 = vpop.f32.mrb[1].mxu1 }
 0x257   : > { %v2087_v25 = vadd.f32 %v4091_v13, %v2086_v46  ;;  %v1398_v31 = vpop.permute.xlu1 %1397  ;;  %v1366_v59 = vpop.permute.xlu0 %1365  ;;  %v4418_v46 = vld [vmem:[#allocation56_spill] sm:$0xff] }
 0x258   : > { %2182 = vst.msk [vmem:[%s4096_s20 + $0x88] sm:$0xff] %vm1596_vm2, %v2092_v21  ;;  %v1791_v0 = vsel %vm1761_vm7, %v1758_v12, %v1398_v31  ;;  %v1775_v26 = vsel %vm1761_vm7, %v1742_v51, %v1366_v59  ;;  %v4417_v21 = vld [vmem:[#allocation22_spill] sm:$0xff] }
 0x259   : > { %2181 = vst.msk [vmem:[%s4096_s20 + $0x80] sm:$0xff] %vm1596_vm2, %v2087_v25 }
 0x25b   : > { %v1524_v14 = vpop.permute.xlu1 %1523  ;;  %v1492_v63 = vpop.permute.xlu0 %1491 }
 0x25c   : > { %v1823_v56 = vsel %vm1794_vm8, %v1790_v50, %v1524_v14  ;;  %v1807_v16 = vsel %vm1794_vm8, %v1774_v3, %v1492_v63 }
 0x25d   : > { %2640 = vmatprep.mubr.msk.f32.mxu0 %vm1839_vm9, %v1807_v16  ;;  %2664 = vmatprep.mubr.msk.f32.mxu1 %vm1839_vm9, %v1823_v56 }
 0x25f   : > { %v1018_v24 = vpop.permute.xlu1 %1017  ;;  %v986_v57 = vpop.permute.xlu0 %985 }
 0x260   : > { %v1694_v42 = vsel %vm1662_vm4, %v4417_v21, %v1018_v24  ;;  %v1678_v25 = vsel %vm1662_vm4, %v4418_v46, %v986_v57 }
 0x263   : > { %v1144_v1 = vpop.permute.xlu1 %1143  ;;  %v1112_v15 = vpop.permute.xlu0 %1111 }
 0x264   : > { %v1726_v9 = vsel %vm1695_vm5, %v1693_v8, %v1144_v1  ;;  %v1710_v29 = vsel %vm1695_vm5, %v1677_v47, %v1112_v15 }
 0x267   : > { %v1526_v49 = vpop.permute.xlu1 %1525  ;;  %v1494_v52 = vpop.permute.xlu0 %1493 }
 0x268   : > { %v1824_v35 = vsel %vm1794_vm8, %v1791_v0, %v1526_v49  ;;  %v1808_v36 = vsel %vm1794_vm8, %v1775_v26, %v1494_v52 }
 0x269   : > { %2641 = vmatmul.mubr.msk.f32.gmra.mrb[12].mxu0 %vm1839_vm9, %v1808_v36  ;;  %2665 = vmatmul.mubr.msk.f32.gmra.mrb[12].mxu1 %vm1839_vm9, %v1824_v35 }
 0x26b   : > { %v1146_v40 = vpop.permute.xlu1 %1145  ;;  %v1114_v5 = vpop.permute.xlu0 %1113 }
 0x26c   : > { %v1727_v19 = vsel %vm1695_vm5, %v1694_v42, %v1146_v40  ;;  %v1711_v2 = vsel %vm1695_vm5, %v1678_v25, %v1114_v5 }
 0x26f   : > { %v1272_v39 = vpop.permute.xlu1 %1271  ;;  %v1240_v58 = vpop.permute.xlu0 %1239 }
 0x270   : > { %v1759_v38 = vsel %vm1728_vm6, %v1726_v9, %v1272_v39  ;;  %v1743_v43 = vsel %vm1728_vm6, %v1710_v29, %v1240_v58 }
 0x273   : > { %v1274_v10 = vpop.permute.xlu1 %1273  ;;  %v1242_v53 = vpop.permute.xlu0 %1241 }
 0x274   : > { %v1760_v17 = vsel %vm1728_vm6, %v1727_v19, %v1274_v10  ;;  %v1744_v28 = vsel %vm1728_vm6, %v1711_v2, %v1242_v53 }
 0x275   : > { %v2627_v54 = vpop.f32.mrb[2].mxu0 }
 0x276   : > { %v2022_v6 = vadd.f32 %v2627_v54, %v4091_v13  ;;  %v2016_v20 = vpop.f32.mrb[3].mxu0 }
 0x277   : > { %v2017_v32 = vadd.f32 %v4091_v13, %v2016_v20  ;;  %v1400_v44 = vpop.permute.xlu1 %1399  ;;  %v1368_v11 = vpop.permute.xlu0 %1367 }
 0x278   : > { %2168 = vst.msk [vmem:[%s4096_s20 + $0x18] sm:$0xff] %vm1596_vm2, %v2022_v6  ;;  %v1792_v61 = vsel %vm1761_vm7, %v1759_v38, %v1400_v44  ;;  %v1776_v37 = vsel %vm1761_vm7, %v1743_v43, %v1368_v11 }
 0x279   : > { %2167 = vst.msk [vmem:[%s4096_s20 + $0x10] sm:$0xff] %vm1596_vm2, %v2017_v32  ;;  %v2651_v45 = vpop.f32.mrb[2].mxu1 }
 0x27a   : > { %v2102_v60 = vadd.f32 %v2651_v45, %v4091_v13  ;;  %v2096_v7 = vpop.f32.mrb[3].mxu1 }
 0x27b   : > { %v2097_v33 = vadd.f32 %v4091_v13, %v2096_v7  ;;  %v1402_v23 = vpop.permute.xlu1 %1401  ;;  %v1370_v62 = vpop.permute.xlu0 %1369 }
 0x27c   : > { %2184 = vst.msk [vmem:[%s4096_s20 + $0x98] sm:$0xff] %vm1596_vm2, %v2102_v60  ;;  %v1793_v22 = vsel %vm1761_vm7, %v1760_v17, %v1402_v23  ;;  %v1777_v30 = vsel %vm1761_vm7, %v1744_v28, %v1370_v62 }
 0x27d   : > { %2183 = vst.msk [vmem:[%s4096_s20 + $0x90] sm:$0xff] %vm1596_vm2, %v2097_v33 }
 0x27f   : > { %v1528_v34 = vpop.permute.xlu1 %1527  ;;  %v1496_v41 = vpop.permute.xlu0 %1495 }
 0x280   : > { %v1825_v31 = vsel %vm1794_vm8, %v1792_v61, %v1528_v34  ;;  %v1809_v59 = vsel %vm1794_vm8, %v1776_v37, %v1496_v41 }
 0x281   : > { %2643 = vmatprep.mubr.msk.f32.mxu0 %vm1839_vm9, %v1809_v59  ;;  %2667 = vmatprep.mubr.msk.f32.mxu1 %vm1839_vm9, %v1825_v31 }
 0x283   : > { %v1530_v50 = vpop.permute.xlu1 %1529  ;;  %v1498_v3 = vpop.permute.xlu0 %1497 }
 0x284   : > { %v1826_v14 = vsel %vm1794_vm8, %v1793_v22, %v1530_v50  ;;  %v1810_v63 = vsel %vm1794_vm8, %v1777_v30, %v1498_v3 }
 0x285   : > { %2644 = vmatmul.mubr.msk.f32.gmra.mrb[14].mxu0 %vm1839_vm9, %v1810_v63  ;;  %2668 = vmatmul.mubr.msk.f32.gmra.mrb[14].mxu1 %vm1839_vm9, %v1826_v14 }
 0x29d   : > { %v2630_v56 = vpop.f32.mrb[4].mxu0  ;;  %v2654_v16 = vpop.f32.mrb[4].mxu1 }
 0x29e   : > { %v2032_v24 = vadd.f32 %v2630_v56, %v4091_v13  ;;  %v2112_v57 = vadd.f32 %v2654_v16, %v4091_v13  ;;  %v2026_v1 = vpop.f32.mrb[5].mxu0  ;;  %v2106_v15 = vpop.f32.mrb[5].mxu1 }
 0x29f   : > { %v2027_v18 = vadd.f32 %v4091_v13, %v2026_v1  ;;  %v2107_v48 = vadd.f32 %v4091_v13, %v2106_v15 }
 0x2a0   : > { %2170 = vst.msk [vmem:[%s4096_s20 + $0x28] sm:$0xff] %vm1596_vm2, %v2032_v24  ;;  %2186 = vst.msk [vmem:[%s4096_s20 + $0xa8] sm:$0xff] %vm1596_vm2, %v2112_v57 }
 0x2a1   : > { %2169 = vst.msk [vmem:[%s4096_s20 + $0x20] sm:$0xff] %vm1596_vm2, %v2027_v18  ;;  %2185 = vst.msk [vmem:[%s4096_s20 + $0xa0] sm:$0xff] %vm1596_vm2, %v2107_v48 }
 0x2c5   : > { %v2633_v55 = vpop.f32.mrb[6].mxu0  ;;  %v2657_v27 = vpop.f32.mrb[6].mxu1 }
 0x2c6   : > { %v2042_v12 = vadd.f32 %v2633_v55, %v4091_v13  ;;  %v2122_v51 = vadd.f32 %v2657_v27, %v4091_v13  ;;  %v2036_v0 = vpop.f32.mrb[7].mxu0  ;;  %v2116_v26 = vpop.f32.mrb[7].mxu1 }
 0x2c7   : > { %v2037_v49 = vadd.f32 %v4091_v13, %v2036_v0  ;;  %v2117_v52 = vadd.f32 %v4091_v13, %v2116_v26 }
 0x2c8   : > { %2172 = vst.msk [vmem:[%s4096_s20 + $0x38] sm:$0xff] %vm1596_vm2, %v2042_v12  ;;  %2188 = vst.msk [vmem:[%s4096_s20 + $0xb8] sm:$0xff] %vm1596_vm2, %v2122_v51 }
 0x2c9   : > { %2171 = vst.msk [vmem:[%s4096_s20 + $0x30] sm:$0xff] %vm1596_vm2, %v2037_v49  ;;  %2187 = vst.msk [vmem:[%s4096_s20 + $0xb0] sm:$0xff] %vm1596_vm2, %v2117_v52 }
 0x2ec   : > { %v2636_v35 = vpop.f32.mrb[8].mxu0  ;;  %v2660_v36 = vpop.f32.mrb[8].mxu1 }
 0x2ed   : > { %v2052_v40 = vadd.f32 %v2636_v35, %v4091_v13  ;;  %v2132_v5 = vadd.f32 %v2660_v36, %v4091_v13  ;;  %v2046_v39 = vpop.f32.mrb[9].mxu0  ;;  %v2126_v58 = vpop.f32.mrb[9].mxu1 }
 0x2ee   : > { %v2047_v10 = vadd.f32 %v4091_v13, %v2046_v39  ;;  %v2127_v53 = vadd.f32 %v4091_v13, %v2126_v58 }
 0x2ef   : > { %2174 = vst.msk [vmem:[%s4096_s20 + $0x48] sm:$0xff] %vm1596_vm2, %v2052_v40  ;;  %2190 = vst.msk [vmem:[%s4096_s20 + $0xc8] sm:$0xff] %vm1596_vm2, %v2132_v5 }
 0x2f0   : > { %2173 = vst.msk [vmem:[%s4096_s20 + $0x40] sm:$0xff] %vm1596_vm2, %v2047_v10  ;;  %2189 = vst.msk [vmem:[%s4096_s20 + $0xc0] sm:$0xff] %vm1596_vm2, %v2127_v53 }
 0x314   : > { %v2639_v54 = vpop.f32.mrb[10].mxu0  ;;  %v2663_v6 = vpop.f32.mrb[10].mxu1 }
 0x315   : > { %v2062_v20 = vadd.f32 %v2639_v54, %v4091_v13  ;;  %v2142_v32 = vadd.f32 %v2663_v6, %v4091_v13  ;;  %v2056_v44 = vpop.f32.mrb[11].mxu0  ;;  %v2136_v11 = vpop.f32.mrb[11].mxu1 }
 0x316   : > { %v2057_v45 = vadd.f32 %v4091_v13, %v2056_v44  ;;  %v2137_v60 = vadd.f32 %v4091_v13, %v2136_v11 }
 0x317   : > { %2176 = vst.msk [vmem:[%s4096_s20 + $0x58] sm:$0xff] %vm1596_vm2, %v2062_v20  ;;  %2192 = vst.msk [vmem:[%s4096_s20 + $0xd8] sm:$0xff] %vm1596_vm2, %v2142_v32 }
 0x318   : > { %2175 = vst.msk [vmem:[%s4096_s20 + $0x50] sm:$0xff] %vm1596_vm2, %v2057_v45  ;;  %2191 = vst.msk [vmem:[%s4096_s20 + $0xd0] sm:$0xff] %vm1596_vm2, %v2137_v60 }
 0x33c   : > { %v2642_v7 = vpop.f32.mrb[12].mxu0  ;;  %v2666_v33 = vpop.f32.mrb[12].mxu1 }
 0x33d   : > { %v2072_v23 = vadd.f32 %v2642_v7, %v4091_v13  ;;  %v2152_v62 = vadd.f32 %v2666_v33, %v4091_v13  ;;  %v2066_v8 = vpop.f32.mrb[13].mxu0  ;;  %v2146_v4 = vpop.f32.mrb[13].mxu1 }
 0x33e   : > { %v2067_v47 = vadd.f32 %v4091_v13, %v2066_v8  ;;  %v2147_v9 = vadd.f32 %v4091_v13, %v2146_v4 }
 0x33f   : > { %2178 = vst.msk [vmem:[%s4096_s20 + $0x68] sm:$0xff] %vm1596_vm2, %v2072_v23  ;;  %2194 = vst.msk [vmem:[%s4096_s20 + $0xe8] sm:$0xff] %vm1596_vm2, %v2152_v62 }
 0x340   : > { %2177 = vst.msk [vmem:[%s4096_s20 + $0x60] sm:$0xff] %vm1596_vm2, %v2067_v47  ;;  %2193 = vst.msk [vmem:[%s4096_s20 + $0xe0] sm:$0xff] %vm1596_vm2, %v2147_v9 }
 0x358   : > { %v2645_v29 = vpop.f32.mrb[14].mxu0  ;;  %v2669_v38 = vpop.f32.mrb[14].mxu1 }
 0x359   : > { %v2082_v43 = vadd.f32 %v2645_v29, %v4091_v13  ;;  %v2162_v61 = vadd.f32 %v2669_v38, %v4091_v13  ;;  %v2076_v37 = vpop.f32.mrb[15].mxu0  ;;  %v2156_v34 = vpop.f32.mrb[15].mxu1 }
 0x35a   : > { %v2077_v41 = vadd.f32 %v4091_v13, %v2076_v37  ;;  %v2157_v21 = vadd.f32 %v4091_v13, %v2156_v34 }
 0x35b   : > { %2180 = vst.msk [vmem:[%s4096_s20 + $0x78] sm:$0xff] %vm1596_vm2, %v2082_v43  ;;  %2196 = vst.msk [vmem:[%s4096_s20 + $0xf8] sm:$0xff] %vm1596_vm2, %v2162_v61 }
 0x35c   : > { %2179 = vst.msk [vmem:[%s4096_s20 + $0x70] sm:$0xff] %vm1596_vm2, %v2077_v41  ;;  %2195 = vst.msk [vmem:[%s4096_s20 + $0xf0] sm:$0xff] %vm1596_vm2, %v2157_v21 }
 0x35d PF: > { %s13_s14 = sadd.s32 1, %s2739_s14   ;;  %s4419_s12 = smov %s2735_s13 }
 0x35e   : > { %p10_p5 = scmp.ge.s32.totalorder %s13_s14, 4   ;;  %s4420_s13 = smov %s4422_s15 }
 0x360   :  { %12 = sbr.rel (!%p10_p5) target bundleno = 2 (0x2), region = 71 }

// kernel: conv_layer_forward.1
= control target key start
LH: loop header
LB: loop body
LE: loop exit
PB: predicated region body
PF: predicated region fallthrough
CT: control target
= control target key end

     0   :  { %s2767_s12 = smov 0   ;;  %s2769_s13 = smov 0   ;;  %s4265_s0 = inlined_call_operand.vmem [shape: f32[2,18,18,4], index: 0, kind: input, shape index: {}]   ;;  %s4266_s1 = inlined_call_operand.vmem [shape: f32[36,8], index: 1, kind: input, shape index: {}]   ;;  %s4267_s2 = inlined_call_operand.vmem [shape: f32[1,8], index: 2, kind: input, shape index: {}]   ;;  %s4268_s3 = inlined_call_operand.vmem [shape: f32[2,16,16,8], index: 3, kind: output, shape index: {}]  }
   0x1   :  { %s2771_s14 = smov 0  }
   0x2 LB: > { %s32_s15 = sadd.s32 1, %s2733_s13  ;;  %p2340_p0 = scmp.ge.s32.totalorder %s2737_s14, 1  ;;  %s2737_s14 = sphi %s2771_s14, %s13_s14   ;;  %s2733_s13 = sphi %s2769_s13, %s4418_s13   ;;  %s2729_s12 = sphi %s2767_s12, %s4417_s12  }
   0x3   : > { %p34_p1 = scmp.ge.s32.totalorder %s32_s15, 2  ;;  %p177_p2 = scmp.lt.s32.totalorder %s2737_s14, 3 }
   0x5   : > { %s4420_s15 = smov (%p34_p1, %s32_s15), 0  ;;  %p178_p3 = pnand %p2340_p0, %p177_p2 }
   0x7   : > { %181 = sbr.rel (%p178_p3) target bundleno = 861 (0x35d), region = 32 }
   0xe   : > { %p216_p4 = scmp.lt.s32.totalorder %s2729_s12, 1  ;;  %s2739_s20 = smov 4   ;;  %vm1563_vm0 = vcmask 31744   ;;  %vm1936_vm1 = vcmask 1043456   ;;  %vm1596_vm2 = vcmask 64512   ;;  %vm1629_vm3 = vcmask 97280  }
   0xf   : > { %s2740_s21 = smov 8   ;;  %s2741_s22 = smov 12   ;;  %vm1662_vm4 = vcmask 130048   ;;  %vm1695_vm5 = vcmask 162816   ;;  %vm1728_vm6 = vcmask 195584   ;;  %vm1761_vm7 = vcmask 228352  }
  0x10   : > { %s4422_s12 = smov (!%p216_p4, %s2729_s12), 1  ;;  %s2742_s23 = smov 16   ;;  %vm1794_vm8 = vcmask 261120   ;;  %vm1839_vm9 = vcmask 293888  }
  0x11   : > { %s2682_s16 = smul.u32 432, %s4422_s12  ;;  %s2743_s24 = smov 20  }
  0x12   : > { %s2744_s25 = smov 24   ;;  %s2745_s30 = smov 28  }
  0x13   : > { %s2791_s19 = scalar_lea.vmem %s4265_s0, %s2682_s16  ;;  %s2746_s10 = smov 32  }
  0x14   : > { %v2794_v0 = vld [vmem:[%s2791_s19 + $0x19] sm:$0xff]  ;;  %v277_v1 = vld [vmem:[%s2791_s19 + $0x1] sm:$0xff]  ;;  %v278_v3 = vld [vmem:[%s2791_s19 + $0x9] sm:$0xff]  ;;  %s2572_s11 = sshll.u32 %s4422_s12, 8 }
  0x15   : > { %575 = vrot.lane.b32.xlu1 %v2794_v0, %s2739_s20  ;;  %571 = vrot.lane.b32.xlu0 %v277_v1, %s2739_s20  ;;  %v2801_v2 = vld [vmem:[%s2791_s19 + $0x21] sm:$0xff]  ;;  %v2808_v4 = vld [vmem:[%s2791_s19 + $0x39] sm:$0xff] }
  0x16   : > { %v2811_v5 = vld [vmem:[%s2791_s19 + $0x31] sm:$0xff]  ;;  %v2821_v7 = vld [vmem:[%s2791_s19 + $0x49] sm:$0xff]  ;;  %v2829_v9 = vld [vmem:[%s2791_s19 + $0x61] sm:$0xff] }
  0x17   : > { %v2818_v6 = vld [vmem:[%s2791_s19 + $0x51] sm:$0xff]  ;;  %v286_v8 = vld [vmem:[%s2791_s19 + $0x69] sm:$0xff]  ;;  %4303 = vst [vmem:[#allocation2_spill] sm:$0xff] %v2829_v9  ;;  %v288_v10 = vld [vmem:[%s2791_s19 + $0x81] sm:$0xff] }
  0x18   : > { %v287_v11 = vld [vmem:[%s2791_s19 + $0x79] sm:$0xff]  ;;  %v289_v13 = vld [vmem:[%s2791_s19 + $0x91] sm:$0xff]  ;;  %v291_v15 = vld [vmem:[%s2791_s19 + $0xa9] sm:$0xff] }
  0x19   : > { %577 = vrot.lane.b32.xlu1 %v2801_v2, %s2739_s20  ;;  %573 = vrot.lane.b32.xlu0 %v278_v3, %s2739_s20  ;;  %v290_v12 = vld [vmem:[%s2791_s19 + $0x99] sm:$0xff]  ;;  %v292_v14 = vld [vmem:[%s2791_s19 + $0xb1] sm:$0xff] }
  0x1a   : > { %v294_v16 = vld [vmem:[%s2791_s19 + $0xc9] sm:$0xff]  ;;  %v293_v17 = vld [vmem:[%s2791_s19 + $0xc1] sm:$0xff]  ;;  %v2854_v19 = vld [vmem:[%s2791_s19 + $0xd9] sm:$0xff] }
  0x1b   : > { %v2851_v18 = vld [vmem:[%s2791_s19 + $0xe1] sm:$0xff]  ;;  %v2861_v20 = vld [vmem:[%s2791_s19 + $0xf9] sm:$0xff]  ;;  %v2864_v21 = vld [vmem:[%s2791_s19 + $0xf1] sm:$0xff] }
  0x1c   : > { %v2871_v22 = vld [vmem:[%s2791_s19 + $0x111] sm:$0xff]  ;;  %v2874_v23 = vld [vmem:[%s2791_s19 + $0x109] sm:$0xff]  ;;  %v2884_v25 = vld [vmem:[%s2791_s19 + $0x121] sm:$0xff] }
  0x1d   : > { %581 = vrot.lane.b32.xlu1 %v2808_v4, %s2739_s20  ;;  %579 = vrot.lane.b32.xlu0 %v2811_v5, %s2739_s20  ;;  %v2881_v24 = vld [vmem:[%s2791_s19 + $0x129] sm:$0xff]  ;;  %4305 = vst [vmem:[#allocation4_spill] sm:$0xff] %v2884_v25  ;;  %v304_v26 = vld [vmem:[%s2791_s19 + $0x141] sm:$0xff] }
  0x1e   : > { %4304 = vst [vmem:[#allocation3_spill] sm:$0xff] %v2881_v24  ;;  %v303_v27 = vld [vmem:[%s2791_s19 + $0x139] sm:$0xff]  ;;  %v305_v29 = vld [vmem:[%s2791_s19 + $0x151] sm:$0xff]  ;;  %v307_v31 = vld [vmem:[%s2791_s19 + $0x169] sm:$0xff] }
  0x1f   : > { %v306_v28 = vld [vmem:[%s2791_s19 + $0x159] sm:$0xff]  ;;  %v308_v30 = vld [vmem:[%s2791_s19 + $0x171] sm:$0xff]  ;;  %v309_v33 = vld [vmem:[%s2791_s19 + $0x2] sm:$0xff] }
  0x20   : > { %v310_v32 = vld [vmem:[%s2791_s19 + $0xa] sm:$0xff]  ;;  %v2907_v34 = vld [vmem:[%s2791_s19 + $0x22] sm:$0xff]  ;;  %v2910_v35 = vld [vmem:[%s2791_s19 + $0x1a] sm:$0xff] }
  0x21   : > { %585 = vrot.lane.b32.xlu1 %v2818_v6, %s2739_s20  ;;  %583 = vrot.lane.b32.xlu0 %v2821_v7, %s2739_s20  ;;  %v2917_v36 = vld [vmem:[%s2791_s19 + $0x3a] sm:$0xff]  ;;  %v2920_v37 = vld [vmem:[%s2791_s19 + $0x32] sm:$0xff] }
  0x22   : > { %v2927_v38 = vld [vmem:[%s2791_s19 + $0x52] sm:$0xff]  ;;  %v2930_v39 = vld [vmem:[%s2791_s19 + $0x4a] sm:$0xff]  ;;  %v2940_v41 = vld [vmem:[%s2791_s19 + $0x62] sm:$0xff] }
  0x23   : > { %v2937_v40 = vld [vmem:[%s2791_s19 + $0x6a] sm:$0xff]  ;;  %4307 = vst [vmem:[#allocation6_spill] sm:$0xff] %v2940_v41  ;;  %v320_v42 = vld [vmem:[%s2791_s19 + $0x82] sm:$0xff]  ;;  %v319_v43 = vld [vmem:[%s2791_s19 + $0x7a] sm:$0xff] }
  0x24   : > { %4306 = vst [vmem:[#allocation5_spill] sm:$0xff] %v2937_v40  ;;  %v322_v44 = vld [vmem:[%s2791_s19 + $0x9a] sm:$0xff]  ;;  %v321_v45 = vld [vmem:[%s2791_s19 + $0x92] sm:$0xff]  ;;  %v323_v47 = vld [vmem:[%s2791_s19 + $0xaa] sm:$0xff] }
  0x25   : > { %589 = vrot.lane.b32.xlu1 %v286_v8, %s2739_s20  ;;  %587 = vrot.lane.b32.xlu0 %v2829_v9, %s2739_s20  ;;  %v324_v46 = vld [vmem:[%s2791_s19 + $0xb2] sm:$0xff]  ;;  %v326_v48 = vld [vmem:[%s2791_s19 + $0xca] sm:$0xff] }
  0x26   : > { %v325_v49 = vld [vmem:[%s2791_s19 + $0xc2] sm:$0xff]  ;;  %v2966_v51 = vld [vmem:[%s2791_s19 + $0xda] sm:$0xff]  ;;  %v2976_v53 = vld [vmem:[%s2791_s19 + $0xf2] sm:$0xff] }
  0x27   : > { %v2963_v50 = vld [vmem:[%s2791_s19 + $0xe2] sm:$0xff]  ;;  %v2973_v52 = vld [vmem:[%s2791_s19 + $0xfa] sm:$0xff]  ;;  %v2983_v54 = vld [vmem:[%s2791_s19 + $0x112] sm:$0xff] }
  0x28   : > { %v2986_v55 = vld [vmem:[%s2791_s19 + $0x10a] sm:$0xff]  ;;  %v2996_v57 = vld [vmem:[%s2791_s19 + $0x122] sm:$0xff]  ;;  %v3004_v59 = vld [vmem:[%s2791_s19 + $0x13a] sm:$0xff] }
  0x29   : > { %593 = vrot.lane.b32.xlu1 %v288_v10, %s2739_s20  ;;  %591 = vrot.lane.b32.xlu0 %v287_v11, %s2739_s20  ;;  %v2993_v56 = vld [vmem:[%s2791_s19 + $0x12a] sm:$0xff]  ;;  %4309 = vst [vmem:[#allocation8_spill] sm:$0xff] %v2996_v57  ;;  %v336_v58 = vld [vmem:[%s2791_s19 + $0x142] sm:$0xff]  ;;  %4310 = vst [vmem:[#allocation9_spill] sm:$0xff] %v3004_v59 }
  0x2a   : > { %4308 = vst [vmem:[#allocation7_spill] sm:$0xff] %v2993_v56  ;;  %v338_v62 = vld [vmem:[%s2791_s19 + $0x15a] sm:$0xff]  ;;  %v337_v63 = vld [vmem:[%s2791_s19 + $0x152] sm:$0xff]  ;;  %v339_v10 = vld [vmem:[%s2791_s19 + $0x16a] sm:$0xff] }
  0x2b   : > { %v340_v8 = vld [vmem:[%s2791_s19 + $0x172] sm:$0xff] }
  0x2d   : > { %597 = vrot.lane.b32.xlu1 %v290_v12, %s2739_s20  ;;  %595 = vrot.lane.b32.xlu0 %v289_v13, %s2739_s20 }
  0x31   : > { %601 = vrot.lane.b32.xlu1 %v292_v14, %s2739_s20  ;;  %599 = vrot.lane.b32.xlu0 %v291_v15, %s2739_s20  ;;  %v3034_v15 = vld [vmem:[%s2791_s19 + $0x18] sm:$0xff] }
  0x32   : > { %4315 = vst [vmem:[#allocation14_spill] sm:$0xff] %v3034_v15 }
  0x35   : > { %605 = vrot.lane.b32.xlu1 %v294_v16, %s2739_s20  ;;  %603 = vrot.lane.b32.xlu0 %v293_v17, %s2739_s20  ;;  %v3037_v16 = vld [vmem:[%s2791_s19 + $0x20] sm:$0xff] }
  0x36   : > { %4316 = vst [vmem:[#allocation15_spill] sm:$0xff] %v3037_v16 }
  0x39   : > { %609 = vrot.lane.b32.xlu1 %v2851_v18, %s2739_s20  ;;  %607 = vrot.lane.b32.xlu0 %v2854_v19, %s2739_s20 }
  0x3d   : > { %613 = vrot.lane.b32.xlu1 %v2861_v20, %s2739_s20  ;;  %611 = vrot.lane.b32.xlu0 %v2864_v21, %s2739_s20 }
  0x41   : > { %617 = vrot.lane.b32.xlu1 %v2871_v22, %s2739_s20  ;;  %615 = vrot.lane.b32.xlu0 %v2874_v23, %s2739_s20 }
  0x45   : > { %621 = vrot.lane.b32.xlu1 %v2881_v24, %s2739_s20  ;;  %619 = vrot.lane.b32.xlu0 %v2884_v25, %s2739_s20 }
  0x49   : > { %625 = vrot.lane.b32.xlu1 %v304_v26, %s2739_s20  ;;  %623 = vrot.lane.b32.xlu0 %v303_v27, %s2739_s20  ;;  %v3048_v27 = vld [vmem:[%s2791_s19 + $0x38] sm:$0xff] }
  0x4d   : > { %629 = vrot.lane.b32.xlu1 %v306_v28, %s2739_s20  ;;  %627 = vrot.lane.b32.xlu0 %v305_v29, %s2739_s20  ;;  %v3051_v28 = vld [vmem:[%s2791_s19 + $0x30] sm:$0xff] }
  0x51   : > { %633 = vrot.lane.b32.xlu1 %v308_v30, %s2739_s20  ;;  %631 = vrot.lane.b32.xlu0 %v307_v31, %s2739_s20  ;;  %v3062_v31 = vld [vmem:[%s2791_s19 + $0x50] sm:$0xff]  ;;  %s4094_s20 = scalar_lea.vmem %s4268_s3, %s2572_s11 }
  0x55   : > { %701 = vrot.lane.b32.xlu1 %v310_v32, %s2740_s21  ;;  %699 = vrot.lane.b32.xlu0 %v309_v33, %s2740_s21  ;;  %v3065_v32 = vld [vmem:[%s2791_s19 + $0x48] sm:$0xff]  ;;  %v258_v33 = vld [vmem:[%s2791_s19 + $0x98] sm:$0xff] }
  0x59   : > { %705 = vrot.lane.b32.xlu1 %v2907_v34, %s2740_s21  ;;  %703 = vrot.lane.b32.xlu0 %v2910_v35, %s2740_s21 }
  0x5d   : > { %709 = vrot.lane.b32.xlu1 %v2917_v36, %s2740_s21  ;;  %707 = vrot.lane.b32.xlu0 %v2920_v37, %s2740_s21 }
  0x61   : > { %713 = vrot.lane.b32.xlu1 %v2927_v38, %s2740_s21  ;;  %711 = vrot.lane.b32.xlu0 %v2930_v39, %s2740_s21 }
  0x65   : > { %717 = vrot.lane.b32.xlu1 %v2937_v40, %s2740_s21  ;;  %715 = vrot.lane.b32.xlu0 %v2940_v41, %s2740_s21  ;;  %v3183_v41 = vld [vmem:[%s2791_s19 + $0x120] sm:$0xff] }
  0x66   : > { %4333 = vst [vmem:[#allocation32_spill] sm:$0xff] %v3183_v41 }
  0x69   : > { %721 = vrot.lane.b32.xlu1 %v320_v42, %s2740_s21  ;;  %719 = vrot.lane.b32.xlu0 %v319_v43, %s2740_s21  ;;  %v257_v42 = vld [vmem:[%s2791_s19 + $0x90] sm:$0xff] }
  0x6d   : > { %725 = vrot.lane.b32.xlu1 %v322_v44, %s2740_s21  ;;  %723 = vrot.lane.b32.xlu0 %v321_v45, %s2740_s21  ;;  %v3074_v45 = vld [vmem:[%s2791_s19 + $0x68] sm:$0xff] }
  0x71   : > { %729 = vrot.lane.b32.xlu1 %v324_v46, %s2740_s21  ;;  %727 = vrot.lane.b32.xlu0 %v323_v47, %s2740_s21  ;;  %v3077_v46 = vld [vmem:[%s2791_s19 + $0x60] sm:$0xff] }
  0x75   : > { %733 = vrot.lane.b32.xlu1 %v326_v48, %s2740_s21  ;;  %731 = vrot.lane.b32.xlu0 %v325_v49, %s2740_s21  ;;  %v260_v49 = vld [vmem:[%s2791_s19 + $0xb0] sm:$0xff] }
  0x79   : > { %737 = vrot.lane.b32.xlu1 %v2963_v50, %s2740_s21  ;;  %735 = vrot.lane.b32.xlu0 %v2966_v51, %s2740_s21 }
  0x7d   : > { %741 = vrot.lane.b32.xlu1 %v2973_v52, %s2740_s21  ;;  %739 = vrot.lane.b32.xlu0 %v2976_v53, %s2740_s21 }
  0x81   : > { %745 = vrot.lane.b32.xlu1 %v2983_v54, %s2740_s21  ;;  %743 = vrot.lane.b32.xlu0 %v2986_v55, %s2740_s21 }
  0x85   : > { %749 = vrot.lane.b32.xlu1 %v2993_v56, %s2740_s21  ;;  %747 = vrot.lane.b32.xlu0 %v2996_v57, %s2740_s21  ;;  %v3180_v56 = vld [vmem:[%s2791_s19 + $0x128] sm:$0xff]  ;;  %v276_v57 = vld [vmem:[%s2791_s19 + $0x170] sm:$0xff] }
  0x86   : > { %4332 = vst [vmem:[#allocation31_spill] sm:$0xff] %v3180_v56 }
  0x87   : > { %v3006_v60 = vpop.permute.xlu1 %575  ;;  %v3008_v61 = vpop.permute.xlu0 %571 }
  0x88   : > { %4311 = vst [vmem:[#allocation10_spill] sm:$0xff] %v3006_v60  ;;  %4312 = vst [vmem:[#allocation11_spill] sm:$0xff] %v3008_v61 }
  0x89   : > { %753 = vrot.lane.b32.xlu1 %v336_v58, %s2740_s21  ;;  %751 = vrot.lane.b32.xlu0 %v3004_v59, %s2740_s21  ;;  %v259_v58 = vld [vmem:[%s2791_s19 + $0xa8] sm:$0xff]  ;;  %v3155_v59 = vld [vmem:[%s2791_s19 + $0xf0] sm:$0xff] }
  0x8b   : > { %v3015_v1 = vpop.permute.xlu1 %577  ;;  %v3017_v3 = vpop.permute.xlu0 %573 }
  0x8c   : > { %4313 = vst [vmem:[#allocation12_spill] sm:$0xff] %v3015_v1  ;;  %4314 = vst [vmem:[#allocation13_spill] sm:$0xff] %v3017_v3  ;;  %v3127_v3 = vld [vmem:[%s2791_s19 + $0xc0] sm:$0xff] }
  0x8d   : > { %757 = vrot.lane.b32.xlu1 %v338_v62, %s2740_s21  ;;  %755 = vrot.lane.b32.xlu0 %v337_v63, %s2740_s21  ;;  %4322 = vst [vmem:[#allocation21_spill] sm:$0xff] %v3127_v3 }
  0x8f   : > { %v3023_v11 = vpop.permute.xlu1 %581  ;;  %v3025_v12 = vpop.permute.xlu0 %579 }
  0x91   : > { %761 = vrot.lane.b32.xlu1 %v340_v8, %s2740_s21  ;;  %759 = vrot.lane.b32.xlu0 %v339_v10, %s2740_s21  ;;  %v3092_v8 = vld [vmem:[%s2791_s19 + $0x80] sm:$0xff]  ;;  %v3095_v10 = vld [vmem:[%s2791_s19 + $0x78] sm:$0xff] }
  0x93   : > { %v3029_v13 = vpop.permute.xlu1 %585  ;;  %v3031_v14 = vpop.permute.xlu0 %583 }
  0x95   : > { %829 = vrot.lane.b32.xlu1 %v3037_v16, %s2741_s22  ;;  %827 = vrot.lane.b32.xlu0 %v3034_v15, %s2741_s22 }
  0x97   : > { %v3043_v17 = vpop.permute.xlu1 %589  ;;  %v3045_v26 = vpop.permute.xlu0 %587 }
  0x99   : > { %833 = vrot.lane.b32.xlu1 %v3048_v27, %s2741_s22  ;;  %831 = vrot.lane.b32.xlu0 %v3051_v28, %s2741_s22 }
  0x9b   : > { %v3057_v29 = vpop.permute.xlu1 %593  ;;  %v3059_v30 = vpop.permute.xlu0 %591 }
  0x9d   : > { %837 = vrot.lane.b32.xlu1 %v3062_v31, %s2741_s22  ;;  %835 = vrot.lane.b32.xlu0 %v3065_v32, %s2741_s22 }
  0x9f   : > { %v598_v43 = vpop.permute.xlu1 %597  ;;  %v596_v44 = vpop.permute.xlu0 %595 }
  0xa0   : > { %v3080_v47 = vsel %vm1563_vm0, %v258_v33, %v598_v43  ;;  %v3083_v48 = vsel %vm1563_vm0, %v257_v42, %v596_v44 }
  0xa1   : > { %841 = vrot.lane.b32.xlu1 %v3074_v45, %s2741_s22  ;;  %839 = vrot.lane.b32.xlu0 %v3077_v46, %s2741_s22 }
  0xa3   : > { %v602_v62 = vpop.permute.xlu1 %601  ;;  %v600_v63 = vpop.permute.xlu0 %599 }
  0xa4   : > { %v3098_v43 = vsel %vm1563_vm0, %v260_v49, %v602_v62  ;;  %v3101_v44 = vsel %vm1563_vm0, %v259_v58, %v600_v63 }
  0xa5   : > { %845 = vrot.lane.b32.xlu1 %v3092_v8, %s2741_s22  ;;  %843 = vrot.lane.b32.xlu0 %v3095_v10, %s2741_s22 }
  0xa7   : > { %v3107_v16 = vpop.permute.xlu1 %605  ;;  %v3109_v1 = vpop.permute.xlu0 %603 }
  0xa8   : > { %4317 = vst [vmem:[#allocation16_spill] sm:$0xff] %v3107_v16  ;;  %4318 = vst [vmem:[#allocation17_spill] sm:$0xff] %v3109_v1  ;;  %v3124_v16 = vld [vmem:[%s2791_s19 + $0xc8] sm:$0xff] }
  0xa9   : > { %849 = vrot.lane.b32.xlu1 %v258_v33, %s2741_s22  ;;  %847 = vrot.lane.b32.xlu0 %v257_v42, %s2741_s22  ;;  %4321 = vst [vmem:[#allocation20_spill] sm:$0xff] %v3124_v16  ;;  %v3169_v1 = vld [vmem:[%s2791_s19 + $0x108] sm:$0xff] }
  0xab   : > { %v3113_v62 = vpop.permute.xlu1 %609  ;;  %v3115_v63 = vpop.permute.xlu0 %607 }
  0xac   : > { %4319 = vst [vmem:[#allocation18_spill] sm:$0xff] %v3113_v62  ;;  %4320 = vst [vmem:[#allocation19_spill] sm:$0xff] %v3115_v63 }
  0xad   : > { %853 = vrot.lane.b32.xlu1 %v260_v49, %s2741_s22  ;;  %851 = vrot.lane.b32.xlu0 %v259_v58, %s2741_s22  ;;  %v3138_v49 = vld [vmem:[%s2791_s19 + $0xe0] sm:$0xff]  ;;  %v3141_v58 = vld [vmem:[%s2791_s19 + $0xd8] sm:$0xff] }
  0xae   : > { %4324 = vst [vmem:[#allocation23_spill] sm:$0xff] %v3138_v49  ;;  %4325 = vst [vmem:[#allocation24_spill] sm:$0xff] %v3141_v58 }
  0xaf   : > { %v3119_v15 = vpop.permute.xlu1 %613  ;;  %v3121_v60 = vpop.permute.xlu0 %611 }
  0xb1   : > { %857 = vrot.lane.b32.xlu1 %v3124_v16, %s2741_s22  ;;  %855 = vrot.lane.b32.xlu0 %v3127_v3, %s2741_s22  ;;  %v3152_v16 = vld [vmem:[%s2791_s19 + $0xf8] sm:$0xff]  ;;  %v3166_v3 = vld [vmem:[%s2791_s19 + $0x110] sm:$0xff] }
  0xb3   : > { %v3133_v33 = vpop.permute.xlu1 %617  ;;  %v3135_v42 = vpop.permute.xlu0 %615 }
  0xb4   : > { %4323 = vst [vmem:[#allocation22_spill] sm:$0xff] %v3135_v42 }
  0xb5   : > { %861 = vrot.lane.b32.xlu1 %v3138_v49, %s2741_s22  ;;  %859 = vrot.lane.b32.xlu0 %v3141_v58, %s2741_s22 }
  0xb7   : > { %v3147_v62 = vpop.permute.xlu1 %621  ;;  %v3149_v63 = vpop.permute.xlu0 %619 }
  0xb8   : > { %4326 = vst [vmem:[#allocation25_spill] sm:$0xff] %v3147_v62  ;;  %4327 = vst [vmem:[#allocation26_spill] sm:$0xff] %v3149_v63  ;;  %v3213_v63 = vld [vmem:[%s2791_s19 + $0x150] sm:$0xff] }
  0xb9   : > { %865 = vrot.lane.b32.xlu1 %v3152_v16, %s2741_s22  ;;  %863 = vrot.lane.b32.xlu0 %v3155_v59, %s2741_s22  ;;  %4341 = vst [vmem:[#allocation40_spill] sm:$0xff] %v3213_v63 }
  0xbb   : > { %v3161_v49 = vpop.permute.xlu1 %625  ;;  %v3163_v58 = vpop.permute.xlu0 %623 }
  0xbc   : > { %4328 = vst [vmem:[#allocation27_spill] sm:$0xff] %v3161_v49  ;;  %4329 = vst [vmem:[#allocation28_spill] sm:$0xff] %v3163_v58 }
  0xbd   : > { %869 = vrot.lane.b32.xlu1 %v3166_v3, %s2741_s22  ;;  %867 = vrot.lane.b32.xlu0 %v3169_v1, %s2741_s22 }
  0xbf   : > { %v3175_v61 = vpop.permute.xlu1 %629  ;;  %v3177_v40 = vpop.permute.xlu0 %627 }
  0xc0   : > { %4330 = vst [vmem:[#allocation29_spill] sm:$0xff] %v3175_v61  ;;  %4331 = vst [vmem:[#allocation30_spill] sm:$0xff] %v3177_v40  ;;  %v3193_v61 = vld [vmem:[%s2791_s19 + $0x140] sm:$0xff]  ;;  %v3196_v40 = vld [vmem:[%s2791_s19 + $0x138] sm:$0xff] }
  0xc1   : > { %873 = vrot.lane.b32.xlu1 %v3180_v56, %s2741_s22  ;;  %871 = vrot.lane.b32.xlu0 %v3183_v41, %s2741_s22  ;;  %4335 = vst [vmem:[#allocation34_spill] sm:$0xff] %v3193_v61  ;;  %4336 = vst [vmem:[#allocation35_spill] sm:$0xff] %v3196_v40 }
  0xc3   : > { %v634_v24 = vpop.permute.xlu1 %633  ;;  %v3190_v25 = vpop.permute.xlu0 %631 }
  0xc4   : > { %4334 = vst [vmem:[#allocation33_spill] sm:$0xff] %v3190_v25  ;;  %v3199_v58 = vsel %vm1563_vm0, %v276_v57, %v634_v24  ;;  %v3210_v25 = vld [vmem:[%s2791_s19 + $0x158] sm:$0xff] }
  0xc5   : > { %4337 = vst [vmem:[#allocation36_spill] sm:$0xff] %v3199_v58  ;;  %877 = vrot.lane.b32.xlu1 %v3193_v61, %s2741_s22  ;;  %875 = vrot.lane.b32.xlu0 %v3196_v40, %s2741_s22  ;;  %4340 = vst [vmem:[#allocation39_spill] sm:$0xff] %v3210_v25  ;;  %v3224_v61 = vld [vmem:[%s2791_s19 + $0x168] sm:$0xff] }
  0xc6   : > { %4344 = vst [vmem:[#allocation43_spill] sm:$0xff] %v3224_v61 }
  0xc7   : > { %v3205_v49 = vpop.permute.xlu1 %701  ;;  %v3207_v41 = vpop.permute.xlu0 %699 }
  0xc8   : > { %4338 = vst [vmem:[#allocation37_spill] sm:$0xff] %v3205_v49  ;;  %4339 = vst [vmem:[#allocation38_spill] sm:$0xff] %v3207_v41  ;;  %v2375_v49 = vld [vmem:[%s2791_s19 + $0x188] sm:$0xff]  ;;  %v2374_v41 = vld [vmem:[%s2791_s19 + $0x180] sm:$0xff] }
  0xc9   : > { %881 = vrot.lane.b32.xlu1 %v3210_v25, %s2741_s22  ;;  %879 = vrot.lane.b32.xlu0 %v3213_v63, %s2741_s22 }
  0xcb   : > { %v3219_v24 = vpop.permute.xlu1 %705  ;;  %v3221_v58 = vpop.permute.xlu0 %703 }
  0xcc   : > { %4342 = vst [vmem:[#allocation41_spill] sm:$0xff] %v3219_v24  ;;  %4343 = vst [vmem:[#allocation42_spill] sm:$0xff] %v3221_v58 }
  0xcd   : > { %885 = vrot.lane.b32.xlu1 %v276_v57, %s2741_s22  ;;  %883 = vrot.lane.b32.xlu0 %v3224_v61, %s2741_s22 }
  0xcf   : > { %v3231_v40 = vpop.permute.xlu1 %709  ;;  %v3233_v56 = vpop.permute.xlu0 %707 }
  0xd1   : > { %889 = vrot.lane.b32.xlu1 %v2375_v49, %s2741_s22  ;;  %887 = vrot.lane.b32.xlu0 %v2374_v41, %s2741_s22 }
  0xd3   : > { %v3237_v24 = vpop.permute.xlu1 %713  ;;  %v3239_v58 = vpop.permute.xlu0 %711 }
  0xd5   : > { %957 = vrot.lane.b32.xlu1 %v2801_v2, %s2742_s23  ;;  %955 = vrot.lane.b32.xlu0 %v2794_v0, %s2742_s23 }
  0xd7   : > { %v3245_v57 = vpop.permute.xlu1 %717  ;;  %v3247_v61 = vpop.permute.xlu0 %715 }
  0xd9   : > { %961 = vrot.lane.b32.xlu1 %v2808_v4, %s2742_s23  ;;  %959 = vrot.lane.b32.xlu0 %v2811_v5, %s2742_s23 }
  0xdb   : > { %v3253_v41 = vpop.permute.xlu1 %721  ;;  %v3255_v49 = vpop.permute.xlu0 %719 }
  0xdd   : > { %965 = vrot.lane.b32.xlu1 %v2818_v6, %s2742_s23  ;;  %963 = vrot.lane.b32.xlu0 %v2821_v7, %s2742_s23 }
  0xdf   : > { %v3261_v0 = vpop.permute.xlu1 %725  ;;  %v3263_v2 = vpop.permute.xlu0 %723 }
  0xe1   : > { %987 = vrot.lane.b32.xlu1 %v2854_v19, %s2742_s23  ;;  %967 = vrot.lane.b32.xlu0 %v2829_v9, %s2742_s23 }
  0xe3   : > { %v3269_v63 = vpop.permute.xlu1 %729  ;;  %v3271_v25 = vpop.permute.xlu0 %727 }
  0xe5   : > { %1083 = vrot.lane.b32.xlu1 %v2910_v35, %s2743_s24  ;;  %989 = vrot.lane.b32.xlu0 %v2851_v18, %s2742_s23 }
  0xe7   : > { %v3277_v62 = vpop.permute.xlu1 %733  ;;  %v3279_v42 = vpop.permute.xlu0 %731 }
  0xe8   : > { %4345 = vst [vmem:[#allocation44_spill] sm:$0xff] %v3277_v62  ;;  %4346 = vst [vmem:[#allocation45_spill] sm:$0xff] %v3279_v42  ;;  %v1829_v62 = vld [vmem:[%s4266_s1 + $0x10] sm:$0xff] }
  0xe9   : > { %1085 = vrot.lane.b32.xlu1 %v2907_v34, %s2743_s24  ;;  %1115 = vrot.lane.b32.xlu0 %v2966_v51, %s2743_s24  ;;  %v1827_v34 = vld [vmem:[%s4266_s1] sm:$0xff]  ;;  %v1828_v51 = vld [vmem:[%s4266_s1 + $0x8] sm:$0xff] }
  0xeb   : > { %v3285_v19 = vpop.permute.xlu1 %737  ;;  %v3287_v9 = vpop.permute.xlu0 %735 }
  0xec   : > { %4347 = vst [vmem:[#allocation46_spill] sm:$0xff] %v3285_v19  ;;  %4348 = vst [vmem:[#allocation47_spill] sm:$0xff] %v3287_v9  ;;  %v2668_v19 = vpack.c.bf16 %v1828_v51, %v1827_v34  ;;  %v1830_v34 = vld [vmem:[%s4266_s1 + $0x18] sm:$0xff] }
  0xed   : > { %1211 = vrot.lane.b32.xlu1 %v3051_v28, %s2744_s25  ;;  %1117 = vrot.lane.b32.xlu0 %v2963_v50, %s2743_s24  ;;  %v2672_v51 = vpack.c.bf16 %v1830_v34, %v1829_v62 }
  0xee   : > { %2669 = vmatprep.subr.bf16.mxu0 %v2668_v19  ;;  %2676 = vmatprep.subr.bf16.mxu1 %v2668_v19 }
  0xef   : > { %v3293_v18 = vpop.permute.xlu1 %741  ;;  %v3295_v35 = vpop.permute.xlu0 %739  ;;  %2671 = vmatpush3.bf16.msra.mxu0 %v2668_v19  ;;  %2679 = vmatpush3.bf16.msra.mxu1 %v2668_v19 }
  0xf0   : > { %2673 = vmatprep.subr.bf16.mxu0 %v2672_v51  ;;  %2677 = vmatprep.subr.bf16.mxu1 %v2672_v51 }
  0xf1   : > { %1213 = vrot.lane.b32.xlu1 %v3048_v27, %s2744_s25  ;;  %1243 = vrot.lane.b32.xlu0 %v3155_v59, %s2744_s25 }
  0xf3   : > { %v3307_v50 = vpop.permute.xlu1 %745  ;;  %v3309_v9 = vpop.permute.xlu0 %743  ;;  %2675 = vmatpush3.bf16.msra.mxu0 %v2672_v51  ;;  %2680 = vmatpush3.bf16.msra.mxu1 %v2672_v51 }
  0xf4   : > { %4349 = vst [vmem:[#allocation48_spill] sm:$0xff] %v3309_v9 }
  0xf5   : > { %1339 = vrot.lane.b32.xlu1 %v2811_v5, %s2745_s30  ;;  %1245 = vrot.lane.b32.xlu0 %v3152_v16, %s2744_s25  ;;  %v1831_v5 = vld [vmem:[%s4266_s1 + $0x20] sm:$0xf] }
  0xf6   : > { %2618 = vmatprep.subr.msk.mxu0 %vm1936_vm1, %v1831_v5  ;;  %2678 = vmatprep.subr.msk.mxu1 %vm1936_vm1, %v1831_v5 }
  0xf7   : > { %v3321_v42 = vpop.permute.xlu1 %749  ;;  %v3323_v9 = vpop.permute.xlu0 %747  ;;  %2619 = vmatpush3.msk.msra.mxu0 %vm1936_vm1, %v1831_v5  ;;  %2681 = vmatpush3.msk.msra.mxu1 %vm1936_vm1, %v1831_v5 }
  0xf9   : > { %991 = vrot.lane.b32.xlu1 %v2864_v21, %s2742_s23  ;;  %1371 = vrot.lane.b32.xlu0 %v2864_v21, %s2745_s30 }
  0xfb   : > { %v3332_v62 = vpop.permute.xlu1 %753  ;;  %v3334_v19 = vpop.permute.xlu0 %751 }
  0xfc   : > { %4350 = vst [vmem:[#allocation49_spill] sm:$0xff] %v3334_v19 }
  0xfd   : > { %1373 = vrot.lane.b32.xlu1 %v2861_v20, %s2745_s30  ;;  %1341 = vrot.lane.b32.xlu0 %v2808_v4, %s2745_s30 }
  0xff   : > { %v3340_v21 = vpop.permute.xlu1 %757  ;;  %v3342_v34 = vpop.permute.xlu0 %755 }
 0x100   : > { %4351 = vst [vmem:[#allocation50_spill] sm:$0xff] %v3342_v34 }
 0x101   : > { %1499 = vrot.lane.b32.xlu1 %v2976_v53, %s2746_s10  ;;  %1467 = vrot.lane.b32.xlu0 %v2920_v37, %s2746_s10 }
 0x103   : > { %v3348_v51 = vpop.permute.xlu1 %761  ;;  %v3350_v19 = vpop.permute.xlu0 %759 }
 0x104   : > { %4352 = vst [vmem:[#allocation51_spill] sm:$0xff] %v3348_v51 }
 0x105   : > { %1087 = vrot.lane.b32.xlu1 %v2920_v37, %s2743_s24  ;;  %993 = vrot.lane.b32.xlu0 %v2861_v20, %s2742_s23  ;;  %v1569_v20 = vsel %vm1563_vm0, %v3048_v27, %v3023_v11  ;;  %v1568_v37 = vsel %vm1563_vm0, %v3051_v28, %v3025_v12 }
 0x107   : > { %v3356_v4 = vpop.permute.xlu1 %829  ;;  %v3358_v5 = vpop.permute.xlu0 %827 }
 0x108   : > { %4353 = vst [vmem:[#allocation52_spill] sm:$0xff] %v3356_v4  ;;  %4354 = vst [vmem:[#allocation53_spill] sm:$0xff] %v3358_v5 }
 0x109   : > { %1469 = vrot.lane.b32.xlu1 %v2917_v36, %s2746_s10  ;;  %1119 = vrot.lane.b32.xlu0 %v2976_v53, %s2743_s24  ;;  %v1602_v53 = vsel %vm1596_vm2, %v1569_v20, %v3231_v40  ;;  %v1571_v40 = vsel %vm1563_vm0, %v3062_v31, %v3029_v13  ;;  %v1573_v13 = vsel %vm1563_vm0, %v3074_v45, %v3043_v17 }
 0x10a   : > { %v1604_v11 = vsel %vm1596_vm2, %v1571_v40, %v3237_v24  ;;  %v1575_v17 = vsel %vm1563_vm0, %v3092_v8, %v3057_v29  ;;  %v1610_v29 = vsel %vm1596_vm2, %v3080_v47, %v3261_v0  ;;  %v1611_v47 = vsel %vm1596_vm2, %v3101_v44, %v3271_v25 }
 0x10b   : > { %v3364_v34 = vpop.permute.xlu1 %833  ;;  %v3366_v51 = vpop.permute.xlu0 %831 }
 0x10c   : > { %4355 = vst [vmem:[#allocation54_spill] sm:$0xff] %v3364_v34  ;;  %4356 = vst [vmem:[#allocation55_spill] sm:$0xff] %v3366_v51  ;;  %v1601_v34 = vsel %vm1596_vm2, %v1568_v37, %v3233_v56  ;;  %v1570_v56 = vsel %vm1563_vm0, %v3065_v32, %v3031_v14  ;;  %v1572_v14 = vsel %vm1563_vm0, %v3077_v46, %v3045_v26 }
 0x10d   : > { %1089 = vrot.lane.b32.xlu1 %v2917_v36, %s2743_s24  ;;  %1501 = vrot.lane.b32.xlu0 %v2973_v52, %s2746_s10  ;;  %v1603_v12 = vsel %vm1596_vm2, %v1570_v56, %v3239_v58  ;;  %v1605_v58 = vsel %vm1596_vm2, %v1572_v14, %v3247_v61  ;;  %v1574_v61 = vsel %vm1563_vm0, %v3095_v10, %v3059_v30 }
 0x10e   : > { %v1608_v26 = vsel %vm1596_vm2, %v1575_v17, %v3253_v41  ;;  %v1609_v30 = vsel %vm1596_vm2, %v3083_v48, %v3263_v2 }
 0x10f   : > { %v838_v36 = vpop.permute.xlu1 %837  ;;  %v836_v51 = vpop.permute.xlu0 %835 }
 0x110   : > { %v3383_v4 = vsel %vm1629_vm3, %v1602_v53, %v838_v36  ;;  %v3386_v5 = vsel %vm1629_vm3, %v1601_v34, %v836_v51 }
 0x111   : > { %1215 = vrot.lane.b32.xlu1 %v3065_v32, %s2744_s25  ;;  %1121 = vrot.lane.b32.xlu0 %v2973_v52, %s2743_s24  ;;  %v1606_v32 = vsel %vm1596_vm2, %v1573_v13, %v3245_v57  ;;  %v1607_v57 = vsel %vm1596_vm2, %v1574_v61, %v3255_v49 }
 0x113   : > { %v842_v27 = vpop.permute.xlu1 %841  ;;  %v840_v28 = vpop.permute.xlu0 %839 }
 0x114   : > { %v3403_v34 = vsel %vm1629_vm3, %v1604_v11, %v842_v27  ;;  %v3406_v52 = vsel %vm1629_vm3, %v1603_v12, %v840_v28 }
 0x115   : > { %1217 = vrot.lane.b32.xlu1 %v3062_v31, %s2744_s25  ;;  %1247 = vrot.lane.b32.xlu0 %v3169_v1, %s2744_s25 }
 0x117   : > { %v846_v24 = vpop.permute.xlu1 %845  ;;  %v844_v51 = vpop.permute.xlu0 %843 }
 0x118   : > { %v3423_v31 = vsel %vm1629_vm3, %v1606_v32, %v846_v24  ;;  %v3426_v20 = vsel %vm1629_vm3, %v1605_v58, %v844_v51  ;;  %v4364_v24 = vld [vmem:[#allocation32_spill] sm:$0xff] }
 0x119   : > { %1343 = vrot.lane.b32.xlu1 %v2821_v7, %s2745_s30  ;;  %1249 = vrot.lane.b32.xlu0 %v3166_v3, %s2744_s25 }
 0x11b   : > { %v850_v37 = vpop.permute.xlu1 %849  ;;  %v848_v53 = vpop.permute.xlu0 %847 }
 0x11c   : > { %v3443_v7 = vsel %vm1629_vm3, %v1608_v26, %v850_v37  ;;  %v3446_v36 = vsel %vm1629_vm3, %v1607_v57, %v848_v53  ;;  %v4365_v37 = vld [vmem:[#allocation27_spill] sm:$0xff]  ;;  %v4366_v53 = vld [vmem:[#allocation34_spill] sm:$0xff] }
 0x11d   : > { %995 = vrot.lane.b32.xlu1 %v2874_v23, %s2742_s23  ;;  %1375 = vrot.lane.b32.xlu0 %v2874_v23, %s2745_s30  ;;  %v1612_v23 = vsel %vm1596_vm2, %v3098_v43, %v3269_v63  ;;  %v1585_v63 = vsel %vm1563_vm0, %v3152_v16, %v3119_v15 }
 0x11f   : > { %v854_v41 = vpop.permute.xlu1 %853  ;;  %v852_v49 = vpop.permute.xlu0 %851 }
 0x120   : > { %v3459_v40 = vsel %vm1629_vm3, %v1610_v29, %v854_v41  ;;  %v3462_v56 = vsel %vm1629_vm3, %v1609_v30, %v852_v49  ;;  %v4367_v29 = vld [vmem:[#allocation28_spill] sm:$0xff]  ;;  %v4369_v49 = vld [vmem:[#allocation49_spill] sm:$0xff] }
 0x121   : > { %1377 = vrot.lane.b32.xlu1 %v2871_v22, %s2745_s30  ;;  %1345 = vrot.lane.b32.xlu0 %v2818_v6, %s2745_s30 }
 0x123   : > { %v858_v48 = vpop.permute.xlu1 %857  ;;  %v856_v0 = vpop.permute.xlu0 %855 }
 0x124   : > { %v3475_v2 = vsel %vm1629_vm3, %v1612_v23, %v858_v48  ;;  %v3478_v11 = vsel %vm1629_vm3, %v1611_v47, %v856_v0 }
 0x125   : > { %4357 = vst [vmem:[#allocation56_spill] sm:$0xff] %v3475_v2  ;;  %4358 = vst [vmem:[#allocation57_spill] sm:$0xff] %v3478_v11  ;;  %1503 = vrot.lane.b32.xlu1 %v2986_v55, %s2746_s10  ;;  %1471 = vrot.lane.b32.xlu0 %v2930_v39, %s2746_s10  ;;  %v4392_v2 = vld [vmem:[#allocation53_spill] sm:$0xff] }
 0x127   : > { %v3484_v6 = vpop.permute.xlu1 %861  ;;  %v3486_v43 = vpop.permute.xlu0 %859 }
 0x129   : > { %1091 = vrot.lane.b32.xlu1 %v2930_v39, %s2743_s24  ;;  %997 = vrot.lane.b32.xlu0 %v2871_v22, %s2742_s23  ;;  %v1584_v39 = vsel %vm1563_vm0, %v3155_v59, %v3121_v60  ;;  %v1618_v22 = vsel %vm1596_vm2, %v1585_v63, %v3293_v18  ;;  %v1587_v59 = vsel %vm1563_vm0, %v3166_v3, %v3133_v33  ;;  %v4359_v60 = vld [vmem:[#allocation22_spill] sm:$0xff]  ;;  %v4360_v18 = vld [vmem:[#allocation48_spill] sm:$0xff]  ;;  %v4362_v3 = vld [vmem:[#allocation31_spill] sm:$0xff] }
 0x12a   : > { %v1617_v12 = vsel %vm1596_vm2, %v1584_v39, %v3295_v35  ;;  %v1586_v15 = vsel %vm1563_vm0, %v3169_v1, %v4359_v60  ;;  %v1620_v16 = vsel %vm1596_vm2, %v1587_v59, %v3307_v50  ;;  %v4361_v1 = vld [vmem:[#allocation25_spill] sm:$0xff]  ;;  %v4363_v50 = vld [vmem:[#allocation26_spill] sm:$0xff] }
 0x12b   : > { %v3492_v25 = vpop.permute.xlu1 %865  ;;  %v3494_v44 = vpop.permute.xlu0 %863  ;;  %v1619_v35 = vsel %vm1596_vm2, %v1586_v15, %v4360_v18  ;;  %v1589_v33 = vsel %vm1563_vm0, %v4362_v3, %v4361_v1  ;;  %v1588_v51 = vsel %vm1563_vm0, %v4364_v24, %v4363_v50  ;;  %v4370_v63 = vld [vmem:[#allocation2_spill] sm:$0xff]  ;;  %v4371_v39 = vld [vmem:[#allocation29_spill] sm:$0xff]  ;;  %v4379_v50 = vld [vmem:[#allocation51_spill] sm:$0xff] }
 0x12c   : > { %v1622_v17 = vsel %vm1596_vm2, %v1589_v33, %v3321_v42  ;;  %v1621_v61 = vsel %vm1596_vm2, %v1588_v51, %v3323_v9  ;;  %v1591_v42 = vsel %vm1563_vm0, %v4366_v53, %v4365_v37  ;;  %v4368_v9 = vld [vmem:[#allocation35_spill] sm:$0xff]  ;;  %v4375_v60 = vld [vmem:[#allocation50_spill] sm:$0xff]  ;;  %v4377_v1 = vld [vmem:[#allocation33_spill] sm:$0xff] }
 0x12d   : > { %1473 = vrot.lane.b32.xlu1 %v2927_v38, %s2746_s10  ;;  %1123 = vrot.lane.b32.xlu0 %v2986_v55, %s2743_s24  ;;  %v1590_v30 = vsel %vm1563_vm0, %v4368_v9, %v4367_v29  ;;  %v1624_v41 = vsel %vm1596_vm2, %v1591_v42, %v3332_v62  ;;  %v4372_v62 = vld [vmem:[#allocation39_spill] sm:$0xff] }
 0x12e   : > { %v1623_v23 = vsel %vm1596_vm2, %v1590_v30, %v4369_v49  ;;  %v2477_v33 = vld [vmem:[%s2791_s19 + $0x69] sm:$0xff] }
 0x12f   : > { %v870_v27 = vpop.permute.xlu1 %869  ;;  %v868_v28 = vpop.permute.xlu0 %867  ;;  %v4382_v42 = vld [vmem:[#allocation3_spill] sm:$0xff] }
 0x130   : > { %v3511_v13 = vsel %vm1629_vm3, %v1618_v22, %v870_v27  ;;  %v3514_v55 = vsel %vm1629_vm3, %v1617_v12, %v868_v28  ;;  %v1593_v22 = vsel %vm1563_vm0, %v4372_v62, %v4371_v39  ;;  %v4373_v12 = vld [vmem:[#allocation30_spill] sm:$0xff]  ;;  %v4374_v27 = vld [vmem:[#allocation40_spill] sm:$0xff] }
 0x131   : > { %1093 = vrot.lane.b32.xlu1 %v2927_v38, %s2743_s24  ;;  %1505 = vrot.lane.b32.xlu0 %v2983_v54, %s2746_s10  ;;  %v1592_v28 = vsel %vm1563_vm0, %v4374_v27, %v4373_v12  ;;  %v1626_v59 = vsel %vm1596_vm2, %v1593_v22, %v3340_v21  ;;  %v4385_v22 = vld [vmem:[#allocation7_spill] sm:$0xff]  ;;  %v4386_v12 = vld [vmem:[#allocation5_spill] sm:$0xff] }
 0x132   : > { %v1625_v15 = vsel %vm1596_vm2, %v1592_v28, %v4375_v60 }
 0x133   : > { %v874_v14 = vpop.permute.xlu1 %873  ;;  %v872_v32 = vpop.permute.xlu0 %871 }
 0x134   : > { %v3531_v38 = vsel %vm1629_vm3, %v1620_v16, %v874_v14  ;;  %v3534_v58 = vsel %vm1629_vm3, %v1619_v35, %v872_v32  ;;  %v4376_v32 = vld [vmem:[#allocation4_spill] sm:$0xff] }
 0x135   : > { %1219 = vrot.lane.b32.xlu1 %v3077_v46, %s2744_s25  ;;  %1125 = vrot.lane.b32.xlu0 %v2983_v54, %s2743_s24 }
 0x137   : > { %v878_v26 = vpop.permute.xlu1 %877  ;;  %v876_v57 = vpop.permute.xlu0 %875 }
 0x138   : > { %v3551_v46 = vsel %vm1629_vm3, %v1622_v17, %v878_v26  ;;  %v3554_v54 = vsel %vm1629_vm3, %v1621_v61, %v876_v57 }
 0x139   : > { %1221 = vrot.lane.b32.xlu1 %v3074_v45, %s2744_s25  ;;  %1251 = vrot.lane.b32.xlu0 %v4364_v24, %s2744_s25  ;;  %v4380_v24 = vld [vmem:[#allocation36_spill] sm:$0xff] }
 0x13a   : > { %v1628_v51 = vsel %vm1596_vm2, %v4380_v24, %v4379_v50  ;;  %v2495_v50 = vld [vmem:[%s2791_s19 + $0x141] sm:$0xff] }
 0x13b   : > { %v882_v47 = vpop.permute.xlu1 %881  ;;  %v880_v48 = vpop.permute.xlu0 %879  ;;  %v2479_v24 = vld [vmem:[%s2791_s19 + $0x81] sm:$0xff] }
 0x13c   : > { %v3571_v45 = vsel %vm1629_vm3, %v1624_v41, %v882_v47  ;;  %v3574_v0 = vsel %vm1629_vm3, %v1623_v23, %v880_v48  ;;  %v4383_v41 = vld [vmem:[#allocation8_spill] sm:$0xff] }
 0x13d   : > { %1347 = vrot.lane.b32.xlu1 %v4370_v63, %s2745_s30  ;;  %1253 = vrot.lane.b32.xlu0 %v4362_v3, %s2744_s25  ;;  %v4378_v3 = vld [vmem:[#allocation43_spill] sm:$0xff] }
 0x13e   : > { %v1594_v21 = vsel %vm1563_vm0, %v4378_v3, %v4377_v1  ;;  %v2478_v1 = vld [vmem:[%s2791_s19 + $0x79] sm:$0xff] }
 0x13f   : > { %v886_v16 = vpop.permute.xlu1 %885  ;;  %v884_v18 = vpop.permute.xlu0 %883  ;;  %v1627_v17 = vsel %vm1596_vm2, %v1594_v21, %v3350_v19  ;;  %v4384_v19 = vld [vmem:[#allocation6_spill] sm:$0xff] }
 0x140   : > { %v3591_v35 = vsel %vm1629_vm3, %v1626_v59, %v886_v16  ;;  %v3594_v14 = vsel %vm1629_vm3, %v1625_v15, %v884_v18 }
 0x141   : > { %999 = vrot.lane.b32.xlu1 %v4376_v32, %s2742_s23  ;;  %1379 = vrot.lane.b32.xlu0 %v4376_v32, %s2745_s30  ;;  %v2494_v32 = vld [vmem:[%s2791_s19 + $0x139] sm:$0xff] }
 0x143   : > { %v890_v61 = vpop.permute.xlu1 %889  ;;  %v888_v26 = vpop.permute.xlu0 %887 }
 0x144   : > { %v3610_v57 = vsel %vm1629_vm3, %v1628_v51, %v890_v61  ;;  %v3613_v37 = vsel %vm1629_vm3, %v1627_v17, %v888_v26  ;;  %v4387_v17 = vld [vmem:[#allocation11_spill] sm:$0xff]  ;;  %v4388_v26 = vld [vmem:[#allocation17_spill] sm:$0xff] }
 0x145   : > { %4381 = vst [vmem:[#allocation22_spill] sm:$0xff] %v3610_v57  ;;  %1381 = vrot.lane.b32.xlu1 %v4382_v42, %s2745_s30  ;;  %1349 = vrot.lane.b32.xlu0 %v2477_v33, %s2745_s30 }
 0x147   : > { %v3618_v29 = vpop.permute.xlu1 %957  ;;  %v956_v30 = vpop.permute.xlu0 %955 }
 0x149   : > { %1507 = vrot.lane.b32.xlu1 %v4383_v41, %s2746_s10  ;;  %1475 = vrot.lane.b32.xlu0 %v4384_v19, %s2746_s10 }
 0x14b   : > { %v3624_v49 = vpop.permute.xlu1 %961  ;;  %v3626_v23 = vpop.permute.xlu0 %959 }
 0x14d   : > { %1001 = vrot.lane.b32.xlu1 %v4382_v42, %s2742_s23  ;;  %969 = vrot.lane.b32.xlu0 %v2477_v33, %s2742_s23  ;;  %v4389_v42 = vld [vmem:[#allocation21_spill] sm:$0xff] }
 0x14f   : > { %v3631_v47 = vpop.permute.xlu1 %965  ;;  %v3633_v48 = vpop.permute.xlu0 %963 }
 0x151   : > { %1127 = vrot.lane.b32.xlu1 %v4383_v41, %s2743_s24  ;;  %1095 = vrot.lane.b32.xlu0 %v4384_v19, %s2743_s24  ;;  %v1580_v41 = vsel %vm1563_vm0, %v4389_v42, %v4388_v26  ;;  %v4390_v19 = vld [vmem:[#allocation38_spill] sm:$0xff] }
 0x153   : > { %v988_v63 = vpop.permute.xlu1 %987  ;;  %v3639_v39 = vpop.permute.xlu0 %967 }
 0x155   : > { %1509 = vrot.lane.b32.xlu1 %v4385_v22, %s2746_s10  ;;  %1477 = vrot.lane.b32.xlu0 %v4386_v12, %s2746_s10 }
 0x157   : > { %v1084_v28 = vpop.permute.xlu1 %1083  ;;  %v3645_v59 = vpop.permute.xlu0 %989 }
 0x159   : > { %1129 = vrot.lane.b32.xlu1 %v4385_v22, %s2743_s24  ;;  %1097 = vrot.lane.b32.xlu0 %v4386_v12, %s2743_s24  ;;  %v4391_v12 = vld [vmem:[#allocation45_spill] sm:$0xff] }
 0x15b   : > { %v3651_v60 = vpop.permute.xlu1 %1085  ;;  %v1116_v15 = vpop.permute.xlu0 %1115 }
 0x15d   : > { %1255 = vrot.lane.b32.xlu1 %v4368_v9, %s2744_s25  ;;  %1223 = vrot.lane.b32.xlu0 %v3095_v10, %s2744_s25 }
 0x15f   : > { %v1212_v16 = vpop.permute.xlu1 %1211  ;;  %v3657_v18 = vpop.permute.xlu0 %1117 }
 0x161   : > { %1257 = vrot.lane.b32.xlu1 %v4366_v53, %s2744_s25  ;;  %1225 = vrot.lane.b32.xlu0 %v3092_v8, %s2744_s25  ;;  %v245_v53 = vld [vmem:[%s2791_s19] sm:$0xff] }
 0x162   : > { %v1564_v61 = vsel %vm1563_vm0, %v245_v53, %v4387_v17 }
 0x163   : > { %v1214_v21 = vpop.permute.xlu1 %1213  ;;  %v1244_v33 = vpop.permute.xlu0 %1243  ;;  %v1597_v22 = vsel %vm1596_vm2, %v1564_v61, %v4390_v19  ;;  %v4393_v19 = vld [vmem:[#allocation9_spill] sm:$0xff] }
 0x164   : > { %v1630_v53 = vsel %vm1629_vm3, %v1597_v22, %v4392_v2  ;;  %v246_v2 = vld [vmem:[%s2791_s19 + $0x8] sm:$0xff] }
 0x165   : > { %1383 = vrot.lane.b32.xlu1 %v2494_v32, %s2745_s30  ;;  %1351 = vrot.lane.b32.xlu0 %v2478_v1, %s2745_s30  ;;  %v1663_v57 = vsel %vm1662_vm4, %v1630_v53, %v956_v30 }
 0x166   : > { %v1696_v61 = vsel %vm1695_vm5, %v1663_v57, %v1084_v28 }
 0x167   : > { %v1340_v10 = vpop.permute.xlu1 %1339  ;;  %v3667_v9 = vpop.permute.xlu0 %1245 }
 0x169   : > { %1003 = vrot.lane.b32.xlu1 %v2494_v32, %s2742_s23  ;;  %971 = vrot.lane.b32.xlu0 %v2478_v1, %s2742_s23  ;;  %v1613_v32 = vsel %vm1596_vm2, %v1580_v41, %v4391_v12  ;;  %v2510_v1 = vld [vmem:[%s2791_s19 + $0x7a] sm:$0xff] }
 0x16a   : > { %v1646_v17 = vsel %vm1629_vm3, %v1613_v32, %v3486_v43  ;;  %v1729_v43 = vsel %vm1728_vm6, %v1696_v61, %v1212_v16  ;;  %v4395_v16 = vld [vmem:[#allocation37_spill] sm:$0xff] }
 0x16b   : > { %v3674_v8 = vpop.permute.xlu1 %991  ;;  %v1372_v51 = vpop.permute.xlu0 %1371  ;;  %v1679_v11 = vsel %vm1662_vm4, %v1646_v17, %v988_v63  ;;  %v1762_v30 = vsel %vm1761_vm7, %v1729_v43, %v1340_v10  ;;  %v2432_v10 = vld [vmem:[%s2791_s19 + $0x13a] sm:$0xff]  ;;  %v4399_v43 = vld [vmem:[#allocation44_spill] sm:$0xff] }
 0x16c   : > { %v1712_v41 = vsel %vm1695_vm5, %v1679_v11, %v1116_v15  ;;  %v4394_v15 = vld [vmem:[#allocation13_spill] sm:$0xff] }
 0x16d   : > { %1385 = vrot.lane.b32.xlu1 %v2495_v50, %s2745_s30  ;;  %1353 = vrot.lane.b32.xlu0 %v2479_v24, %s2745_s30  ;;  %v1745_v22 = vsel %vm1728_vm6, %v1712_v41, %v1244_v33  ;;  %v1565_v32 = vsel %vm1563_vm0, %v246_v2, %v4394_v15  ;;  %v4397_v41 = vld [vmem:[#allocation16_spill] sm:$0xff] }
 0x16e   : > { %v1778_v63 = vsel %vm1761_vm7, %v1745_v22, %v1372_v51  ;;  %v1598_v33 = vsel %vm1596_vm2, %v1565_v32, %v4395_v16  ;;  %v4396_v51 = vld [vmem:[#allocation52_spill] sm:$0xff] }
 0x16f   : > { %v1374_v26 = vpop.permute.xlu1 %1373  ;;  %v1342_v42 = vpop.permute.xlu0 %1341  ;;  %v1631_v53 = vsel %vm1629_vm3, %v1598_v33, %v4396_v51  ;;  %v2496_v51 = vld [vmem:[%s2791_s19 + $0x151] sm:$0xff] }
 0x171   : > { %1511 = vrot.lane.b32.xlu1 %v4393_v19, %s2746_s10  ;;  %1479 = vrot.lane.b32.xlu0 %v2510_v1, %s2746_s10 }
 0x173   : > { %v1500_v12 = vpop.permute.xlu1 %1499  ;;  %v1468_v57 = vpop.permute.xlu0 %1467 }
 0x174   : > { %v1795_v11 = vsel %vm1794_vm8, %v1762_v30, %v1468_v57  ;;  %v1811_v28 = vsel %vm1794_vm8, %v1778_v63, %v1500_v12  ;;  %v2527_v63 = vld [vmem:[%s2791_s19 + $0x142] sm:$0xff] }
 0x175   : > { %1005 = vrot.lane.b32.xlu1 %v2495_v50, %s2742_s23  ;;  %973 = vrot.lane.b32.xlu0 %v2479_v24, %s2742_s23  ;;  %v1664_v50 = vsel %vm1662_vm4, %v1631_v53, %v3618_v29  ;;  %v4398_v24 = vld [vmem:[#allocation20_spill] sm:$0xff]  ;;  %v2511_v12 = vld [vmem:[%s2791_s19 + $0x82] sm:$0xff] }
 0x176   : > { %2620 = vmatprep.mubr.msk.f32.mxu0 %vm1839_vm9, %v1795_v11  ;;  %2644 = vmatprep.mubr.msk.f32.mxu1 %vm1839_vm9, %v1811_v28  ;;  %v1581_v19 = vsel %vm1563_vm0, %v4398_v24, %v4397_v41  ;;  %v1697_v2 = vsel %vm1695_vm5, %v1664_v50, %v3651_v60  ;;  %v2480_v53 = vld [vmem:[%s2791_s19 + $0x91] sm:$0xff] }
 0x177   : > { %v1088_v17 = vpop.permute.xlu1 %1087  ;;  %v3717_v61 = vpop.permute.xlu0 %993  ;;  %v1614_v22 = vsel %vm1596_vm2, %v1581_v19, %v4399_v43  ;;  %v1730_v30 = vsel %vm1728_vm6, %v1697_v2, %v1214_v21  ;;  %v4400_v19 = vld [vmem:[#allocation10_spill] sm:$0xff] }
 0x178   : > { %v1647_v29 = vsel %vm1629_vm3, %v1614_v22, %v3484_v6  ;;  %v1763_v57 = vsel %vm1761_vm7, %v1730_v30, %v1342_v42  ;;  %v4401_v2 = vld [vmem:[#allocation14_spill] sm:$0xff]  ;;  %v4403_v22 = vld [vmem:[#allocation24_spill] sm:$0xff] }
 0x179   : > { %1131 = vrot.lane.b32.xlu1 %v2432_v10, %s2743_s24  ;;  %1099 = vrot.lane.b32.xlu0 %v2510_v1, %s2743_s24  ;;  %v1680_v60 = vsel %vm1662_vm4, %v1647_v29, %v3645_v59  ;;  %v1566_v43 = vsel %vm1563_vm0, %v4401_v2, %v4400_v19  ;;  %v4405_v29 = vld [vmem:[#allocation47_spill] sm:$0xff]  ;;  %v2528_v19 = vld [vmem:[%s2791_s19 + $0x152] sm:$0xff] }
 0x17a   : > { %v1713_v15 = vsel %vm1695_vm5, %v1680_v60, %v3657_v18  ;;  %v2448_v18 = vld [vmem:[%s2791_s19 + $0x90] sm:$0xff]  ;;  %v2481_v60 = vld [vmem:[%s2791_s19 + $0x99] sm:$0xff] }
 0x17b   : > { %v1470_v11 = vpop.permute.xlu1 %1469  ;;  %v1120_v28 = vpop.permute.xlu0 %1119  ;;  %v1746_v6 = vsel %vm1728_vm6, %v1713_v15, %v3667_v9  ;;  %v2512_v2 = vld [vmem:[%s2791_s19 + $0x92] sm:$0xff] }
 0x17c   : > { %v1796_v1 = vsel %vm1794_vm8, %v1763_v57, %v1470_v11  ;;  %v1779_v21 = vsel %vm1761_vm7, %v1746_v6, %v1374_v26  ;;  %v2449_v26 = vld [vmem:[%s2791_s19 + $0x98] sm:$0xff] }
 0x17d   : > { %1513 = vrot.lane.b32.xlu1 %v2527_v63, %s2746_s10  ;;  %1481 = vrot.lane.b32.xlu0 %v2511_v12, %s2746_s10  ;;  %v2497_v11 = vld [vmem:[%s2791_s19 + $0x159] sm:$0xff] }
 0x17e   : > { %2621 = vmatmul.mubr.msk.f32.vlgmr.msra.gmra.mrb[0].mxu0 %vm1839_vm9, %v1796_v1  ;;  %v4406_v1 = vld [vmem:[#allocation55_spill] sm:$0xff] }
 0x17f   : > { %v3747_v42 = vpop.permute.xlu1 %1089  ;;  %v1502_v59 = vpop.permute.xlu0 %1501 }
 0x180   : > { %v1812_v32 = vsel %vm1794_vm8, %v1779_v21, %v1502_v59 }
 0x181   : > { %1133 = vrot.lane.b32.xlu1 %v2527_v63, %s2743_s24  ;;  %1101 = vrot.lane.b32.xlu0 %v2511_v12, %s2743_s24  ;;  %v4404_v63 = vld [vmem:[#allocation42_spill] sm:$0xff] }
 0x182   : > { %2645 = vmatmul.mubr.msk.f32.vlgmr.msra.gmra.mrb[0].mxu1 %vm1839_vm9, %v1812_v32  ;;  %v1599_v12 = vsel %vm1596_vm2, %v1566_v43, %v4404_v63 }
 0x183   : > { %v1216_v16 = vpop.permute.xlu1 %1215  ;;  %v3754_v9 = vpop.permute.xlu0 %1121  ;;  %v1632_v15 = vsel %vm1629_vm3, %v1599_v12, %v4406_v1  ;;  %v4411_v1 = vld [vmem:[#allocation18_spill] sm:$0xff] }
 0x184   : > { %v1665_v32 = vsel %vm1662_vm4, %v1632_v15, %v3626_v23  ;;  %v4412_v15 = vld [vmem:[#allocation23_spill] sm:$0xff] }
 0x185   : > { %1259 = vrot.lane.b32.xlu1 %v4374_v27, %s2744_s25  ;;  %1227 = vrot.lane.b32.xlu0 %v2448_v18, %s2744_s25 }
 0x187   : > { %v1218_v33 = vpop.permute.xlu1 %1217  ;;  %v1248_v10 = vpop.permute.xlu0 %1247 }
 0x189   : > { %1261 = vrot.lane.b32.xlu1 %v4372_v62, %s2744_s25  ;;  %1229 = vrot.lane.b32.xlu0 %v2449_v26, %s2744_s25  ;;  %v4402_v62 = vld [vmem:[#allocation19_spill] sm:$0xff]  ;;  %v1698_v26 = vsel %vm1695_vm5, %v1665_v32, %v1088_v17 }
 0x18a   : > { %v1582_v30 = vsel %vm1563_vm0, %v4403_v22, %v4402_v62  ;;  %v4407_v22 = vld [vmem:[#allocation12_spill] sm:$0xff] }
 0x18b   : > { %v1344_v50 = vpop.permute.xlu1 %1343  ;;  %v1250_v41 = vpop.permute.xlu0 %1249  ;;  %v1615_v57 = vsel %vm1596_vm2, %v1582_v30, %v4405_v29  ;;  %v4408_v30 = vld [vmem:[#allocation15_spill] sm:$0xff] }
 0x18c   : > { %v1648_v6 = vsel %vm1629_vm3, %v1615_v57, %v3494_v44  ;;  %v1567_v63 = vsel %vm1563_vm0, %v4408_v30, %v4407_v22 }
 0x18d   : > { %1387 = vrot.lane.b32.xlu1 %v2496_v51, %s2745_s30  ;;  %1355 = vrot.lane.b32.xlu0 %v2480_v53, %s2745_s30  ;;  %v1681_v18 = vsel %vm1662_vm4, %v1648_v6, %v3674_v8  ;;  %v1583_v6 = vsel %vm1563_vm0, %v4412_v15, %v4411_v1 }
 0x18f   : > { %v3767_v27 = vpop.permute.xlu1 %995  ;;  %v1376_v24 = vpop.permute.xlu0 %1375 }
 0x190   : > { %v1683_v1 = vsel %vm1662_vm4, %v3514_v55, %v3767_v27 }
 0x191   : > { %1007 = vrot.lane.b32.xlu1 %v2496_v51, %s2742_s23  ;;  %975 = vrot.lane.b32.xlu0 %v2480_v53, %s2742_s23  ;;  %v1714_v51 = vsel %vm1695_vm5, %v1681_v18, %v1120_v28  ;;  %v1731_v53 = vsel %vm1728_vm6, %v1698_v26, %v1216_v16  ;;  %v4409_v16 = vld [vmem:[#allocation41_spill] sm:$0xff]  ;;  %v4413_v18 = vld [vmem:[#allocation46_spill] sm:$0xff] }
 0x192   : > { %v1747_v44 = vsel %vm1728_vm6, %v1714_v51, %v1248_v10  ;;  %v1764_v43 = vsel %vm1761_vm7, %v1731_v53, %v1344_v50  ;;  %v1600_v10 = vsel %vm1596_vm2, %v1567_v63, %v4409_v16  ;;  %v4410_v50 = vld [vmem:[#allocation54_spill] sm:$0xff]  ;;  %v1616_v26 = vsel %vm1596_vm2, %v1583_v6, %v4413_v18  ;;  %v2498_v63 = vld [vmem:[%s2791_s19 + $0x169] sm:$0xff] }
 0x193   : > { %v1378_v21 = vpop.permute.xlu1 %1377  ;;  %v1346_v59 = vpop.permute.xlu0 %1345  ;;  %v1780_v23 = vsel %vm1761_vm7, %v1747_v44, %v1376_v24  ;;  %v1633_v24 = vsel %vm1629_vm3, %v1600_v10, %v4410_v50  ;;  %v2482_v16 = vld [vmem:[%s2791_s19 + $0xa9] sm:$0xff] }
 0x194   : > { %v1666_v57 = vsel %vm1662_vm4, %v1633_v24, %v3624_v49  ;;  %v1649_v49 = vsel %vm1629_vm3, %v1616_v26, %v3492_v25  ;;  %v2529_v25 = vld [vmem:[%s2791_s19 + $0x15a] sm:$0xff]  ;;  %v2499_v26 = vld [vmem:[%s2791_s19 + $0x171] sm:$0xff] }
 0x195   : > { %1389 = vrot.lane.b32.xlu1 %v2497_v11, %s2745_s30  ;;  %1357 = vrot.lane.b32.xlu0 %v2481_v60, %s2745_s30  ;;  %v1699_v32 = vsel %vm1695_vm5, %v1666_v57, %v3747_v42  ;;  %v1682_v42 = vsel %vm1662_vm4, %v1649_v49, %v3717_v61  ;;  %v1667_v57 = vsel %vm1662_vm4, %v3386_v5, %v3633_v48  ;;  %v2483_v5 = vld [vmem:[%s2791_s19 + $0xb1] sm:$0xff] }
 0x196   : > { %v1732_v51 = vsel %vm1728_vm6, %v1699_v32, %v1218_v33 }
 0x197   : > { %v1504_v62 = vpop.permute.xlu1 %1503  ;;  %v1472_v8 = vpop.permute.xlu0 %1471  ;;  %v1765_v53 = vsel %vm1761_vm7, %v1732_v51, %v1346_v59  ;;  %v2513_v59 = vld [vmem:[%s2791_s19 + $0x9a] sm:$0xff] }
 0x198   : > { %v1813_v17 = vsel %vm1794_vm8, %v1780_v23, %v1504_v62  ;;  %v1797_v28 = vsel %vm1794_vm8, %v1764_v43, %v1472_v8 }
 0x199   : > { %1515 = vrot.lane.b32.xlu1 %v2528_v19, %s2746_s10  ;;  %1483 = vrot.lane.b32.xlu0 %v2512_v2, %s2746_s10 }
 0x19a   : > { %2623 = vmatprep.mubr.msk.f32.mxu0 %vm1839_vm9, %v1797_v28  ;;  %2647 = vmatprep.mubr.msk.f32.mxu1 %vm1839_vm9, %v1813_v17  ;;  %v2467_v17 = vld [vmem:[%s2791_s19 + $0x170] sm:$0xff] }
 0x19b   : > { %v1092_v12 = vpop.permute.xlu1 %1091  ;;  %v3814_v29 = vpop.permute.xlu0 %997  ;;  %v2451_v28 = vld [vmem:[%s2791_s19 + $0xb0] sm:$0xff] }
 0x19c   : > { %v1700_v15 = vsel %vm1695_vm5, %v1667_v57, %v1092_v12 }
 0x19d   : > { %1009 = vrot.lane.b32.xlu1 %v2497_v11, %s2742_s23  ;;  %977 = vrot.lane.b32.xlu0 %v2481_v60, %s2742_s23  ;;  %v1715_v60 = vsel %vm1695_vm5, %v1682_v42, %v3754_v9 }
 0x19e   : > { %v1748_v33 = vsel %vm1728_vm6, %v1715_v60, %v1250_v41 }
 0x19f   : > { %v1474_v44 = vpop.permute.xlu1 %1473  ;;  %v1124_v43 = vpop.permute.xlu0 %1123  ;;  %v1781_v23 = vsel %vm1761_vm7, %v1748_v33, %v1378_v21  ;;  %v2450_v21 = vld [vmem:[%s2791_s19 + $0xa8] sm:$0xff]  ;;  %v1668_v33 = vsel %vm1662_vm4, %v3383_v4, %v3631_v47 }
 0x1a0   : > { %v1798_v11 = vsel %vm1794_vm8, %v1765_v53, %v1474_v44  ;;  %v1716_v6 = vsel %vm1695_vm5, %v1683_v1, %v1124_v43  ;;  %v2530_v53 = vld [vmem:[%s2791_s19 + $0x16a] sm:$0xff]  ;;  %v2500_v1 = vld [vmem:[%s2791_s19 + $0x181] sm:$0xff] }
 0x1a1   : > { %1135 = vrot.lane.b32.xlu1 %v2528_v19, %s2743_s24  ;;  %1103 = vrot.lane.b32.xlu0 %v2512_v2, %s2743_s24  ;;  %v2514_v44 = vld [vmem:[%s2791_s19 + $0xaa] sm:$0xff] }
 0x1a2   : > { %2624 = vmatmul.mubr.msk.f32.gmra.mrb[2].mxu0 %vm1839_vm9, %v1798_v11 }
 0x1a3   : > { %v1094_v61 = vpop.permute.xlu1 %1093  ;;  %v1506_v62 = vpop.permute.xlu0 %1505 }
 0x1a4   : > { %v1814_v8 = vsel %vm1794_vm8, %v1781_v23, %v1506_v62 }
 0x1a5   : > { %1517 = vrot.lane.b32.xlu1 %v2529_v25, %s2746_s10  ;;  %1485 = vrot.lane.b32.xlu0 %v2513_v59, %s2746_s10 }
 0x1a6   : > { %2648 = vmatmul.mubr.msk.f32.gmra.mrb[2].mxu1 %vm1839_vm9, %v1814_v8 }
 0x1a7   : > { %v1220_v9 = vpop.permute.xlu1 %1219  ;;  %v1126_v41 = vpop.permute.xlu0 %1125 }
 0x1a8   : > { %v1733_v32 = vsel %vm1728_vm6, %v1700_v15, %v1220_v9  ;;  %v2484_v15 = vld [vmem:[%s2791_s19 + $0xc1] sm:$0xff] }
 0x1a9   : > { %1137 = vrot.lane.b32.xlu1 %v2529_v25, %s2743_s24  ;;  %1105 = vrot.lane.b32.xlu0 %v2513_v59, %s2743_s24  ;;  %v1684_v25 = vsel %vm1662_vm4, %v3511_v13, %v3814_v29  ;;  %v1701_v59 = vsel %vm1695_vm5, %v1668_v33, %v1094_v61  ;;  %v2516_v33 = vld [vmem:[%s2791_s19 + $0xc2] sm:$0xff] }
 0x1aa   : > { %v1717_v23 = vsel %vm1695_vm5, %v1684_v25, %v1126_v41  ;;  %v2531_v41 = vld [vmem:[%s2791_s19 + $0x172] sm:$0xff] }
 0x1ab   : > { %v1222_v19 = vpop.permute.xlu1 %1221  ;;  %v1252_v2 = vpop.permute.xlu0 %1251 }
 0x1ac   : > { %v1749_v18 = vsel %vm1728_vm6, %v1716_v6, %v1252_v2  ;;  %v1734_v62 = vsel %vm1728_vm6, %v1701_v59, %v1222_v19 }
 0x1ad   : > { %1263 = vrot.lane.b32.xlu1 %v4378_v3, %s2744_s25  ;;  %1231 = vrot.lane.b32.xlu0 %v2450_v21, %s2744_s25  ;;  %v2515_v21 = vld [vmem:[%s2791_s19 + $0xb2] sm:$0xff] }
 0x1af   : > { %v1348_v22 = vpop.permute.xlu1 %1347  ;;  %v1254_v30 = vpop.permute.xlu0 %1253 }
 0x1b0   : > { %v1766_v48 = vsel %vm1761_vm7, %v1733_v32, %v1348_v22  ;;  %v1750_v8 = vsel %vm1728_vm6, %v1717_v23, %v1254_v30  ;;  %v2468_v22 = vld [vmem:[%s2791_s19 + $0x180] sm:$0xff] }
 0x1b1   : > { %1265 = vrot.lane.b32.xlu1 %v2467_v17, %s2744_s25  ;;  %1233 = vrot.lane.b32.xlu0 %v2451_v28, %s2744_s25  ;;  %v2452_v30 = vld [vmem:[%s2791_s19 + $0xc0] sm:$0xff] }
 0x1b3   : > { %v3859_v10 = vpop.permute.xlu1 %999  ;;  %v1380_v50 = vpop.permute.xlu0 %1379 }
 0x1b4   : > { %v1782_v55 = vsel %vm1761_vm7, %v1749_v18, %v1380_v50  ;;  %v2469_v50 = vld [vmem:[%s2791_s19 + $0x188] sm:$0xff] }
 0x1b5   : > { %1391 = vrot.lane.b32.xlu1 %v2498_v63, %s2745_s30  ;;  %1359 = vrot.lane.b32.xlu0 %v2482_v16, %s2745_s30 }
 0x1b7   : > { %v1382_v3 = vpop.permute.xlu1 %1381  ;;  %v1350_v24 = vpop.permute.xlu0 %1349 }
 0x1b8   : > { %v1783_v4 = vsel %vm1761_vm7, %v1750_v8, %v1382_v3  ;;  %v1767_v47 = vsel %vm1761_vm7, %v1734_v62, %v1350_v24  ;;  %v2453_v3 = vld [vmem:[%s2791_s19 + $0xc8] sm:$0xff] }
 0x1b9   : > { %1011 = vrot.lane.b32.xlu1 %v2498_v63, %s2742_s23  ;;  %979 = vrot.lane.b32.xlu0 %v2482_v16, %s2742_s23 }
 0x1bb   : > { %v1508_v27 = vpop.permute.xlu1 %1507  ;;  %v1476_v12 = vpop.permute.xlu0 %1475 }
 0x1bc   : > { %v1815_v51 = vsel %vm1794_vm8, %v1782_v55, %v1508_v27  ;;  %v1799_v49 = vsel %vm1794_vm8, %v1766_v48, %v1476_v12  ;;  %v1685_v48 = vsel %vm1662_vm4, %v3534_v58, %v3859_v10 }
 0x1bd   : > { %1393 = vrot.lane.b32.xlu1 %v2499_v26, %s2745_s30  ;;  %1361 = vrot.lane.b32.xlu0 %v2483_v5, %s2745_s30 }
 0x1be   : > { %2626 = vmatprep.mubr.msk.f32.mxu0 %vm1839_vm9, %v1799_v49  ;;  %2650 = vmatprep.mubr.msk.f32.mxu1 %vm1839_vm9, %v1815_v51  ;;  %v2501_v49 = vld [vmem:[%s2791_s19 + $0x189] sm:$0xff] }
 0x1bf   : > { %v3887_v43 = vpop.permute.xlu1 %1001  ;;  %v3889_v42 = vpop.permute.xlu0 %969 }
 0x1c0   : > { %v1686_v8 = vsel %vm1662_vm4, %v3531_v38, %v3887_v43 }
 0x1c1   : > { %1519 = vrot.lane.b32.xlu1 %v2530_v53, %s2746_s10  ;;  %1487 = vrot.lane.b32.xlu0 %v2514_v44, %s2746_s10 }
 0x1c3   : > { %v1128_v11 = vpop.permute.xlu1 %1127  ;;  %v1096_v60 = vpop.permute.xlu0 %1095 }
 0x1c4   : > { %v1718_v55 = vsel %vm1695_vm5, %v1685_v48, %v1128_v11  ;;  %v2503_v48 = vld [vmem:[%s2791_s19 + $0x1a1] sm:$0xff] }
 0x1c5   : > { %1013 = vrot.lane.b32.xlu1 %v2499_v26, %s2742_s23  ;;  %981 = vrot.lane.b32.xlu0 %v2483_v5, %s2742_s23  ;;  %v1669_v5 = vsel %vm1662_vm4, %v3406_v52, %v3639_v39  ;;  %v2485_v52 = vld [vmem:[%s2791_s19 + $0xc9] sm:$0xff] }
 0x1c6   : > { %v1702_v27 = vsel %vm1695_vm5, %v1669_v5, %v1096_v60  ;;  %v2532_v60 = vld [vmem:[%s2791_s19 + $0x182] sm:$0xff] }
 0x1c7   : > { %v1510_v9 = vpop.permute.xlu1 %1509  ;;  %v1478_v13 = vpop.permute.xlu0 %1477 }
 0x1c8   : > { %v1816_v29 = vsel %vm1794_vm8, %v1783_v4, %v1510_v9  ;;  %v1800_v61 = vsel %vm1794_vm8, %v1767_v47, %v1478_v13  ;;  %v1670_v4 = vsel %vm1662_vm4, %v3403_v34, %v3889_v42 }
 0x1c9   : > { %1139 = vrot.lane.b32.xlu1 %v2530_v53, %s2743_s24  ;;  %1107 = vrot.lane.b32.xlu0 %v2514_v44, %s2743_s24 }
 0x1ca   : > { %2627 = vmatmul.mubr.msk.f32.gmra.mrb[4].mxu0 %vm1839_vm9, %v1800_v61  ;;  %2651 = vmatmul.mubr.msk.f32.gmra.mrb[4].mxu1 %vm1839_vm9, %v1816_v29 }
 0x1cb   : > { %v1130_v19 = vpop.permute.xlu1 %1129  ;;  %v1098_v2 = vpop.permute.xlu0 %1097 }
 0x1cc   : > { %v1719_v47 = vsel %vm1695_vm5, %v1686_v8, %v1130_v19  ;;  %v1703_v9 = vsel %vm1695_vm5, %v1670_v4, %v1098_v2  ;;  %v2517_v19 = vld [vmem:[%s2791_s19 + $0xca] sm:$0xff] }
 0x1cd   : > { %1521 = vrot.lane.b32.xlu1 %v2531_v41, %s2746_s10  ;;  %1489 = vrot.lane.b32.xlu0 %v2515_v21, %s2746_s10 }
 0x1cf   : > { %v1256_v17 = vpop.permute.xlu1 %1255  ;;  %v1224_v28 = vpop.permute.xlu0 %1223 }
 0x1d0   : > { %v1751_v12 = vsel %vm1728_vm6, %v1718_v55, %v1256_v17  ;;  %v1735_v51 = vsel %vm1728_vm6, %v1702_v27, %v1224_v28  ;;  %v2487_v55 = vld [vmem:[%s2791_s19 + $0xe1] sm:$0xff] }
 0x1d1   : > { %1141 = vrot.lane.b32.xlu1 %v2531_v41, %s2743_s24  ;;  %1109 = vrot.lane.b32.xlu0 %v2515_v21, %s2743_s24  ;;  %v2533_v21 = vld [vmem:[%s2791_s19 + $0x18a] sm:$0xff] }
 0x1d3   : > { %v1258_v63 = vpop.permute.xlu1 %1257  ;;  %v1226_v16 = vpop.permute.xlu0 %1225 }
 0x1d4   : > { %v1752_v13 = vsel %vm1728_vm6, %v1719_v47, %v1258_v63  ;;  %v1736_v29 = vsel %vm1728_vm6, %v1703_v9, %v1226_v16  ;;  %v2454_v63 = vld [vmem:[%s2791_s19 + $0xd8] sm:$0xff] }
 0x1d5   : > { %1267 = vrot.lane.b32.xlu1 %v2468_v22, %s2744_s25  ;;  %1235 = vrot.lane.b32.xlu0 %v2452_v30, %s2744_s25  ;;  %v2470_v30 = vld [vmem:[%s2791_s19 + $0x198] sm:$0xff] }
 0x1d7   : > { %v1384_v24 = vpop.permute.xlu1 %1383  ;;  %v1352_v57 = vpop.permute.xlu0 %1351 }
 0x1d8   : > { %v1784_v39 = vsel %vm1761_vm7, %v1751_v12, %v1384_v24  ;;  %v1768_v58 = vsel %vm1761_vm7, %v1735_v51, %v1352_v57  ;;  %v2455_v24 = vld [vmem:[%s2791_s19 + $0xe0] sm:$0xff] }
 0x1d9   : > { %1269 = vrot.lane.b32.xlu1 %v2469_v50, %s2744_s25  ;;  %1237 = vrot.lane.b32.xlu0 %v2453_v3, %s2744_s25  ;;  %v2471_v3 = vld [vmem:[%s2791_s19 + $0x1a0] sm:$0xff] }
 0x1db   : > { %v3929_v6 = vpop.permute.xlu1 %1003  ;;  %v3931_v32 = vpop.permute.xlu0 %971 }
 0x1dc   : > { %v1687_v51 = vsel %vm1662_vm4, %v3554_v54, %v3929_v6  ;;  %v2518_v54 = vld [vmem:[%s2791_s19 + $0xda] sm:$0xff] }
 0x1dd   : > { %1395 = vrot.lane.b32.xlu1 %v2500_v1, %s2745_s30  ;;  %1363 = vrot.lane.b32.xlu0 %v2484_v15, %s2745_s30 }
 0x1df   : > { %v1386_v18 = vpop.permute.xlu1 %1385  ;;  %v1354_v26 = vpop.permute.xlu0 %1353 }
 0x1e0   : > { %v1785_v38 = vsel %vm1761_vm7, %v1752_v13, %v1386_v18  ;;  %v1769_v43 = vsel %vm1761_vm7, %v1736_v29, %v1354_v26  ;;  %v2486_v18 = vld [vmem:[%s2791_s19 + $0xd9] sm:$0xff] }
 0x1e1   : > { %1015 = vrot.lane.b32.xlu1 %v2500_v1, %s2742_s23  ;;  %983 = vrot.lane.b32.xlu0 %v2484_v15, %s2742_s23  ;;  %v2502_v15 = vld [vmem:[%s2791_s19 + $0x199] sm:$0xff] }
 0x1e3   : > { %v1512_v10 = vpop.permute.xlu1 %1511  ;;  %v1480_v53 = vpop.permute.xlu0 %1479 }
 0x1e4   : > { %v1817_v44 = vsel %vm1794_vm8, %v1784_v39, %v1512_v10  ;;  %v1801_v11 = vsel %vm1794_vm8, %v1768_v58, %v1480_v53  ;;  %v2534_v53 = vld [vmem:[%s2791_s19 + $0x19a] sm:$0xff] }
 0x1e5   : > { %1397 = vrot.lane.b32.xlu1 %v2501_v49, %s2745_s30  ;;  %1365 = vrot.lane.b32.xlu0 %v2485_v52, %s2745_s30 }
 0x1e6   : > { %2629 = vmatprep.mubr.msk.f32.mxu0 %vm1839_vm9, %v1801_v11  ;;  %2653 = vmatprep.mubr.msk.f32.mxu1 %vm1839_vm9, %v1817_v44 }
 0x1e7   : > { %v3959_v25 = vpop.permute.xlu1 %1005  ;;  %v3961_v59 = vpop.permute.xlu0 %973 }
 0x1e8   : > { %v1688_v9 = vsel %vm1662_vm4, %v3551_v46, %v3959_v25  ;;  %v1672_v13 = vsel %vm1662_vm4, %v3423_v31, %v3961_v59 }
 0x1e9   : > { %1523 = vrot.lane.b32.xlu1 %v2532_v60, %s2746_s10  ;;  %1491 = vrot.lane.b32.xlu0 %v2516_v33, %s2746_s10 }
 0x1eb   : > { %v1132_v23 = vpop.permute.xlu1 %1131  ;;  %v1100_v62 = vpop.permute.xlu0 %1099 }
 0x1ed   : > { %1017 = vrot.lane.b32.xlu1 %v2501_v49, %s2742_s23  ;;  %985 = vrot.lane.b32.xlu0 %v2485_v52, %s2742_s23  ;;  %v1671_v49 = vsel %vm1662_vm4, %v3426_v20, %v3931_v32  ;;  %v1720_v52 = vsel %vm1695_vm5, %v1687_v51, %v1132_v23  ;;  %v2519_v23 = vld [vmem:[%s2791_s19 + $0xe2] sm:$0xff] }
 0x1ee   : > { %v1704_v39 = vsel %vm1695_vm5, %v1671_v49, %v1100_v62 }
 0x1ef   : > { %v1514_v61 = vpop.permute.xlu1 %1513  ;;  %v1482_v34 = vpop.permute.xlu0 %1481 }
 0x1f0   : > { %v1818_v42 = vsel %vm1794_vm8, %v1785_v38, %v1514_v61  ;;  %v1802_v41 = vsel %vm1794_vm8, %v1769_v43, %v1482_v34 }
 0x1f1   : > { %1143 = vrot.lane.b32.xlu1 %v2532_v60, %s2743_s24  ;;  %1111 = vrot.lane.b32.xlu0 %v2516_v33, %s2743_s24  ;;  %v2535_v33 = vld [vmem:[%s2791_s19 + $0x1a2] sm:$0xff] }
 0x1f2   : > { %2630 = vmatmul.mubr.msk.f32.gmra.mrb[6].mxu0 %vm1839_vm9, %v1802_v41  ;;  %2654 = vmatmul.mubr.msk.f32.gmra.mrb[6].mxu1 %vm1839_vm9, %v1818_v42 }
 0x1f3   : > { %v1134_v2 = vpop.permute.xlu1 %1133  ;;  %v1102_v17 = vpop.permute.xlu0 %1101 }
 0x1f4   : > { %v1721_v29 = vsel %vm1695_vm5, %v1688_v9, %v1134_v2  ;;  %v1705_v38 = vsel %vm1695_vm5, %v1672_v13, %v1102_v17  ;;  %v4089_v13 = vld [vmem:[%s4267_s2] ss:$0 sm:$0xff] }
 0x1f5   : > { %1525 = vrot.lane.b32.xlu1 %v2533_v21, %s2746_s10  ;;  %1493 = vrot.lane.b32.xlu0 %v2517_v19, %s2746_s10 }
 0x1f7   : > { %v1260_v28 = vpop.permute.xlu1 %1259  ;;  %v1228_v22 = vpop.permute.xlu0 %1227 }
 0x1f8   : > { %v1753_v58 = vsel %vm1728_vm6, %v1720_v52, %v1260_v28  ;;  %v1737_v10 = vsel %vm1728_vm6, %v1704_v39, %v1228_v22 }
 0x1f9   : > { %1145 = vrot.lane.b32.xlu1 %v2533_v21, %s2743_s24  ;;  %1113 = vrot.lane.b32.xlu0 %v2517_v19, %s2743_s24 }
 0x1fb   : > { %v1262_v16 = vpop.permute.xlu1 %1261  ;;  %v1230_v50 = vpop.permute.xlu0 %1229 }
 0x1fc   : > { %v1754_v43 = vsel %vm1728_vm6, %v1721_v29, %v1262_v16  ;;  %v1738_v61 = vsel %vm1728_vm6, %v1705_v38, %v1230_v50 }
 0x1fd   : > { %1271 = vrot.lane.b32.xlu1 %v2470_v30, %s2744_s25  ;;  %1239 = vrot.lane.b32.xlu0 %v2454_v63, %s2744_s25 }
 0x1ff   : > { %v1388_v57 = vpop.permute.xlu1 %1387  ;;  %v1356_v1 = vpop.permute.xlu0 %1355 }
 0x200   : > { %v1786_v6 = vsel %vm1761_vm7, %v1753_v58, %v1388_v57  ;;  %v1770_v20 = vsel %vm1761_vm7, %v1737_v10, %v1356_v1 }
 0x201   : > { %1273 = vrot.lane.b32.xlu1 %v2471_v3, %s2744_s25  ;;  %1241 = vrot.lane.b32.xlu0 %v2455_v24, %s2744_s25 }
 0x203   : > { %v4001_v26 = vpop.permute.xlu1 %1007  ;;  %v4003_v5 = vpop.permute.xlu0 %975 }
 0x204   : > { %v1689_v24 = vsel %vm1662_vm4, %v3574_v0, %v4001_v26  ;;  %v1673_v57 = vsel %vm1662_vm4, %v3446_v36, %v4003_v5 }
 0x205   : > { %1399 = vrot.lane.b32.xlu1 %v2502_v15, %s2745_s30  ;;  %1367 = vrot.lane.b32.xlu0 %v2486_v18, %s2745_s30 }
 0x207   : > { %v1390_v27 = vpop.permute.xlu1 %1389  ;;  %v1358_v12 = vpop.permute.xlu0 %1357 }
 0x208   : > { %v1787_v34 = vsel %vm1761_vm7, %v1754_v43, %v1390_v27  ;;  %v1771_v42 = vsel %vm1761_vm7, %v1738_v61, %v1358_v12 }
 0x209   : > { %1401 = vrot.lane.b32.xlu1 %v2503_v48, %s2745_s30  ;;  %1369 = vrot.lane.b32.xlu0 %v2487_v55, %s2745_s30 }
 0x20b   : > { %v1516_v32 = vpop.permute.xlu1 %1515  ;;  %v1484_v44 = vpop.permute.xlu0 %1483 }
 0x20c   : > { %v1819_v11 = vsel %vm1794_vm8, %v1786_v6, %v1516_v32  ;;  %v1803_v60 = vsel %vm1794_vm8, %v1770_v20, %v1484_v44 }
 0x20d   : > { %1527 = vrot.lane.b32.xlu1 %v2534_v53, %s2746_s10  ;;  %1495 = vrot.lane.b32.xlu0 %v2518_v54, %s2746_s10 }
 0x20e   : > { %2632 = vmatprep.mubr.msk.f32.mxu0 %vm1839_vm9, %v1803_v60  ;;  %2656 = vmatprep.mubr.msk.f32.mxu1 %vm1839_vm9, %v1819_v11 }
 0x20f   : > { %v1010_v62 = vpop.permute.xlu1 %1009  ;;  %v978_v8 = vpop.permute.xlu0 %977 }
 0x210   : > { %v1690_v39 = vsel %vm1662_vm4, %v3571_v45, %v1010_v62  ;;  %v1674_v58 = vsel %vm1662_vm4, %v3443_v7, %v978_v8 }
 0x211   : > { %1529 = vrot.lane.b32.xlu1 %v2535_v33, %s2746_s10  ;;  %1497 = vrot.lane.b32.xlu0 %v2519_v23, %s2746_s10 }
 0x213   : > { %v1136_v4 = vpop.permute.xlu1 %1135  ;;  %v1104_v47 = vpop.permute.xlu0 %1103 }
 0x214   : > { %v1722_v1 = vsel %vm1695_vm5, %v1689_v24, %v1136_v4  ;;  %v1706_v15 = vsel %vm1695_vm5, %v1673_v57, %v1104_v47 }
 0x217   : > { %v1518_v41 = vpop.permute.xlu1 %1517  ;;  %v1486_v21 = vpop.permute.xlu0 %1485 }
 0x218   : > { %v1820_v46 = vsel %vm1794_vm8, %v1787_v34, %v1518_v41  ;;  %v1804_v25 = vsel %vm1794_vm8, %v1771_v42, %v1486_v21 }
 0x219   : > { %2633 = vmatmul.mubr.msk.f32.gmra.mrb[8].mxu0 %vm1839_vm9, %v1804_v25  ;;  %2657 = vmatmul.mubr.msk.f32.gmra.mrb[8].mxu1 %vm1839_vm9, %v1820_v46 }
 0x21b   : > { %v1138_v31 = vpop.permute.xlu1 %1137  ;;  %v1106_v59 = vpop.permute.xlu0 %1105 }
 0x21c   : > { %v1723_v10 = vsel %vm1695_vm5, %v1690_v39, %v1138_v31  ;;  %v1707_v53 = vsel %vm1695_vm5, %v1674_v58, %v1106_v59 }
 0x21f   : > { %v1264_v19 = vpop.permute.xlu1 %1263  ;;  %v1232_v2 = vpop.permute.xlu0 %1231 }
 0x220   : > { %v1755_v18 = vsel %vm1728_vm6, %v1722_v1, %v1264_v19  ;;  %v1739_v48 = vsel %vm1728_vm6, %v1706_v15, %v1232_v2 }
 0x223   : > { %v1266_v17 = vpop.permute.xlu1 %1265  ;;  %v1234_v28 = vpop.permute.xlu0 %1233 }
 0x224   : > { %v1756_v54 = vsel %vm1728_vm6, %v1723_v10, %v1266_v17  ;;  %v1740_v6 = vsel %vm1728_vm6, %v1707_v53, %v1234_v28 }
 0x227   : > { %v1392_v22 = vpop.permute.xlu1 %1391  ;;  %v1360_v30 = vpop.permute.xlu0 %1359 }
 0x228   : > { %v1788_v55 = vsel %vm1761_vm7, %v1755_v18, %v1392_v22  ;;  %v1772_v27 = vsel %vm1761_vm7, %v1739_v48, %v1360_v30 }
 0x22b   : > { %v1012_v63 = vpop.permute.xlu1 %1011  ;;  %v980_v16 = vpop.permute.xlu0 %979 }
 0x22c   : > { %v1691_v19 = vsel %vm1662_vm4, %v3594_v14, %v1012_v63  ;;  %v1675_v2 = vsel %vm1662_vm4, %v3462_v56, %v980_v16 }
 0x22f   : > { %v1394_v50 = vpop.permute.xlu1 %1393  ;;  %v1362_v3 = vpop.permute.xlu0 %1361 }
 0x230   : > { %v1789_v20 = vsel %vm1761_vm7, %v1756_v54, %v1394_v50  ;;  %v1773_v32 = vsel %vm1761_vm7, %v1740_v6, %v1362_v3 }
 0x233   : > { %v1520_v12 = vpop.permute.xlu1 %1519  ;;  %v1488_v51 = vpop.permute.xlu0 %1487 }
 0x234   : > { %v1821_v0 = vsel %vm1794_vm8, %v1788_v55, %v1520_v12  ;;  %v1805_v26 = vsel %vm1794_vm8, %v1772_v27, %v1488_v51 }
 0x235   : > { %2635 = vmatprep.mubr.msk.f32.mxu0 %vm1839_vm9, %v1805_v26  ;;  %2659 = vmatprep.mubr.msk.f32.mxu1 %vm1839_vm9, %v1821_v0 }
 0x237   : > { %v4067_v36 = vpop.permute.xlu1 %1013  ;;  %v4069_v5 = vpop.permute.xlu0 %981 }
 0x238   : > { %v1692_v18 = vsel %vm1662_vm4, %v3591_v35, %v4067_v36  ;;  %v1676_v48 = vsel %vm1662_vm4, %v3459_v40, %v4069_v5 }
 0x23b   : > { %v1140_v49 = vpop.permute.xlu1 %1139  ;;  %v1108_v52 = vpop.permute.xlu0 %1107 }
 0x23c   : > { %v1724_v17 = vsel %vm1695_vm5, %v1691_v19, %v1140_v49  ;;  %v1708_v28 = vsel %vm1695_vm5, %v1675_v2, %v1108_v52 }
 0x23f   : > { %v1522_v44 = vpop.permute.xlu1 %1521  ;;  %v1490_v11 = vpop.permute.xlu0 %1489 }
 0x240   : > { %v1822_v45 = vsel %vm1794_vm8, %v1789_v20, %v1522_v44  ;;  %v1806_v60 = vsel %vm1794_vm8, %v1773_v32, %v1490_v11 }
 0x241   : > { %2636 = vmatmul.mubr.msk.f32.gmra.mrb[10].mxu0 %vm1839_vm9, %v1806_v60  ;;  %2660 = vmatmul.mubr.msk.f32.gmra.mrb[10].mxu1 %vm1839_vm9, %v1822_v45 }
 0x243   : > { %v1142_v7 = vpop.permute.xlu1 %1141  ;;  %v1110_v33 = vpop.permute.xlu0 %1109 }
 0x244   : > { %v1725_v55 = vsel %vm1695_vm5, %v1692_v18, %v1142_v7  ;;  %v1709_v27 = vsel %vm1695_vm5, %v1676_v48, %v1110_v33 }
 0x247   : > { %v1268_v23 = vpop.permute.xlu1 %1267  ;;  %v1236_v62 = vpop.permute.xlu0 %1235 }
 0x248   : > { %v1757_v22 = vsel %vm1728_vm6, %v1724_v17, %v1268_v23  ;;  %v1741_v30 = vsel %vm1728_vm6, %v1708_v28, %v1236_v62 }
 0x24b   : > { %v1270_v8 = vpop.permute.xlu1 %1269  ;;  %v1238_v4 = vpop.permute.xlu0 %1237 }
 0x24c   : > { %v1758_v12 = vsel %vm1728_vm6, %v1725_v55, %v1270_v8  ;;  %v1742_v51 = vsel %vm1728_vm6, %v1709_v27, %v1238_v4  ;;  %v4414_v4 = vld [vmem:[#allocation57_spill] sm:$0xff] }
 0x24f   : > { %v1396_v47 = vpop.permute.xlu1 %1395  ;;  %v1364_v9 = vpop.permute.xlu0 %1363 }
 0x250   : > { %v1790_v50 = vsel %vm1761_vm7, %v1757_v22, %v1396_v47  ;;  %v1774_v3 = vsel %vm1761_vm7, %v1741_v30, %v1364_v9 }
 0x251   : > { %v2622_v29 = vpop.f32.mrb[0].mxu0 }
 0x252   : > { %v2012_v38 = vadd.f32 %v2622_v29, %v4089_v13  ;;  %v2006_v43 = vpop.f32.mrb[1].mxu0 }
 0x253   : > { %v2007_v61 = vadd.f32 %v4089_v13, %v2006_v43  ;;  %v4098_v34 = vpop.permute.xlu1 %1015  ;;  %v4100_v42 = vpop.permute.xlu0 %983 }
 0x254   : > { %2166 = vst.msk [vmem:[%s4094_s20 + $0x8] sm:$0xff] %vm1596_vm2, %v2012_v38  ;;  %v1693_v8 = vsel %vm1662_vm4, %v3613_v37, %v4098_v34  ;;  %v1677_v47 = vsel %vm1662_vm4, %v4414_v4, %v4100_v42 }
 0x255   : > { %2165 = vst.msk [vmem:[%s4094_s20] sm:$0xff] %vm1596_vm2, %v2007_v61  ;;  %v2646_v41 = vpop.f32.mrb[0].mxu1 }
 0x256   : > { %v2092_v21 = vadd.f32 %v2646_v41, %v4089_v13  ;;  %v2086_v46 = vpop.f32.mrb[1].mxu1 }
 0x257   : > { %v2087_v25 = vadd.f32 %v4089_v13, %v2086_v46  ;;  %v1398_v31 = vpop.permute.xlu1 %1397  ;;  %v1366_v59 = vpop.permute.xlu0 %1365  ;;  %v4416_v46 = vld [vmem:[#allocation56_spill] sm:$0xff] }
 0x258   : > { %2182 = vst.msk [vmem:[%s4094_s20 + $0x88] sm:$0xff] %vm1596_vm2, %v2092_v21  ;;  %v1791_v0 = vsel %vm1761_vm7, %v1758_v12, %v1398_v31  ;;  %v1775_v26 = vsel %vm1761_vm7, %v1742_v51, %v1366_v59  ;;  %v4415_v21 = vld [vmem:[#allocation22_spill] sm:$0xff] }
 0x259   : > { %2181 = vst.msk [vmem:[%s4094_s20 + $0x80] sm:$0xff] %vm1596_vm2, %v2087_v25 }
 0x25b   : > { %v1524_v14 = vpop.permute.xlu1 %1523  ;;  %v1492_v63 = vpop.permute.xlu0 %1491 }
 0x25c   : > { %v1823_v56 = vsel %vm1794_vm8, %v1790_v50, %v1524_v14  ;;  %v1807_v16 = vsel %vm1794_vm8, %v1774_v3, %v1492_v63 }
 0x25d   : > { %2638 = vmatprep.mubr.msk.f32.mxu0 %vm1839_vm9, %v1807_v16  ;;  %2662 = vmatprep.mubr.msk.f32.mxu1 %vm1839_vm9, %v1823_v56 }
 0x25f   : > { %v1018_v24 = vpop.permute.xlu1 %1017  ;;  %v986_v57 = vpop.permute.xlu0 %985 }
 0x260   : > { %v1694_v42 = vsel %vm1662_vm4, %v4415_v21, %v1018_v24  ;;  %v1678_v25 = vsel %vm1662_vm4, %v4416_v46, %v986_v57 }
 0x263   : > { %v1144_v1 = vpop.permute.xlu1 %1143  ;;  %v1112_v15 = vpop.permute.xlu0 %1111 }
 0x264   : > { %v1726_v9 = vsel %vm1695_vm5, %v1693_v8, %v1144_v1  ;;  %v1710_v29 = vsel %vm1695_vm5, %v1677_v47, %v1112_v15 }
 0x267   : > { %v1526_v49 = vpop.permute.xlu1 %1525  ;;  %v1494_v52 = vpop.permute.xlu0 %1493 }
 0x268   : > { %v1824_v35 = vsel %vm1794_vm8, %v1791_v0, %v1526_v49  ;;  %v1808_v36 = vsel %vm1794_vm8, %v1775_v26, %v1494_v52 }
 0x269   : > { %2639 = vmatmul.mubr.msk.f32.gmra.mrb[12].mxu0 %vm1839_vm9, %v1808_v36  ;;  %2663 = vmatmul.mubr.msk.f32.gmra.mrb[12].mxu1 %vm1839_vm9, %v1824_v35 }
 0x26b   : > { %v1146_v40 = vpop.permute.xlu1 %1145  ;;  %v1114_v5 = vpop.permute.xlu0 %1113 }
 0x26c   : > { %v1727_v19 = vsel %vm1695_vm5, %v1694_v42, %v1146_v40  ;;  %v1711_v2 = vsel %vm1695_vm5, %v1678_v25, %v1114_v5 }
 0x26f   : > { %v1272_v39 = vpop.permute.xlu1 %1271  ;;  %v1240_v58 = vpop.permute.xlu0 %1239 }
 0x270   : > { %v1759_v38 = vsel %vm1728_vm6, %v1726_v9, %v1272_v39  ;;  %v1743_v43 = vsel %vm1728_vm6, %v1710_v29, %v1240_v58 }
 0x273   : > { %v1274_v10 = vpop.permute.xlu1 %1273  ;;  %v1242_v53 = vpop.permute.xlu0 %1241 }
 0x274   : > { %v1760_v17 = vsel %vm1728_vm6, %v1727_v19, %v1274_v10  ;;  %v1744_v28 = vsel %vm1728_vm6, %v1711_v2, %v1242_v53 }
 0x275   : > { %v2625_v54 = vpop.f32.mrb[2].mxu0 }
 0x276   : > { %v2022_v6 = vadd.f32 %v2625_v54, %v4089_v13  ;;  %v2016_v20 = vpop.f32.mrb[3].mxu0 }
 0x277   : > { %v2017_v32 = vadd.f32 %v4089_v13, %v2016_v20  ;;  %v1400_v44 = vpop.permute.xlu1 %1399  ;;  %v1368_v11 = vpop.permute.xlu0 %1367 }
 0x278   : > { %2168 = vst.msk [vmem:[%s4094_s20 + $0x18] sm:$0xff] %vm1596_vm2, %v2022_v6  ;;  %v1792_v61 = vsel %vm1761_vm7, %v1759_v38, %v1400_v44  ;;  %v1776_v37 = vsel %vm1761_vm7, %v1743_v43, %v1368_v11 }
 0x279   : > { %2167 = vst.msk [vmem:[%s4094_s20 + $0x10] sm:$0xff] %vm1596_vm2, %v2017_v32  ;;  %v2649_v45 = vpop.f32.mrb[2].mxu1 }
 0x27a   : > { %v2102_v60 = vadd.f32 %v2649_v45, %v4089_v13  ;;  %v2096_v7 = vpop.f32.mrb[3].mxu1 }
 0x27b   : > { %v2097_v33 = vadd.f32 %v4089_v13, %v2096_v7  ;;  %v1402_v23 = vpop.permute.xlu1 %1401  ;;  %v1370_v62 = vpop.permute.xlu0 %1369 }
 0x27c   : > { %2184 = vst.msk [vmem:[%s4094_s20 + $0x98] sm:$0xff] %vm1596_vm2, %v2102_v60  ;;  %v1793_v22 = vsel %vm1761_vm7, %v1760_v17, %v1402_v23  ;;  %v1777_v30 = vsel %vm1761_vm7, %v1744_v28, %v1370_v62 }
 0x27d   : > { %2183 = vst.msk [vmem:[%s4094_s20 + $0x90] sm:$0xff] %vm1596_vm2, %v2097_v33 }
 0x27f   : > { %v1528_v34 = vpop.permute.xlu1 %1527  ;;  %v1496_v41 = vpop.permute.xlu0 %1495 }
 0x280   : > { %v1825_v31 = vsel %vm1794_vm8, %v1792_v61, %v1528_v34  ;;  %v1809_v59 = vsel %vm1794_vm8, %v1776_v37, %v1496_v41 }
 0x281   : > { %2641 = vmatprep.mubr.msk.f32.mxu0 %vm1839_vm9, %v1809_v59  ;;  %2665 = vmatprep.mubr.msk.f32.mxu1 %vm1839_vm9, %v1825_v31 }
 0x283   : > { %v1530_v50 = vpop.permute.xlu1 %1529  ;;  %v1498_v3 = vpop.permute.xlu0 %1497 }
 0x284   : > { %v1826_v14 = vsel %vm1794_vm8, %v1793_v22, %v1530_v50  ;;  %v1810_v63 = vsel %vm1794_vm8, %v1777_v30, %v1498_v3 }
 0x285   : > { %2642 = vmatmul.mubr.msk.f32.gmra.mrb[14].mxu0 %vm1839_vm9, %v1810_v63  ;;  %2666 = vmatmul.mubr.msk.f32.gmra.mrb[14].mxu1 %vm1839_vm9, %v1826_v14 }
 0x29d   : > { %v2628_v56 = vpop.f32.mrb[4].mxu0  ;;  %v2652_v16 = vpop.f32.mrb[4].mxu1 }
 0x29e   : > { %v2032_v24 = vadd.f32 %v2628_v56, %v4089_v13  ;;  %v2112_v57 = vadd.f32 %v2652_v16, %v4089_v13  ;;  %v2026_v1 = vpop.f32.mrb[5].mxu0  ;;  %v2106_v15 = vpop.f32.mrb[5].mxu1 }
 0x29f   : > { %v2027_v18 = vadd.f32 %v4089_v13, %v2026_v1  ;;  %v2107_v48 = vadd.f32 %v4089_v13, %v2106_v15 }
 0x2a0   : > { %2170 = vst.msk [vmem:[%s4094_s20 + $0x28] sm:$0xff] %vm1596_vm2, %v2032_v24  ;;  %2186 = vst.msk [vmem:[%s4094_s20 + $0xa8] sm:$0xff] %vm1596_vm2, %v2112_v57 }
 0x2a1   : > { %2169 = vst.msk [vmem:[%s4094_s20 + $0x20] sm:$0xff] %vm1596_vm2, %v2027_v18  ;;  %2185 = vst.msk [vmem:[%s4094_s20 + $0xa0] sm:$0xff] %vm1596_vm2, %v2107_v48 }
 0x2c5   : > { %v2631_v55 = vpop.f32.mrb[6].mxu0  ;;  %v2655_v27 = vpop.f32.mrb[6].mxu1 }
 0x2c6   : > { %v2042_v12 = vadd.f32 %v2631_v55, %v4089_v13  ;;  %v2122_v51 = vadd.f32 %v2655_v27, %v4089_v13  ;;  %v2036_v0 = vpop.f32.mrb[7].mxu0  ;;  %v2116_v26 = vpop.f32.mrb[7].mxu1 }
 0x2c7   : > { %v2037_v49 = vadd.f32 %v4089_v13, %v2036_v0  ;;  %v2117_v52 = vadd.f32 %v4089_v13, %v2116_v26 }
 0x2c8   : > { %2172 = vst.msk [vmem:[%s4094_s20 + $0x38] sm:$0xff] %vm1596_vm2, %v2042_v12  ;;  %2188 = vst.msk [vmem:[%s4094_s20 + $0xb8] sm:$0xff] %vm1596_vm2, %v2122_v51 }
 0x2c9   : > { %2171 = vst.msk [vmem:[%s4094_s20 + $0x30] sm:$0xff] %vm1596_vm2, %v2037_v49  ;;  %2187 = vst.msk [vmem:[%s4094_s20 + $0xb0] sm:$0xff] %vm1596_vm2, %v2117_v52 }
 0x2ec   : > { %v2634_v35 = vpop.f32.mrb[8].mxu0  ;;  %v2658_v36 = vpop.f32.mrb[8].mxu1 }
 0x2ed   : > { %v2052_v40 = vadd.f32 %v2634_v35, %v4089_v13  ;;  %v2132_v5 = vadd.f32 %v2658_v36, %v4089_v13  ;;  %v2046_v39 = vpop.f32.mrb[9].mxu0  ;;  %v2126_v58 = vpop.f32.mrb[9].mxu1 }
 0x2ee   : > { %v2047_v10 = vadd.f32 %v4089_v13, %v2046_v39  ;;  %v2127_v53 = vadd.f32 %v4089_v13, %v2126_v58 }
 0x2ef   : > { %2174 = vst.msk [vmem:[%s4094_s20 + $0x48] sm:$0xff] %vm1596_vm2, %v2052_v40  ;;  %2190 = vst.msk [vmem:[%s4094_s20 + $0xc8] sm:$0xff] %vm1596_vm2, %v2132_v5 }
 0x2f0   : > { %2173 = vst.msk [vmem:[%s4094_s20 + $0x40] sm:$0xff] %vm1596_vm2, %v2047_v10  ;;  %2189 = vst.msk [vmem:[%s4094_s20 + $0xc0] sm:$0xff] %vm1596_vm2, %v2127_v53 }
 0x314   : > { %v2637_v54 = vpop.f32.mrb[10].mxu0  ;;  %v2661_v6 = vpop.f32.mrb[10].mxu1 }
 0x315   : > { %v2062_v20 = vadd.f32 %v2637_v54, %v4089_v13  ;;  %v2142_v32 = vadd.f32 %v2661_v6, %v4089_v13  ;;  %v2056_v44 = vpop.f32.mrb[11].mxu0  ;;  %v2136_v11 = vpop.f32.mrb[11].mxu1 }
 0x316   : > { %v2057_v45 = vadd.f32 %v4089_v13, %v2056_v44  ;;  %v2137_v60 = vadd.f32 %v4089_v13, %v2136_v11 }
 0x317   : > { %2176 = vst.msk [vmem:[%s4094_s20 + $0x58] sm:$0xff] %vm1596_vm2, %v2062_v20  ;;  %2192 = vst.msk [vmem:[%s4094_s20 + $0xd8] sm:$0xff] %vm1596_vm2, %v2142_v32 }
 0x318   : > { %2175 = vst.msk [vmem:[%s4094_s20 + $0x50] sm:$0xff] %vm1596_vm2, %v2057_v45  ;;  %2191 = vst.msk [vmem:[%s4094_s20 + $0xd0] sm:$0xff] %vm1596_vm2, %v2137_v60 }
 0x33c   : > { %v2640_v7 = vpop.f32.mrb[12].mxu0  ;;  %v2664_v33 = vpop.f32.mrb[12].mxu1 }
 0x33d   : > { %v2072_v23 = vadd.f32 %v2640_v7, %v4089_v13  ;;  %v2152_v62 = vadd.f32 %v2664_v33, %v4089_v13  ;;  %v2066_v8 = vpop.f32.mrb[13].mxu0  ;;  %v2146_v4 = vpop.f32.mrb[13].mxu1 }
 0x33e   : > { %v2067_v47 = vadd.f32 %v4089_v13, %v2066_v8  ;;  %v2147_v9 = vadd.f32 %v4089_v13, %v2146_v4 }
 0x33f   : > { %2178 = vst.msk [vmem:[%s4094_s20 + $0x68] sm:$0xff] %vm1596_vm2, %v2072_v23  ;;  %2194 = vst.msk [vmem:[%s4094_s20 + $0xe8] sm:$0xff] %vm1596_vm2, %v2152_v62 }
 0x340   : > { %2177 = vst.msk [vmem:[%s4094_s20 + $0x60] sm:$0xff] %vm1596_vm2, %v2067_v47  ;;  %2193 = vst.msk [vmem:[%s4094_s20 + $0xe0] sm:$0xff] %vm1596_vm2, %v2147_v9 }
 0x358   : > { %v2643_v29 = vpop.f32.mrb[14].mxu0  ;;  %v2667_v38 = vpop.f32.mrb[14].mxu1 }
 0x359   : > { %v2082_v43 = vadd.f32 %v2643_v29, %v4089_v13  ;;  %v2162_v61 = vadd.f32 %v2667_v38, %v4089_v13  ;;  %v2076_v37 = vpop.f32.mrb[15].mxu0  ;;  %v2156_v34 = vpop.f32.mrb[15].mxu1 }
 0x35a   : > { %v2077_v41 = vadd.f32 %v4089_v13, %v2076_v37  ;;  %v2157_v21 = vadd.f32 %v4089_v13, %v2156_v34 }
 0x35b   : > { %2180 = vst.msk [vmem:[%s4094_s20 + $0x78] sm:$0xff] %vm1596_vm2, %v2082_v43  ;;  %2196 = vst.msk [vmem:[%s4094_s20 + $0xf8] sm:$0xff] %vm1596_vm2, %v2162_v61 }
 0x35c   : > { %2179 = vst.msk [vmem:[%s4094_s20 + $0x70] sm:$0xff] %vm1596_vm2, %v2077_v41  ;;  %2195 = vst.msk [vmem:[%s4094_s20 + $0xf0] sm:$0xff] %vm1596_vm2, %v2157_v21 }
 0x35d PF: > { %s13_s14 = sadd.s32 1, %s2737_s14   ;;  %s4417_s12 = smov %s2733_s13 }
 0x35e   : > { %p10_p5 = scmp.ge.s32.totalorder %s13_s14, 4   ;;  %s4418_s13 = smov %s4420_s15 }
 0x360   :  { %12 = sbr.rel (!%p10_p5) target bundleno = 2 (0x2), region = 71 }

// kernel: conv_layer_forward.1
= control target key start
LH: loop header
LB: loop body
LE: loop exit
PB: predicated region body
PF: predicated region fallthrough
CT: control target
= control target key end

     0   :  { %s5476_s12 = smov 0   ;;  %s5478_s13 = smov 0   ;;  %s6546_s0 = inlined_call_operand.vmem [shape: f32[2,18,18,4], index: 0, kind: input, shape index: {}]   ;;  %s6547_s1 = inlined_call_operand.vmem [shape: f32[36,8], index: 1, kind: input, shape index: {}]   ;;  %s6548_s2 = inlined_call_operand.vmem [shape: f32[1,8], index: 2, kind: input, shape index: {}]   ;;  %s6549_s3 = inlined_call_operand.vmem [shape: f32[2,16,16,8], index: 3, kind: output, shape index: {}]  }
   0x1   :  { %s5480_s14 = smov 0  }
   0x2 LB: > { %s32_s15 = sadd.s32 1, %s5450_s13  ;;  %p3905_p0 = scmp.ge.s32.totalorder %s5454_s14, 1  ;;  %s5454_s14 = sphi %s5480_s14, %s13_s14   ;;  %s5450_s13 = sphi %s5478_s13, %s6660_s13   ;;  %s5446_s12 = sphi %s5476_s12, %s6659_s12  }
   0x3   : > { %p34_p1 = scmp.ge.s32.totalorder %s32_s15, 2  ;;  %p177_p2 = scmp.lt.s32.totalorder %s5454_s14, 3 }
   0x5   : > { %s6662_s15 = smov (%p34_p1, %s32_s15), 0  ;;  %p178_p3 = pnand %p3905_p0, %p177_p2 }
   0x7   : > { %181 = sbr.rel (%p178_p3) target bundleno = 524 (0x20c), region = 32 }
   0xe   : > { %v310_v0 = vld [vmem:[%s6547_s1 + $0x4] sm:$0xf]  ;;  %vm408_vm0 = vcmask 1043456   ;;  %v5500_v1 = vld [vmem:[%s6547_s1 + $0x10] sm:$0xf]  ;;  %p216_p4 = scmp.lt.s32.totalorder %s5446_s12, 1 }
   0xf   : > { %4699 = vmatprep.subr.msk.mxu1 %vm408_vm0, %v310_v0  ;;  %4899 = vmatprep.subr.msk.mxu0 %vm408_vm0, %v5500_v1  ;;  %v277_v2 = vld [vmem:[%s6547_s1] sm:$0xf]  ;;  %v2163_v3 = vld [vmem:[%s6547_s1 + $0x14] sm:$0xf]  ;;  %vm311_vm1 = vcmask 31744   ;;  %vm3729_vm2 = vcmask 64512  }
  0x10   : > { %4700 = vmatpush3.msk.msra.mxu1 %vm408_vm0, %v310_v0  ;;  %4900 = vmatpush3.msk.msra.mxu0 %vm408_vm0, %v5500_v1  ;;  %s6664_s12 = smov (!%p216_p4, %s5446_s12), 1  ;;  %v2555_v9 = vld [vmem:[%s6547_s1 + $0x18] sm:$0xf]  ;;  %v5541_v10 = vld [vmem:[%s6547_s1 + $0x8] sm:$0xf] }
  0x11   : > { %4749 = vmatprep.subr.msk.mxu1 %vm408_vm0, %v277_v2  ;;  %4949 = vmatprep.subr.msk.mxu0 %vm408_vm0, %v2163_v3  ;;  %s5407_s24 = smul.u32 432, %s6664_s12  ;;  %v5660_v28 = vld [vmem:[%s6547_s1 + $0x1c] sm:$0xf]  ;;  %v5823_v61 = vld [vmem:[%s6547_s1 + $0xc] sm:$0xf]  ;;  %s4401_s11 = sshll.u32 %s6664_s12, 8 }
  0x12   : > { %s6438_s20 = scalar_lea.vmem %s6549_s3, %s4401_s11 }
  0x13   : > { %s5522_s27 = scalar_lea.vmem %s6546_s0, %s5407_s24 }
  0x14   : > { %v278_v4 = vld [vmem:[%s5522_s27 + $0x1] sm:$0xff]  ;;  %v4073_v5 = vld [vmem:[%s5522_s27 + $0x19] sm:$0xff]  ;;  %v279_v6 = vld [vmem:[%s5522_s27 + $0x9] sm:$0xff] }
  0x15   : > { %4701 = vmatprep.mubr.msk.f32.mxu1 %vm311_vm1, %v278_v4  ;;  %4901 = vmatprep.mubr.msk.f32.mxu0 %vm311_vm1, %v4073_v5  ;;  %v4074_v7 = vld [vmem:[%s5522_s27 + $0x21] sm:$0xff]  ;;  %v5531_v8 = vld [vmem:[%s5522_s27 + $0x31] sm:$0xff]  ;;  %v5546_v11 = vld [vmem:[%s5522_s27 + $0x39] sm:$0xff] }
  0x16   : > { %4702 = vmatmul.mubr.msk.f32.vlgmr.msra.gmra.mrb[0].mxu1 %vm311_vm1, %v279_v6  ;;  %4902 = vmatmul.mubr.msk.f32.vlgmr.msra.gmra.mrb[0].mxu0 %vm311_vm1, %v4074_v7  ;;  %v5552_v12 = vld [vmem:[%s5522_s27 + $0x49] sm:$0xff]  ;;  %v5565_v13 = vld [vmem:[%s5522_s27 + $0x51] sm:$0xff]  ;;  %v5568_v14 = vld [vmem:[%s5522_s27 + $0x61] sm:$0xff] }
  0x17   : > { %4750 = vmatpush3.msk.msra.mxu1 %vm408_vm0, %v277_v2  ;;  %4950 = vmatpush3.msk.msra.mxu0 %vm408_vm0, %v2163_v3  ;;  %v5579_v15 = vld [vmem:[%s5522_s27 + $0x69] sm:$0xff]  ;;  %v5582_v16 = vld [vmem:[%s5522_s27 + $0x79] sm:$0xff]  ;;  %v5593_v17 = vld [vmem:[%s5522_s27 + $0x81] sm:$0xff] }
  0x18   : > { %4704 = vmatprep.mubr.msk.f32.mxu1 %vm311_vm1, %v4073_v5  ;;  %4904 = vmatprep.mubr.msk.f32.mxu0 %vm311_vm1, %v5531_v8  ;;  %v5596_v18 = vld [vmem:[%s5522_s27 + $0x91] sm:$0xff]  ;;  %v5607_v19 = vld [vmem:[%s5522_s27 + $0x99] sm:$0xff]  ;;  %v5610_v20 = vld [vmem:[%s5522_s27 + $0xa9] sm:$0xff] }
  0x19   : > { %4999 = vmatprep.subr.msk.mxu0 %vm408_vm0, %v2555_v9  ;;  %4799 = vmatprep.subr.msk.mxu1 %vm408_vm0, %v5541_v10  ;;  %v5621_v21 = vld [vmem:[%s5522_s27 + $0xb1] sm:$0xff]  ;;  %v5624_v22 = vld [vmem:[%s5522_s27 + $0xc1] sm:$0xff]  ;;  %v5635_v23 = vld [vmem:[%s5522_s27 + $0xc9] sm:$0xff] }
  0x1a   : > { %4705 = vmatmul.mubr.msk.f32.gmra.mrb[2].mxu1 %vm311_vm1, %v4074_v7  ;;  %4905 = vmatmul.mubr.msk.f32.gmra.mrb[2].mxu0 %vm311_vm1, %v5546_v11  ;;  %v5638_v24 = vld [vmem:[%s5522_s27 + $0x1a] sm:$0xff]  ;;  %v5649_v25 = vld [vmem:[%s5522_s27 + $0x22] sm:$0xff]  ;;  %v5655_v27 = vld [vmem:[%s5522_s27 + $0x32] sm:$0xff] }
  0x1b   : > { %4707 = vmatprep.mubr.msk.f32.mxu1 %vm311_vm1, %v5531_v8  ;;  %4907 = vmatprep.mubr.msk.f32.mxu0 %vm311_vm1, %v5552_v12  ;;  %v5652_v26 = vld [vmem:[%s5522_s27 + $0xd9] sm:$0xff]  ;;  %v5670_v29 = vld [vmem:[%s5522_s27 + $0xe1] sm:$0xff]  ;;  %v5678_v31 = vld [vmem:[%s5522_s27 + $0xf1] sm:$0xff] }
  0x1c   : > { %6595 = vst [vmem:[#allocation2_spill] sm:$0xff] %v5670_v29  ;;  %v5673_v30 = vld [vmem:[%s5522_s27 + $0x3a] sm:$0xff]  ;;  %6596 = vst [vmem:[#allocation3_spill] sm:$0xff] %v5678_v31  ;;  %v5681_v32 = vld [vmem:[%s5522_s27 + $0x4a] sm:$0xff] }
  0x1d   : > { %v5694_v33 = vld [vmem:[%s5522_s27 + $0xf9] sm:$0xff]  ;;  %v5700_v35 = vld [vmem:[%s5522_s27 + $0x109] sm:$0xff]  ;;  %v5714_v37 = vld [vmem:[%s5522_s27 + $0x111] sm:$0xff] }
  0x1e   : > { %4708 = vmatmul.mubr.msk.f32.gmra.mrb[4].mxu1 %vm311_vm1, %v5546_v11  ;;  %4908 = vmatmul.mubr.msk.f32.gmra.mrb[4].mxu0 %vm311_vm1, %v5565_v13  ;;  %6597 = vst [vmem:[#allocation4_spill] sm:$0xff] %v5694_v33  ;;  %v5697_v34 = vld [vmem:[%s5522_s27 + $0x52] sm:$0xff]  ;;  %6598 = vst [vmem:[#allocation5_spill] sm:$0xff] %v5700_v35  ;;  %v5703_v36 = vld [vmem:[%s5522_s27 + $0x62] sm:$0xff] }
  0x1f   : > { %4710 = vmatprep.mubr.msk.f32.mxu1 %vm311_vm1, %v5552_v12  ;;  %4910 = vmatprep.mubr.msk.f32.mxu0 %vm311_vm1, %v5568_v14  ;;  %6599 = vst [vmem:[#allocation6_spill] sm:$0xff] %v5714_v37  ;;  %v5717_v38 = vld [vmem:[%s5522_s27 + $0x6a] sm:$0xff]  ;;  %v5720_v39 = vld [vmem:[%s5522_s27 + $0x121] sm:$0xff]  ;;  %v5740_v43 = vld [vmem:[%s5522_s27 + $0x139] sm:$0xff] }
  0x20   : > { %6600 = vst [vmem:[#allocation7_spill] sm:$0xff] %v5720_v39  ;;  %v5723_v40 = vld [vmem:[%s5522_s27 + $0x7a] sm:$0xff]  ;;  %v5734_v41 = vld [vmem:[%s5522_s27 + $0x129] sm:$0xff]  ;;  %6602 = vst [vmem:[#allocation9_spill] sm:$0xff] %v5740_v43 }
  0x21   : > { %6601 = vst [vmem:[#allocation8_spill] sm:$0xff] %v5734_v41  ;;  %v5737_v42 = vld [vmem:[%s5522_s27 + $0x82] sm:$0xff]  ;;  %v5743_v44 = vld [vmem:[%s5522_s27 + $0x92] sm:$0xff]  ;;  %v5757_v46 = vld [vmem:[%s5522_s27 + $0x9a] sm:$0xff] }
  0x22   : > { %4711 = vmatmul.mubr.msk.f32.gmra.mrb[6].mxu1 %vm311_vm1, %v5565_v13  ;;  %4911 = vmatmul.mubr.msk.f32.gmra.mrb[6].mxu0 %vm311_vm1, %v5579_v15  ;;  %v5754_v45 = vld [vmem:[%s5522_s27 + $0x141] sm:$0xff]  ;;  %v5760_v47 = vld [vmem:[%s5522_s27 + $0x151] sm:$0xff]  ;;  %v5774_v49 = vld [vmem:[%s5522_s27 + $0x159] sm:$0xff] }
  0x23   : > { %4713 = vmatprep.mubr.msk.f32.mxu1 %vm311_vm1, %v5568_v14  ;;  %4913 = vmatprep.mubr.msk.f32.mxu0 %vm311_vm1, %v5582_v16  ;;  %6603 = vst [vmem:[#allocation10_spill] sm:$0xff] %v5754_v45  ;;  %6604 = vst [vmem:[#allocation11_spill] sm:$0xff] %v5760_v47  ;;  %v5763_v48 = vld [vmem:[%s5522_s27 + $0xaa] sm:$0xff]  ;;  %v5777_v50 = vld [vmem:[%s5522_s27 + $0xb2] sm:$0xff] }
  0x24   : > { %6605 = vst [vmem:[#allocation12_spill] sm:$0xff] %v5774_v49  ;;  %v5780_v51 = vld [vmem:[%s5522_s27 + $0x169] sm:$0xff]  ;;  %v5794_v53 = vld [vmem:[%s5522_s27 + $0x171] sm:$0xff]  ;;  %v245_v55 = vld [vmem:[%s5522_s27] sm:$0xff] }
  0x25   : > { %6606 = vst [vmem:[#allocation13_spill] sm:$0xff] %v5780_v51  ;;  %v5783_v52 = vld [vmem:[%s5522_s27 + $0xc2] sm:$0xff]  ;;  %6607 = vst [vmem:[#allocation14_spill] sm:$0xff] %v5794_v53  ;;  %v5797_v54 = vld [vmem:[%s5522_s27 + $0xca] sm:$0xff] }
  0x26   : > { %4714 = vmatmul.mubr.msk.f32.gmra.mrb[8].mxu1 %vm311_vm1, %v5579_v15  ;;  %4914 = vmatmul.mubr.msk.f32.gmra.mrb[8].mxu0 %vm311_vm1, %v5593_v17  ;;  %v5801_v56 = vld [vmem:[%s5522_s27 + $0xda] sm:$0xff]  ;;  %v246_v57 = vld [vmem:[%s5522_s27 + $0x8] sm:$0xff]  ;;  %v5818_v60 = vld [vmem:[%s5522_s27 + $0xf2] sm:$0xff] }
  0x27   : > { %4716 = vmatprep.mubr.msk.f32.mxu1 %vm311_vm1, %v5582_v16  ;;  %4916 = vmatprep.mubr.msk.f32.mxu0 %vm311_vm1, %v5596_v18  ;;  %v5812_v58 = vld [vmem:[%s5522_s27 + $0xe2] sm:$0xff]  ;;  %v5815_v59 = vld [vmem:[%s5522_s27 + $0x18] sm:$0xff]  ;;  %v5841_v0 = vld [vmem:[%s5522_s27 + $0x30] sm:$0xff] }
  0x28   : > { %6608 = vst [vmem:[#allocation15_spill] sm:$0xff] %v5815_v59  ;;  %v5833_v62 = vld [vmem:[%s5522_s27 + $0x20] sm:$0xff]  ;;  %6610 = vst [vmem:[#allocation17_spill] sm:$0xff] %v5841_v0  ;;  %v5844_v2 = vld [vmem:[%s5522_s27 + $0x10a] sm:$0xff] }
  0x29   : > { %6609 = vst [vmem:[#allocation16_spill] sm:$0xff] %v5833_v62  ;;  %v5836_v63 = vld [vmem:[%s5522_s27 + $0xfa] sm:$0xff]  ;;  %v5860_v4 = vld [vmem:[%s5522_s27 + $0x112] sm:$0xff]  ;;  %v5863_v5 = vld [vmem:[%s5522_s27 + $0x48] sm:$0xff] }
  0x2a   : > { %4717 = vmatmul.mubr.msk.f32.gmra.mrb[10].mxu1 %vm311_vm1, %v5593_v17  ;;  %4917 = vmatmul.mubr.msk.f32.gmra.mrb[10].mxu0 %vm311_vm1, %v5607_v19  ;;  %v5857_v3 = vld [vmem:[%s5522_s27 + $0x38] sm:$0xff]  ;;  %6612 = vst [vmem:[#allocation19_spill] sm:$0xff] %v5863_v5  ;;  %v5866_v6 = vld [vmem:[%s5522_s27 + $0x122] sm:$0xff]  ;;  %v5877_v7 = vld [vmem:[%s5522_s27 + $0x50] sm:$0xff] }
  0x2b   : > { %4719 = vmatprep.mubr.msk.f32.mxu1 %vm311_vm1, %v5596_v18  ;;  %4919 = vmatprep.mubr.msk.f32.mxu0 %vm311_vm1, %v5610_v20  ;;  %6611 = vst [vmem:[#allocation18_spill] sm:$0xff] %v5857_v3  ;;  %6613 = vst [vmem:[#allocation20_spill] sm:$0xff] %v5877_v7 }
  0x2e   : > { %4720 = vmatmul.mubr.msk.f32.gmra.mrb[12].mxu1 %vm311_vm1, %v5607_v19  ;;  %4920 = vmatmul.mubr.msk.f32.gmra.mrb[12].mxu0 %vm311_vm1, %v5621_v21 }
  0x2f   : > { %4722 = vmatprep.mubr.msk.f32.mxu1 %vm311_vm1, %v5610_v20  ;;  %4922 = vmatprep.mubr.msk.f32.mxu0 %vm311_vm1, %v5624_v22 }
  0x32   : > { %4723 = vmatmul.mubr.msk.f32.gmra.mrb[14].mxu1 %vm311_vm1, %v5621_v21  ;;  %4923 = vmatmul.mubr.msk.f32.gmra.mrb[14].mxu0 %vm311_vm1, %v5635_v23 }
  0x33   : > { %4725 = vmatprep.mubr.msk.f32.mxu1 %vm311_vm1, %v5624_v22  ;;  %4951 = vmatprep.mubr.msk.f32.mxu0 %vm311_vm1, %v5638_v24 }
  0x36   : > { %4726 = vmatmul.mubr.msk.f32.gmra.mrb[16].mxu1 %vm311_vm1, %v5635_v23  ;;  %4952 = vmatmul.mubr.msk.f32.vlgmr.msra.gmra.mrb[0].mxu0 %vm311_vm1, %v5649_v25 }
  0x37   : > { %5000 = vmatpush3.msk.msra.mxu0 %vm408_vm0, %v2555_v9  ;;  %4728 = vmatprep.mubr.msk.f32.mxu1 %vm311_vm1, %v5652_v26  ;;  %v5880_v9 = vld [vmem:[%s5522_s27 + $0x12a] sm:$0xff] }
  0x38   : > { %4954 = vmatprep.mubr.msk.f32.mxu0 %vm311_vm1, %v5655_v27  ;;  %5049 = vmatprep.subr.msk.mxu0 %vm408_vm0, %v5660_v28 }
  0x3a   : > { %4729 = vmatmul.mubr.msk.f32.gmra.mrb[18].mxu1 %vm311_vm1, %v5670_v29  ;;  %4955 = vmatmul.mubr.msk.f32.gmra.mrb[2].mxu0 %vm311_vm1, %v5673_v30  ;;  %v5977_v29 = vld [vmem:[%s5522_s27 + $0xd8] sm:$0xff] }
  0x3b   : > { %4731 = vmatprep.mubr.msk.f32.mxu1 %vm311_vm1, %v5678_v31  ;;  %4957 = vmatprep.mubr.msk.f32.mxu0 %vm311_vm1, %v5681_v32  ;;  %v5960_v31 = vld [vmem:[%s5522_s27 + $0x18a] sm:$0xff] }
  0x3c   : > { %6624 = vst [vmem:[#allocation31_spill] sm:$0xff] %v5960_v31 }
  0x3e   : > { %4732 = vmatmul.mubr.msk.f32.gmra.mrb[20].mxu1 %vm311_vm1, %v5694_v33  ;;  %4958 = vmatmul.mubr.msk.f32.gmra.mrb[4].mxu0 %vm311_vm1, %v5697_v34  ;;  %v5946_v33 = vld [vmem:[%s5522_s27 + $0x182] sm:$0xff] }
  0x3f   : > { %4734 = vmatprep.mubr.msk.f32.mxu1 %vm311_vm1, %v5700_v35  ;;  %4960 = vmatprep.mubr.msk.f32.mxu0 %vm311_vm1, %v5703_v36  ;;  %v5943_v35 = vld [vmem:[%s5522_s27 + $0xa8] sm:$0xff]  ;;  %6622 = vst [vmem:[#allocation29_spill] sm:$0xff] %v5946_v33 }
  0x40   : > { %6621 = vst [vmem:[#allocation28_spill] sm:$0xff] %v5943_v35 }
  0x42   : > { %4735 = vmatmul.mubr.msk.f32.gmra.mrb[22].mxu1 %vm311_vm1, %v5714_v37  ;;  %4961 = vmatmul.mubr.msk.f32.gmra.mrb[6].mxu0 %vm311_vm1, %v5717_v38  ;;  %v5940_v37 = vld [vmem:[%s5522_s27 + $0x172] sm:$0xff] }
  0x43   : > { %4737 = vmatprep.mubr.msk.f32.mxu1 %vm311_vm1, %v5720_v39  ;;  %4963 = vmatprep.mubr.msk.f32.mxu0 %vm311_vm1, %v5723_v40  ;;  %v5937_v39 = vld [vmem:[%s5522_s27 + $0x98] sm:$0xff]  ;;  %6620 = vst [vmem:[#allocation27_spill] sm:$0xff] %v5940_v37 }
  0x44   : > { %6619 = vst [vmem:[#allocation26_spill] sm:$0xff] %v5937_v39 }
  0x46   : > { %4738 = vmatmul.mubr.msk.f32.gmra.mrb[24].mxu1 %vm311_vm1, %v5734_v41  ;;  %4964 = vmatmul.mubr.msk.f32.gmra.mrb[8].mxu0 %vm311_vm1, %v5737_v42  ;;  %v5926_v41 = vld [vmem:[%s5522_s27 + $0x16a] sm:$0xff] }
  0x47   : > { %4740 = vmatprep.mubr.msk.f32.mxu1 %vm311_vm1, %v5740_v43  ;;  %4966 = vmatprep.mubr.msk.f32.mxu0 %vm311_vm1, %v5743_v44  ;;  %v5923_v43 = vld [vmem:[%s5522_s27 + $0x90] sm:$0xff] }
  0x48   : > { %6618 = vst [vmem:[#allocation25_spill] sm:$0xff] %v5923_v43 }
  0x4a   : > { %4741 = vmatmul.mubr.msk.f32.gmra.mrb[26].mxu1 %vm311_vm1, %v5754_v45  ;;  %4967 = vmatmul.mubr.msk.f32.gmra.mrb[10].mxu0 %vm311_vm1, %v5757_v46  ;;  %v5920_v45 = vld [vmem:[%s5522_s27 + $0x15a] sm:$0xff] }
  0x4b   : > { %4743 = vmatprep.mubr.msk.f32.mxu1 %vm311_vm1, %v5760_v47  ;;  %4969 = vmatprep.mubr.msk.f32.mxu0 %vm311_vm1, %v5763_v48  ;;  %v5917_v47 = vld [vmem:[%s5522_s27 + $0x80] sm:$0xff] }
  0x4c   : > { %6617 = vst [vmem:[#allocation24_spill] sm:$0xff] %v5917_v47 }
  0x4e   : > { %4744 = vmatmul.mubr.msk.f32.gmra.mrb[28].mxu1 %vm311_vm1, %v5774_v49  ;;  %4970 = vmatmul.mubr.msk.f32.gmra.mrb[12].mxu0 %vm311_vm1, %v5777_v50  ;;  %v5906_v49 = vld [vmem:[%s5522_s27 + $0x152] sm:$0xff] }
  0x4f   : > { %4746 = vmatprep.mubr.msk.f32.mxu1 %vm311_vm1, %v5780_v51  ;;  %4972 = vmatprep.mubr.msk.f32.mxu0 %vm311_vm1, %v5783_v52  ;;  %v5903_v51 = vld [vmem:[%s5522_s27 + $0x78] sm:$0xff] }
  0x50   : > { %6616 = vst [vmem:[#allocation23_spill] sm:$0xff] %v5903_v51 }
  0x52   : > { %4747 = vmatmul.mubr.msk.f32.gmra.mrb[30].mxu1 %vm311_vm1, %v5794_v53  ;;  %4973 = vmatmul.mubr.msk.f32.gmra.mrb[14].mxu0 %vm311_vm1, %v5797_v54  ;;  %v5900_v53 = vld [vmem:[%s5522_s27 + $0x142] sm:$0xff] }
  0x53   : > { %4751 = vmatprep.mubr.msk.f32.mxu1 %vm311_vm1, %v245_v55  ;;  %4975 = vmatprep.mubr.msk.f32.mxu0 %vm311_vm1, %v5801_v56  ;;  %v5886_v55 = vld [vmem:[%s5522_s27 + $0x13a] sm:$0xff] }
  0x56   : > { %4752 = vmatmul.mubr.msk.f32.vlgmr.msra.gmra.mrb[0].mxu1 %vm311_vm1, %v246_v57  ;;  %4976 = vmatmul.mubr.msk.f32.gmra.mrb[16].mxu0 %vm311_vm1, %v5812_v58  ;;  %v5897_v57 = vld [vmem:[%s5522_s27 + $0x68] sm:$0xff] }
  0x57   : > { %4800 = vmatpush3.msk.msra.mxu1 %vm408_vm0, %v5541_v10  ;;  %4754 = vmatprep.mubr.msk.f32.mxu1 %vm311_vm1, %v5815_v59  ;;  %v5883_v10 = vld [vmem:[%s5522_s27 + $0x60] sm:$0xff]  ;;  %6615 = vst [vmem:[#allocation22_spill] sm:$0xff] %v5897_v57 }
  0x58   : > { %4978 = vmatprep.mubr.msk.f32.mxu0 %vm311_vm1, %v5818_v60  ;;  %4849 = vmatprep.subr.msk.mxu1 %vm408_vm0, %v5823_v61  ;;  %6614 = vst [vmem:[#allocation21_spill] sm:$0xff] %v5883_v10  ;;  %v5963_v59 = vld [vmem:[%s5522_s27 + $0xc0] sm:$0xff] }
  0x5a   : > { %4755 = vmatmul.mubr.msk.f32.gmra.mrb[2].mxu1 %vm311_vm1, %v5833_v62  ;;  %4979 = vmatmul.mubr.msk.f32.gmra.mrb[18].mxu0 %vm311_vm1, %v5836_v63  ;;  %v5957_v62 = vld [vmem:[%s5522_s27 + $0xb0] sm:$0xff] }
  0x5b   : > { %4757 = vmatprep.mubr.msk.f32.mxu1 %vm311_vm1, %v5841_v0  ;;  %4981 = vmatprep.mubr.msk.f32.mxu0 %vm311_vm1, %v5844_v2  ;;  %6623 = vst [vmem:[#allocation30_spill] sm:$0xff] %v5957_v62 }
  0x5e   : > { %4758 = vmatmul.mubr.msk.f32.gmra.mrb[4].mxu1 %vm311_vm1, %v5857_v3  ;;  %4982 = vmatmul.mubr.msk.f32.gmra.mrb[20].mxu0 %vm311_vm1, %v5860_v4 }
  0x5f   : > { %4760 = vmatprep.mubr.msk.f32.mxu1 %vm311_vm1, %v5863_v5  ;;  %4984 = vmatprep.mubr.msk.f32.mxu0 %vm311_vm1, %v5866_v6 }
  0x62   : > { %4761 = vmatmul.mubr.msk.f32.gmra.mrb[6].mxu1 %vm311_vm1, %v5877_v7  ;;  %4985 = vmatmul.mubr.msk.f32.gmra.mrb[22].mxu0 %vm311_vm1, %v5880_v9 }
  0x63   : > { %4763 = vmatprep.mubr.msk.f32.mxu1 %vm311_vm1, %v5883_v10  ;;  %4987 = vmatprep.mubr.msk.f32.mxu0 %vm311_vm1, %v5886_v55 }
  0x66   : > { %4764 = vmatmul.mubr.msk.f32.gmra.mrb[8].mxu1 %vm311_vm1, %v5897_v57  ;;  %4988 = vmatmul.mubr.msk.f32.gmra.mrb[24].mxu0 %vm311_vm1, %v5900_v53 }
  0x67   : > { %4766 = vmatprep.mubr.msk.f32.mxu1 %vm311_vm1, %v5903_v51  ;;  %4990 = vmatprep.mubr.msk.f32.mxu0 %vm311_vm1, %v5906_v49 }
  0x6a   : > { %4767 = vmatmul.mubr.msk.f32.gmra.mrb[10].mxu1 %vm311_vm1, %v5917_v47  ;;  %4991 = vmatmul.mubr.msk.f32.gmra.mrb[26].mxu0 %vm311_vm1, %v5920_v45 }
  0x6b   : > { %4769 = vmatprep.mubr.msk.f32.mxu1 %vm311_vm1, %v5923_v43  ;;  %4993 = vmatprep.mubr.msk.f32.mxu0 %vm311_vm1, %v5926_v41 }
  0x6e   : > { %4770 = vmatmul.mubr.msk.f32.gmra.mrb[12].mxu1 %vm311_vm1, %v5937_v39  ;;  %4994 = vmatmul.mubr.msk.f32.gmra.mrb[28].mxu0 %vm311_vm1, %v5940_v37  ;;  %v5982_v37 = vld [vmem:[%s6547_s1 + $0x20] sm:$0xf] }
  0x6f   : > { %4772 = vmatprep.mubr.msk.f32.mxu1 %vm311_vm1, %v5943_v35  ;;  %4996 = vmatprep.mubr.msk.f32.mxu0 %vm311_vm1, %v5946_v33  ;;  %v5974_v33 = vld [vmem:[%s5522_s27 + $0xc8] sm:$0xff] }
  0x70   : > { %6625 = vst [vmem:[#allocation32_spill] sm:$0xff] %v5974_v33 }
  0x72   : > { %4773 = vmatmul.mubr.msk.f32.gmra.mrb[14].mxu1 %vm311_vm1, %v5957_v62  ;;  %4997 = vmatmul.mubr.msk.f32.gmra.mrb[30].mxu0 %vm311_vm1, %v5960_v31  ;;  %v5993_v31 = vld [vmem:[%s5522_s27 + $0xe0] sm:$0xff] }
  0x73   : > { %4775 = vmatprep.mubr.msk.f32.mxu1 %vm311_vm1, %v5963_v59  ;;  %5001 = vmatprep.mubr.msk.f32.mxu0 %vm311_vm1, %v5841_v0  ;;  %v5998_v0 = vld [vmem:[%s5522_s27 + $0xf0] sm:$0xff] }
  0x76   : > { %4776 = vmatmul.mubr.msk.f32.gmra.mrb[16].mxu1 %vm311_vm1, %v5974_v33  ;;  %5002 = vmatmul.mubr.msk.f32.vlgmr.msra.gmra.mrb[0].mxu0 %vm311_vm1, %v5857_v3  ;;  %v961_v3 = vld [vmem:[%s5522_s27 + $0x2] sm:$0xff] }
  0x77   : > { %5050 = vmatpush3.msk.msra.mxu0 %vm408_vm0, %v5660_v28  ;;  %4778 = vmatprep.mubr.msk.f32.mxu1 %vm311_vm1, %v5977_v29  ;;  %v6011_v28 = vld [vmem:[%s5522_s27 + $0xf8] sm:$0xff] }
  0x78   : > { %5004 = vmatprep.mubr.msk.f32.mxu0 %vm311_vm1, %v5863_v5  ;;  %5099 = vmatprep.subr.msk.mxu0 %vm408_vm0, %v5982_v37  ;;  %v6014_v5 = vld [vmem:[%s5522_s27 + $0x108] sm:$0xff] }
  0x7a   : > { %4779 = vmatmul.mubr.msk.f32.gmra.mrb[18].mxu1 %vm311_vm1, %v5993_v31  ;;  %5005 = vmatmul.mubr.msk.f32.gmra.mrb[2].mxu0 %vm311_vm1, %v5877_v7  ;;  %v6025_v7 = vld [vmem:[%s5522_s27 + $0x110] sm:$0xff] }
  0x7b   : > { %4781 = vmatprep.mubr.msk.f32.mxu1 %vm311_vm1, %v5998_v0  ;;  %5007 = vmatprep.mubr.msk.f32.mxu0 %vm311_vm1, %v5883_v10  ;;  %v6028_v10 = vld [vmem:[%s5522_s27 + $0x120] sm:$0xff] }
  0x7e   : > { %4782 = vmatmul.mubr.msk.f32.gmra.mrb[20].mxu1 %vm311_vm1, %v6011_v28  ;;  %5008 = vmatmul.mubr.msk.f32.gmra.mrb[4].mxu0 %vm311_vm1, %v5897_v57  ;;  %v6039_v57 = vld [vmem:[%s5522_s27 + $0x128] sm:$0xff] }
  0x7f   : > { %4784 = vmatprep.mubr.msk.f32.mxu1 %vm311_vm1, %v6014_v5  ;;  %5010 = vmatprep.mubr.msk.f32.mxu0 %vm311_vm1, %v5903_v51  ;;  %v6042_v51 = vld [vmem:[%s5522_s27 + $0x138] sm:$0xff] }
  0x82   : > { %4785 = vmatmul.mubr.msk.f32.gmra.mrb[22].mxu1 %vm311_vm1, %v6025_v7  ;;  %5011 = vmatmul.mubr.msk.f32.gmra.mrb[6].mxu0 %vm311_vm1, %v5917_v47  ;;  %v6053_v47 = vld [vmem:[%s5522_s27 + $0x140] sm:$0xff] }
  0x83   : > { %4787 = vmatprep.mubr.msk.f32.mxu1 %vm311_vm1, %v6028_v10  ;;  %5013 = vmatprep.mubr.msk.f32.mxu0 %vm311_vm1, %v5923_v43  ;;  %v6056_v43 = vld [vmem:[%s5522_s27 + $0x150] sm:$0xff] }
  0x86   : > { %4788 = vmatmul.mubr.msk.f32.gmra.mrb[24].mxu1 %vm311_vm1, %v6039_v57  ;;  %5014 = vmatmul.mubr.msk.f32.gmra.mrb[8].mxu0 %vm311_vm1, %v5937_v39  ;;  %v6067_v39 = vld [vmem:[%s5522_s27 + $0x158] sm:$0xff] }
  0x87   : > { %4790 = vmatprep.mubr.msk.f32.mxu1 %vm311_vm1, %v6042_v51  ;;  %5016 = vmatprep.mubr.msk.f32.mxu0 %vm311_vm1, %v5943_v35  ;;  %v6070_v35 = vld [vmem:[%s5522_s27 + $0x168] sm:$0xff] }
  0x8a   : > { %4791 = vmatmul.mubr.msk.f32.gmra.mrb[26].mxu1 %vm311_vm1, %v6053_v47  ;;  %5017 = vmatmul.mubr.msk.f32.gmra.mrb[10].mxu0 %vm311_vm1, %v5957_v62  ;;  %v6081_v62 = vld [vmem:[%s5522_s27 + $0x170] sm:$0xff] }
  0x8b   : > { %4793 = vmatprep.mubr.msk.f32.mxu1 %vm311_vm1, %v6056_v43  ;;  %5019 = vmatprep.mubr.msk.f32.mxu0 %vm311_vm1, %v5963_v59 }
  0x8e   : > { %4794 = vmatmul.mubr.msk.f32.gmra.mrb[28].mxu1 %vm311_vm1, %v6067_v39  ;;  %5020 = vmatmul.mubr.msk.f32.gmra.mrb[12].mxu0 %vm311_vm1, %v5974_v33  ;;  %v962_v33 = vld [vmem:[%s5522_s27 + $0xa] sm:$0xff] }
  0x8f   : > { %4796 = vmatprep.mubr.msk.f32.mxu1 %vm311_vm1, %v6070_v35  ;;  %5022 = vmatprep.mubr.msk.f32.mxu0 %vm311_vm1, %v5977_v29 }
  0x92   : > { %4797 = vmatmul.mubr.msk.f32.gmra.mrb[30].mxu1 %vm311_vm1, %v6081_v62  ;;  %5023 = vmatmul.mubr.msk.f32.gmra.mrb[14].mxu0 %vm311_vm1, %v5993_v31 }
  0x93   : > { %4801 = vmatprep.mubr.msk.f32.mxu1 %vm311_vm1, %v961_v3  ;;  %5025 = vmatprep.mubr.msk.f32.mxu0 %vm311_vm1, %v5998_v0  ;;  %v6642_v3 = vld [vmem:[#allocation22_spill] sm:$0xff] }
  0x96   : > { %4802 = vmatmul.mubr.msk.f32.vlgmr.msra.gmra.mrb[0].mxu1 %vm311_vm1, %v962_v33  ;;  %5026 = vmatmul.mubr.msk.f32.gmra.mrb[16].mxu0 %vm311_vm1, %v6011_v28  ;;  %v4233_v33 = vld [vmem:[%s5522_s27 + $0x198] sm:$0xff] }
  0x97   : > { %4850 = vmatpush3.msk.msra.mxu1 %vm408_vm0, %v5823_v61  ;;  %4804 = vmatprep.mubr.msk.f32.mxu1 %vm311_vm1, %v5638_v24  ;;  %v6136_v24 = vld [vmem:[%s5522_s27 + $0x180] sm:$0xff] }
  0x98   : > { %5028 = vmatprep.mubr.msk.f32.mxu0 %vm311_vm1, %v6014_v5  ;;  %5149 = vmatprep.subr.msk.mxu1 %vm408_vm0, %v5500_v1  ;;  %v4234_v61 = vld [vmem:[%s5522_s27 + $0x1a0] sm:$0xff] }
  0x9a   : > { %4805 = vmatmul.mubr.msk.f32.gmra.mrb[2].mxu1 %vm311_vm1, %v5649_v25  ;;  %5029 = vmatmul.mubr.msk.f32.gmra.mrb[18].mxu0 %vm311_vm1, %v6025_v7  ;;  %v6147_v25 = vld [vmem:[%s5522_s27 + $0x188] sm:$0xff] }
  0x9b   : > { %4807 = vmatprep.mubr.msk.f32.mxu1 %vm311_vm1, %v5655_v27  ;;  %5031 = vmatprep.mubr.msk.f32.mxu0 %vm311_vm1, %v6028_v10 }
  0x9e   : > { %4808 = vmatmul.mubr.msk.f32.gmra.mrb[4].mxu1 %vm311_vm1, %v5673_v30  ;;  %5032 = vmatmul.mubr.msk.f32.gmra.mrb[20].mxu0 %vm311_vm1, %v6039_v57 }
  0x9f   : > { %4810 = vmatprep.mubr.msk.f32.mxu1 %vm311_vm1, %v5681_v32  ;;  %5034 = vmatprep.mubr.msk.f32.mxu0 %vm311_vm1, %v6042_v51 }
  0xa2   : > { %4811 = vmatmul.mubr.msk.f32.gmra.mrb[6].mxu1 %vm311_vm1, %v5697_v34  ;;  %5035 = vmatmul.mubr.msk.f32.gmra.mrb[22].mxu0 %vm311_vm1, %v6053_v47 }
  0xa3   : > { %4813 = vmatprep.mubr.msk.f32.mxu1 %vm311_vm1, %v5703_v36  ;;  %5037 = vmatprep.mubr.msk.f32.mxu0 %vm311_vm1, %v6056_v43 }
  0xa6   : > { %4814 = vmatmul.mubr.msk.f32.gmra.mrb[8].mxu1 %vm311_vm1, %v5717_v38  ;;  %5038 = vmatmul.mubr.msk.f32.gmra.mrb[24].mxu0 %vm311_vm1, %v6067_v39 }
  0xa7   : > { %4816 = vmatprep.mubr.msk.f32.mxu1 %vm311_vm1, %v5723_v40  ;;  %5040 = vmatprep.mubr.msk.f32.mxu0 %vm311_vm1, %v6070_v35 }
  0xaa   : > { %4817 = vmatmul.mubr.msk.f32.gmra.mrb[10].mxu1 %vm311_vm1, %v5737_v42  ;;  %5041 = vmatmul.mubr.msk.f32.gmra.mrb[26].mxu0 %vm311_vm1, %v6081_v62 }
  0xab   : > { %4819 = vmatprep.mubr.msk.f32.mxu1 %vm311_vm1, %v5743_v44  ;;  %5043 = vmatprep.mubr.msk.f32.mxu0 %vm311_vm1, %v6136_v24 }
  0xae   : > { %4820 = vmatmul.mubr.msk.f32.gmra.mrb[12].mxu1 %vm311_vm1, %v5757_v46  ;;  %5044 = vmatmul.mubr.msk.f32.gmra.mrb[28].mxu0 %vm311_vm1, %v6147_v25 }
  0xaf   : > { %4822 = vmatprep.mubr.msk.f32.mxu1 %vm311_vm1, %v5763_v48  ;;  %5046 = vmatprep.mubr.msk.f32.mxu0 %vm311_vm1, %v4233_v33  ;;  %v6643_v33 = vld [vmem:[#allocation10_spill] sm:$0xff] }
  0xb2   : > { %4823 = vmatmul.mubr.msk.f32.gmra.mrb[14].mxu1 %vm311_vm1, %v5777_v50  ;;  %5047 = vmatmul.mubr.msk.f32.gmra.mrb[30].mxu0 %vm311_vm1, %v4234_v61  ;;  %v6644_v61 = vld [vmem:[#allocation23_spill] sm:$0xff] }
  0xb3   : > { %4825 = vmatprep.mubr.msk.f32.mxu1 %vm311_vm1, %v5783_v52  ;;  %5051 = vmatprep.mubr.msk.f32.mxu0 %vm311_vm1, %v5531_v8  ;;  %v6626_v8 = vld [vmem:[#allocation27_spill] sm:$0xff] }
  0xb6   : > { %4826 = vmatmul.mubr.msk.f32.gmra.mrb[16].mxu1 %vm311_vm1, %v5797_v54  ;;  %5052 = vmatmul.mubr.msk.f32.vlgmr.msra.gmra.mrb[0].mxu0 %vm311_vm1, %v5546_v11  ;;  %v6627_v11 = vld [vmem:[#allocation2_spill] sm:$0xff] }
  0xb7   : > { %5100 = vmatpush3.msk.msra.mxu0 %vm408_vm0, %v5982_v37  ;;  %4828 = vmatprep.mubr.msk.f32.mxu1 %vm311_vm1, %v5801_v56  ;;  %v6641_v37 = vld [vmem:[#allocation9_spill] sm:$0xff] }
  0xb8   : > { %5054 = vmatprep.mubr.msk.f32.mxu0 %vm311_vm1, %v5552_v12  ;;  %v6628_v12 = vld [vmem:[#allocation15_spill] sm:$0xff] }
  0xba   : > { %4829 = vmatmul.mubr.msk.f32.gmra.mrb[18].mxu1 %vm311_vm1, %v5812_v58  ;;  %5055 = vmatmul.mubr.msk.f32.gmra.mrb[2].mxu0 %vm311_vm1, %v5565_v13  ;;  %v6629_v13 = vld [vmem:[#allocation3_spill] sm:$0xff] }
  0xbb   : > { %4831 = vmatprep.mubr.msk.f32.mxu1 %vm311_vm1, %v5818_v60  ;;  %5057 = vmatprep.mubr.msk.f32.mxu0 %vm311_vm1, %v5568_v14  ;;  %v6630_v14 = vld [vmem:[#allocation16_spill] sm:$0xff] }
  0xbe   : > { %4832 = vmatmul.mubr.msk.f32.gmra.mrb[20].mxu1 %vm311_vm1, %v5836_v63  ;;  %5058 = vmatmul.mubr.msk.f32.gmra.mrb[4].mxu0 %vm311_vm1, %v5579_v15  ;;  %v6631_v15 = vld [vmem:[#allocation4_spill] sm:$0xff] }
  0xbf   : > { %4834 = vmatprep.mubr.msk.f32.mxu1 %vm311_vm1, %v5844_v2  ;;  %5060 = vmatprep.mubr.msk.f32.mxu0 %vm311_vm1, %v5582_v16  ;;  %v6632_v16 = vld [vmem:[#allocation17_spill] sm:$0xff] }
  0xc2   : > { %4835 = vmatmul.mubr.msk.f32.gmra.mrb[22].mxu1 %vm311_vm1, %v5860_v4  ;;  %5061 = vmatmul.mubr.msk.f32.gmra.mrb[6].mxu0 %vm311_vm1, %v5593_v17  ;;  %v6633_v17 = vld [vmem:[#allocation5_spill] sm:$0xff] }
  0xc3   : > { %4837 = vmatprep.mubr.msk.f32.mxu1 %vm311_vm1, %v5866_v6  ;;  %5063 = vmatprep.mubr.msk.f32.mxu0 %vm311_vm1, %v5596_v18  ;;  %v6634_v18 = vld [vmem:[#allocation18_spill] sm:$0xff] }
  0xc6   : > { %4838 = vmatmul.mubr.msk.f32.gmra.mrb[24].mxu1 %vm311_vm1, %v5880_v9  ;;  %5064 = vmatmul.mubr.msk.f32.gmra.mrb[8].mxu0 %vm311_vm1, %v5607_v19  ;;  %v6635_v19 = vld [vmem:[#allocation6_spill] sm:$0xff] }
  0xc7   : > { %4840 = vmatprep.mubr.msk.f32.mxu1 %vm311_vm1, %v5886_v55  ;;  %5066 = vmatprep.mubr.msk.f32.mxu0 %vm311_vm1, %v5610_v20  ;;  %v6636_v20 = vld [vmem:[#allocation19_spill] sm:$0xff] }
  0xca   : > { %4841 = vmatmul.mubr.msk.f32.gmra.mrb[26].mxu1 %vm311_vm1, %v5900_v53  ;;  %5067 = vmatmul.mubr.msk.f32.gmra.mrb[10].mxu0 %vm311_vm1, %v5621_v21  ;;  %v6637_v21 = vld [vmem:[#allocation7_spill] sm:$0xff] }
  0xcb   : > { %4843 = vmatprep.mubr.msk.f32.mxu1 %vm311_vm1, %v5906_v49  ;;  %5069 = vmatprep.mubr.msk.f32.mxu0 %vm311_vm1, %v5624_v22  ;;  %v6639_v22 = vld [vmem:[#allocation8_spill] sm:$0xff] }
  0xce   : > { %4844 = vmatmul.mubr.msk.f32.gmra.mrb[28].mxu1 %vm311_vm1, %v5920_v45  ;;  %5070 = vmatmul.mubr.msk.f32.gmra.mrb[12].mxu0 %vm311_vm1, %v5635_v23  ;;  %v6640_v23 = vld [vmem:[#allocation21_spill] sm:$0xff] }
  0xcf   : > { %4846 = vmatprep.mubr.msk.f32.mxu1 %vm311_vm1, %v5926_v41  ;;  %5072 = vmatprep.mubr.msk.f32.mxu0 %vm311_vm1, %v5652_v26 }
  0xd2   : > { %4847 = vmatmul.mubr.msk.f32.gmra.mrb[30].mxu1 %vm311_vm1, %v6626_v8  ;;  %5073 = vmatmul.mubr.msk.f32.gmra.mrb[14].mxu0 %vm311_vm1, %v6627_v11  ;;  %v6653_v8 = vld [vmem:[#allocation30_spill] sm:$0xff] }
  0xd3   : > { %4851 = vmatprep.mubr.msk.f32.mxu1 %vm311_vm1, %v6628_v12  ;;  %5075 = vmatprep.mubr.msk.f32.mxu0 %vm311_vm1, %v6629_v13  ;;  %v6645_v12 = vld [vmem:[#allocation11_spill] sm:$0xff] }
  0xd6   : > { %4852 = vmatmul.mubr.msk.f32.vlgmr.msra.gmra.mrb[0].mxu1 %vm311_vm1, %v6630_v14  ;;  %5076 = vmatmul.mubr.msk.f32.gmra.mrb[16].mxu0 %vm311_vm1, %v6631_v15  ;;  %v6646_v14 = vld [vmem:[#allocation24_spill] sm:$0xff] }
  0xd7   : > { %5150 = vmatpush3.msk.msra.mxu1 %vm408_vm0, %v5500_v1  ;;  %4854 = vmatprep.mubr.msk.f32.mxu1 %vm311_vm1, %v6632_v16  ;;  %v6638_v1 = vld [vmem:[#allocation20_spill] sm:$0xff] }
  0xd8   : > { %5078 = vmatprep.mubr.msk.f32.mxu0 %vm311_vm1, %v6633_v17  ;;  %v6647_v16 = vld [vmem:[#allocation12_spill] sm:$0xff] }
  0xda   : > { %4855 = vmatmul.mubr.msk.f32.gmra.mrb[2].mxu1 %vm311_vm1, %v6634_v18  ;;  %5079 = vmatmul.mubr.msk.f32.gmra.mrb[18].mxu0 %vm311_vm1, %v6635_v19  ;;  %v6648_v18 = vld [vmem:[#allocation25_spill] sm:$0xff] }
  0xdb   : > { %4857 = vmatprep.mubr.msk.f32.mxu1 %vm311_vm1, %v6636_v20  ;;  %5081 = vmatprep.mubr.msk.f32.mxu0 %vm311_vm1, %v6637_v21  ;;  %v6649_v20 = vld [vmem:[#allocation13_spill] sm:$0xff] }
  0xde   : > { %4858 = vmatmul.mubr.msk.f32.gmra.mrb[4].mxu1 %vm311_vm1, %v6638_v1  ;;  %5082 = vmatmul.mubr.msk.f32.gmra.mrb[20].mxu0 %vm311_vm1, %v6639_v22  ;;  %v6274_v1 = vld [vmem:[%s5522_s27 + $0x181] sm:$0xff] }
  0xdf   : > { %4860 = vmatprep.mubr.msk.f32.mxu1 %vm311_vm1, %v6640_v23  ;;  %5084 = vmatprep.mubr.msk.f32.mxu0 %vm311_vm1, %v6641_v37  ;;  %v6650_v23 = vld [vmem:[#allocation26_spill] sm:$0xff] }
  0xe2   : > { %4861 = vmatmul.mubr.msk.f32.gmra.mrb[6].mxu1 %vm311_vm1, %v6642_v3  ;;  %5085 = vmatmul.mubr.msk.f32.gmra.mrb[22].mxu0 %vm311_vm1, %v6643_v33  ;;  %v6651_v3 = vld [vmem:[#allocation14_spill] sm:$0xff] }
  0xe3   : > { %4863 = vmatprep.mubr.msk.f32.mxu1 %vm311_vm1, %v6644_v61  ;;  %5087 = vmatprep.mubr.msk.f32.mxu0 %vm311_vm1, %v6645_v12  ;;  %v6652_v61 = vld [vmem:[#allocation28_spill] sm:$0xff] }
  0xe6   : > { %4864 = vmatmul.mubr.msk.f32.gmra.mrb[8].mxu1 %vm311_vm1, %v6646_v14  ;;  %5088 = vmatmul.mubr.msk.f32.gmra.mrb[24].mxu0 %vm311_vm1, %v6647_v16  ;;  %v6285_v14 = vld [vmem:[%s5522_s27 + $0x189] sm:$0xff] }
  0xe7   : > { %4866 = vmatprep.mubr.msk.f32.mxu1 %vm311_vm1, %v6648_v18  ;;  %5090 = vmatprep.mubr.msk.f32.mxu0 %vm311_vm1, %v6649_v20  ;;  %v4298_v18 = vld [vmem:[%s5522_s27 + $0x199] sm:$0xff] }
  0xea   : > { %4867 = vmatmul.mubr.msk.f32.gmra.mrb[10].mxu1 %vm311_vm1, %v6650_v23  ;;  %5091 = vmatmul.mubr.msk.f32.gmra.mrb[26].mxu0 %vm311_vm1, %v6651_v3  ;;  %v4299_v23 = vld [vmem:[%s5522_s27 + $0x1a1] sm:$0xff]  ;;  %v6654_v3 = vld [vmem:[#allocation32_spill] sm:$0xff] }
  0xeb   : > { %4869 = vmatprep.mubr.msk.f32.mxu1 %vm311_vm1, %v6652_v61  ;;  %5093 = vmatprep.mubr.msk.f32.mxu0 %vm311_vm1, %v6274_v1 }
  0xee   : > { %4870 = vmatmul.mubr.msk.f32.gmra.mrb[12].mxu1 %vm311_vm1, %v6653_v8  ;;  %5094 = vmatmul.mubr.msk.f32.gmra.mrb[28].mxu0 %vm311_vm1, %v6285_v14 }
  0xef   : > { %4872 = vmatprep.mubr.msk.f32.mxu1 %vm311_vm1, %v5963_v59  ;;  %5096 = vmatprep.mubr.msk.f32.mxu0 %vm311_vm1, %v4298_v18 }
  0xf2   : > { %4873 = vmatmul.mubr.msk.f32.gmra.mrb[14].mxu1 %vm311_vm1, %v6654_v3  ;;  %5097 = vmatmul.mubr.msk.f32.gmra.mrb[30].mxu0 %vm311_vm1, %v4299_v23 }
  0xf3   : > { %4875 = vmatprep.mubr.msk.f32.mxu1 %vm311_vm1, %v5977_v29  ;;  %5101 = vmatprep.mubr.msk.f32.mxu0 %vm311_vm1, %v5655_v27  ;;  %v6656_v27 = vld [vmem:[#allocation29_spill] sm:$0xff] }
  0xf4   : > { %v4363_v29 = vld [vmem:[%s5522_s27 + $0x19a] sm:$0xff] }
  0xf6   : > { %4876 = vmatmul.mubr.msk.f32.gmra.mrb[16].mxu1 %vm311_vm1, %v5993_v31  ;;  %5102 = vmatmul.mubr.msk.f32.vlgmr.msra.gmra.mrb[0].mxu0 %vm311_vm1, %v5673_v30  ;;  %v6657_v30 = vld [vmem:[#allocation14_spill] sm:$0xff]  ;;  %v6658_v31 = vld [vmem:[#allocation31_spill] sm:$0xff] }
  0xf7   : > { %4878 = vmatprep.mubr.msk.f32.mxu1 %vm311_vm1, %v5998_v0  ;;  %5104 = vmatprep.mubr.msk.f32.mxu0 %vm311_vm1, %v5681_v32  ;;  %v4364_v32 = vld [vmem:[%s5522_s27 + $0x1a2] sm:$0xff] }
  0xfa   : > { %4879 = vmatmul.mubr.msk.f32.gmra.mrb[18].mxu1 %vm311_vm1, %v6011_v28  ;;  %5105 = vmatmul.mubr.msk.f32.gmra.mrb[2].mxu0 %vm311_vm1, %v5697_v34 }
  0xfb   : > { %4881 = vmatprep.mubr.msk.f32.mxu1 %vm311_vm1, %v6014_v5  ;;  %5107 = vmatprep.mubr.msk.f32.mxu0 %vm311_vm1, %v5703_v36 }
  0xfe   : > { %4882 = vmatmul.mubr.msk.f32.gmra.mrb[20].mxu1 %vm311_vm1, %v6025_v7  ;;  %5108 = vmatmul.mubr.msk.f32.gmra.mrb[4].mxu0 %vm311_vm1, %v5717_v38 }
  0xff   : > { %4884 = vmatprep.mubr.msk.f32.mxu1 %vm311_vm1, %v6028_v10  ;;  %5110 = vmatprep.mubr.msk.f32.mxu0 %vm311_vm1, %v5723_v40 }
 0x102   : > { %4885 = vmatmul.mubr.msk.f32.gmra.mrb[22].mxu1 %vm311_vm1, %v6039_v57  ;;  %5111 = vmatmul.mubr.msk.f32.gmra.mrb[6].mxu0 %vm311_vm1, %v5737_v42 }
 0x103   : > { %4887 = vmatprep.mubr.msk.f32.mxu1 %vm311_vm1, %v6042_v51  ;;  %5113 = vmatprep.mubr.msk.f32.mxu0 %vm311_vm1, %v5743_v44 }
 0x106   : > { %4888 = vmatmul.mubr.msk.f32.gmra.mrb[24].mxu1 %vm311_vm1, %v6053_v47  ;;  %5114 = vmatmul.mubr.msk.f32.gmra.mrb[8].mxu0 %vm311_vm1, %v5757_v46 }
 0x107   : > { %4890 = vmatprep.mubr.msk.f32.mxu1 %vm311_vm1, %v6056_v43  ;;  %5116 = vmatprep.mubr.msk.f32.mxu0 %vm311_vm1, %v5763_v48 }
 0x10a   : > { %4891 = vmatmul.mubr.msk.f32.gmra.mrb[26].mxu1 %vm311_vm1, %v6067_v39  ;;  %5117 = vmatmul.mubr.msk.f32.gmra.mrb[10].mxu0 %vm311_vm1, %v5777_v50 }
 0x10b   : > { %4893 = vmatprep.mubr.msk.f32.mxu1 %vm311_vm1, %v6070_v35  ;;  %5119 = vmatprep.mubr.msk.f32.mxu0 %vm311_vm1, %v5783_v52  ;;  %v6433_v52 = vld [vmem:[%s6548_s2] ss:$0 sm:$0xff] }
 0x10e   : > { %4894 = vmatmul.mubr.msk.f32.gmra.mrb[28].mxu1 %vm311_vm1, %v6081_v62  ;;  %5120 = vmatmul.mubr.msk.f32.gmra.mrb[12].mxu0 %vm311_vm1, %v5797_v54 }
 0x10f   : > { %4896 = vmatprep.mubr.msk.f32.mxu1 %vm311_vm1, %v6136_v24  ;;  %5122 = vmatprep.mubr.msk.f32.mxu0 %vm311_vm1, %v5801_v56 }
 0x112   : > { %4897 = vmatmul.mubr.msk.f32.gmra.mrb[30].mxu1 %vm311_vm1, %v6147_v25  ;;  %5123 = vmatmul.mubr.msk.f32.gmra.mrb[14].mxu0 %vm311_vm1, %v5812_v58 }
 0x113   : > { %4925 = vmatprep.mubr.msk.f32.mxu1 %vm311_vm1, %v5652_v26  ;;  %5125 = vmatprep.mubr.msk.f32.mxu0 %vm311_vm1, %v5818_v60  ;;  %v6655_v26 = vld [vmem:[#allocation27_spill] sm:$0xff] }
 0x116   : > { %4926 = vmatmul.mubr.msk.f32.vlgmr.msra.gmra.mrb[16].mxu1 %vm311_vm1, %v6627_v11  ;;  %5126 = vmatmul.mubr.msk.f32.gmra.mrb[16].mxu0 %vm311_vm1, %v5836_v63 }
 0x117   : > { %4928 = vmatprep.mubr.msk.f32.mxu1 %vm311_vm1, %v6629_v13  ;;  %5128 = vmatprep.mubr.msk.f32.mxu0 %vm311_vm1, %v5844_v2 }
 0x11a   : > { %4929 = vmatmul.mubr.msk.f32.gmra.mrb[18].mxu1 %vm311_vm1, %v6631_v15  ;;  %5129 = vmatmul.mubr.msk.f32.gmra.mrb[18].mxu0 %vm311_vm1, %v5860_v4 }
 0x11b   : > { %4931 = vmatprep.mubr.msk.f32.mxu1 %vm311_vm1, %v6633_v17  ;;  %5131 = vmatprep.mubr.msk.f32.mxu0 %vm311_vm1, %v5866_v6 }
 0x11e   : > { %4932 = vmatmul.mubr.msk.f32.gmra.mrb[20].mxu1 %vm311_vm1, %v6635_v19  ;;  %5132 = vmatmul.mubr.msk.f32.gmra.mrb[20].mxu0 %vm311_vm1, %v5880_v9 }
 0x11f   : > { %4934 = vmatprep.mubr.msk.f32.mxu1 %vm311_vm1, %v6637_v21  ;;  %5134 = vmatprep.mubr.msk.f32.mxu0 %vm311_vm1, %v5886_v55 }
 0x122   : > { %4935 = vmatmul.mubr.msk.f32.gmra.mrb[22].mxu1 %vm311_vm1, %v6639_v22  ;;  %5135 = vmatmul.mubr.msk.f32.gmra.mrb[22].mxu0 %vm311_vm1, %v5900_v53 }
 0x123   : > { %4937 = vmatprep.mubr.msk.f32.mxu1 %vm311_vm1, %v6641_v37  ;;  %5137 = vmatprep.mubr.msk.f32.mxu0 %vm311_vm1, %v5906_v49 }
 0x126   : > { %4938 = vmatmul.mubr.msk.f32.gmra.mrb[24].mxu1 %vm311_vm1, %v6643_v33  ;;  %5138 = vmatmul.mubr.msk.f32.gmra.mrb[24].mxu0 %vm311_vm1, %v5920_v45 }
 0x127   : > { %4940 = vmatprep.mubr.msk.f32.mxu1 %vm311_vm1, %v6645_v12  ;;  %5140 = vmatprep.mubr.msk.f32.mxu0 %vm311_vm1, %v5926_v41 }
 0x12a   : > { %4941 = vmatmul.mubr.msk.f32.gmra.mrb[26].mxu1 %vm311_vm1, %v6647_v16  ;;  %5141 = vmatmul.mubr.msk.f32.gmra.mrb[26].mxu0 %vm311_vm1, %v6655_v26 }
 0x12b   : > { %4943 = vmatprep.mubr.msk.f32.mxu1 %vm311_vm1, %v6649_v20  ;;  %5143 = vmatprep.mubr.msk.f32.mxu0 %vm311_vm1, %v6656_v27 }
 0x12e   : > { %4944 = vmatmul.mubr.msk.f32.gmra.mrb[28].mxu1 %vm311_vm1, %v6657_v30  ;;  %5144 = vmatmul.mubr.msk.f32.gmra.mrb[28].mxu0 %vm311_vm1, %v6658_v31 }
 0x12f   : > { %4946 = vmatprep.mubr.msk.f32.mxu1 %vm311_vm1, %v6274_v1  ;;  %5146 = vmatprep.mubr.msk.f32.mxu0 %vm311_vm1, %v4363_v29 }
 0x132   : > { %4947 = vmatmul.mubr.msk.f32.gmra.mrb[30].mxu1 %vm311_vm1, %v6285_v14  ;;  %5147 = vmatmul.mubr.msk.f32.gmra.mrb[30].mxu0 %vm311_vm1, %v4364_v32 }
 0x1a9   : > { %v4853_v34 = vpop.f32.mrb[0].mxu1 }
 0x1aa   : > { %v1551_v35 = vpop.f32.mrb[1].mxu1 }
 0x1ad   : > { %v4856_v36 = vpop.f32.mrb[2].mxu1 }
 0x1ae   : > { %v1561_v38 = vpop.f32.mrb[3].mxu1 }
 0x1b1   : > { %v4859_v39 = vpop.f32.mrb[4].mxu1 }
 0x1b2   : > { %v1571_v40 = vpop.f32.mrb[5].mxu1 }
 0x1b5   : > { %v4862_v41 = vpop.f32.mrb[6].mxu1 }
 0x1b6   : > { %v1581_v42 = vpop.f32.mrb[7].mxu1 }
 0x1b9   : > { %v4865_v43 = vpop.f32.mrb[8].mxu1 }
 0x1ba   : > { %v1591_v44 = vpop.f32.mrb[9].mxu1 }
 0x1bd   : > { %v4868_v45 = vpop.f32.mrb[10].mxu1 }
 0x1be   : > { %v1601_v46 = vpop.f32.mrb[11].mxu1 }
 0x1c1   : > { %v4871_v47 = vpop.f32.mrb[12].mxu1 }
 0x1c2   : > { %v1611_v48 = vpop.f32.mrb[13].mxu1 }
 0x1c5   : > { %v4874_v49 = vpop.f32.mrb[14].mxu1 }
 0x1c6   : > { %v6427_v50 = vpop.f32.mrb[15].mxu1 }
 0x1c9   : > { %v5103_v51 = vpop.f32.mrb[0].mxu0 }
 0x1ca   : > { %v5151_v53 = vadd.f32 %v5103_v51, %v4853_v34  ;;  %v3499_v54 = vpop.f32.mrb[1].mxu0 }
 0x1cb   : > { %v5152_v56 = vadd.f32 %v3499_v54, %v1551_v35 }
 0x1cc   : > { %v3698_v58 = vadd.f32 %v5151_v53, %v6433_v52 }
 0x1cd   : > { %v3697_v59 = vadd.f32 %v5152_v56, %v6433_v52  ;;  %v5106_v60 = vpop.f32.mrb[2].mxu0 }
 0x1ce   : > { %3731 = vst.msk [vmem:[%s6438_s20 + $0x8] sm:$0xff] %vm3729_vm2, %v3698_v58  ;;  %v5153_v62 = vadd.f32 %v5106_v60, %v4856_v36  ;;  %v3509_v63 = vpop.f32.mrb[3].mxu0 }
 0x1cf   : > { %3730 = vst.msk [vmem:[%s6438_s20] sm:$0xff] %vm3729_vm2, %v3697_v59  ;;  %v5154_v0 = vadd.f32 %v3509_v63, %v1561_v38 }
 0x1d0   : > { %v3700_v2 = vadd.f32 %v5153_v62, %v6433_v52 }
 0x1d1   : > { %v3699_v4 = vadd.f32 %v5154_v0, %v6433_v52  ;;  %v5109_v5 = vpop.f32.mrb[4].mxu0 }
 0x1d2   : > { %3733 = vst.msk [vmem:[%s6438_s20 + $0x18] sm:$0xff] %vm3729_vm2, %v3700_v2  ;;  %v5155_v6 = vadd.f32 %v5109_v5, %v4859_v39  ;;  %v3519_v7 = vpop.f32.mrb[5].mxu0 }
 0x1d3   : > { %3732 = vst.msk [vmem:[%s6438_s20 + $0x10] sm:$0xff] %vm3729_vm2, %v3699_v4  ;;  %v5156_v9 = vadd.f32 %v3519_v7, %v1571_v40 }
 0x1d4   : > { %v3702_v10 = vadd.f32 %v5155_v6, %v6433_v52 }
 0x1d5   : > { %v3701_v55 = vadd.f32 %v5156_v9, %v6433_v52  ;;  %v5112_v57 = vpop.f32.mrb[6].mxu0 }
 0x1d6   : > { %3735 = vst.msk [vmem:[%s6438_s20 + $0x28] sm:$0xff] %vm3729_vm2, %v3702_v10  ;;  %v5157_v28 = vadd.f32 %v5112_v57, %v4862_v41  ;;  %v3529_v24 = vpop.f32.mrb[7].mxu0 }
 0x1d7   : > { %3734 = vst.msk [vmem:[%s6438_s20 + $0x20] sm:$0xff] %vm3729_vm2, %v3701_v55  ;;  %v5158_v25 = vadd.f32 %v3529_v24, %v1581_v42 }
 0x1d8   : > { %v3704_v8 = vadd.f32 %v5157_v28, %v6433_v52 }
 0x1d9   : > { %v3703_v11 = vadd.f32 %v5158_v25, %v6433_v52  ;;  %v5115_v13 = vpop.f32.mrb[8].mxu0 }
 0x1da   : > { %3737 = vst.msk [vmem:[%s6438_s20 + $0x38] sm:$0xff] %vm3729_vm2, %v3704_v8  ;;  %v5159_v15 = vadd.f32 %v5115_v13, %v4865_v43  ;;  %v3539_v17 = vpop.f32.mrb[9].mxu0 }
 0x1db   : > { %3736 = vst.msk [vmem:[%s6438_s20 + $0x30] sm:$0xff] %vm3729_vm2, %v3703_v11  ;;  %v5160_v19 = vadd.f32 %v3539_v17, %v1591_v44 }
 0x1dc   : > { %v3706_v21 = vadd.f32 %v5159_v15, %v6433_v52 }
 0x1dd   : > { %v3705_v22 = vadd.f32 %v5160_v19, %v6433_v52  ;;  %v5118_v37 = vpop.f32.mrb[10].mxu0 }
 0x1de   : > { %3739 = vst.msk [vmem:[%s6438_s20 + $0x48] sm:$0xff] %vm3729_vm2, %v3706_v21  ;;  %v5161_v33 = vadd.f32 %v5118_v37, %v4868_v45  ;;  %v3549_v12 = vpop.f32.mrb[11].mxu0 }
 0x1df   : > { %3738 = vst.msk [vmem:[%s6438_s20 + $0x40] sm:$0xff] %vm3729_vm2, %v3705_v22  ;;  %v5162_v16 = vadd.f32 %v3549_v12, %v1601_v46 }
 0x1e0   : > { %v3708_v20 = vadd.f32 %v5161_v33, %v6433_v52 }
 0x1e1   : > { %v3707_v1 = vadd.f32 %v5162_v16, %v6433_v52  ;;  %v5121_v3 = vpop.f32.mrb[12].mxu0 }
 0x1e2   : > { %3741 = vst.msk [vmem:[%s6438_s20 + $0x58] sm:$0xff] %vm3729_vm2, %v3708_v20  ;;  %v5163_v61 = vadd.f32 %v5121_v3, %v4871_v47  ;;  %v3559_v14 = vpop.f32.mrb[13].mxu0 }
 0x1e3   : > { %3740 = vst.msk [vmem:[%s6438_s20 + $0x50] sm:$0xff] %vm3729_vm2, %v3707_v1  ;;  %v5164_v18 = vadd.f32 %v3559_v14, %v1611_v48 }
 0x1e4   : > { %v3710_v23 = vadd.f32 %v5163_v61, %v6433_v52 }
 0x1e5   : > { %v3709_v26 = vadd.f32 %v5164_v18, %v6433_v52  ;;  %v5124_v27 = vpop.f32.mrb[14].mxu0 }
 0x1e6   : > { %3743 = vst.msk [vmem:[%s6438_s20 + $0x68] sm:$0xff] %vm3729_vm2, %v3710_v23  ;;  %v5165_v29 = vadd.f32 %v5124_v27, %v4874_v49  ;;  %v3569_v30 = vpop.f32.mrb[15].mxu0 }
 0x1e7   : > { %3742 = vst.msk [vmem:[%s6438_s20 + $0x60] sm:$0xff] %vm3729_vm2, %v3709_v26  ;;  %v5166_v31 = vadd.f32 %v3569_v30, %v6427_v50 }
 0x1e8   : > { %v3712_v32 = vadd.f32 %v5165_v29, %v6433_v52 }
 0x1e9   : > { %v3711_v34 = vadd.f32 %v5166_v31, %v6433_v52  ;;  %v4927_v35 = vpop.f32.mrb[16].mxu1  ;;  %v5127_v36 = vpop.f32.mrb[16].mxu0 }
 0x1ea   : > { %3745 = vst.msk [vmem:[%s6438_s20 + $0x78] sm:$0xff] %vm3729_vm2, %v3712_v32  ;;  %v5167_v38 = vadd.f32 %v5127_v36, %v4927_v35  ;;  %v2020_v39 = vpop.f32.mrb[17].mxu1  ;;  %v3579_v40 = vpop.f32.mrb[17].mxu0 }
 0x1eb   : > { %3744 = vst.msk [vmem:[%s6438_s20 + $0x70] sm:$0xff] %vm3729_vm2, %v3711_v34  ;;  %v5168_v41 = vadd.f32 %v3579_v40, %v2020_v39 }
 0x1ec   : > { %v3714_v42 = vadd.f32 %v5167_v38, %v6433_v52 }
 0x1ed   : > { %v3713_v43 = vadd.f32 %v5168_v41, %v6433_v52  ;;  %v4930_v44 = vpop.f32.mrb[18].mxu1  ;;  %v5130_v45 = vpop.f32.mrb[18].mxu0 }
 0x1ee   : > { %3747 = vst.msk [vmem:[%s6438_s20 + $0x88] sm:$0xff] %vm3729_vm2, %v3714_v42  ;;  %v5169_v46 = vadd.f32 %v5130_v45, %v4930_v44  ;;  %v2030_v47 = vpop.f32.mrb[19].mxu1  ;;  %v3589_v48 = vpop.f32.mrb[19].mxu0 }
 0x1ef   : > { %3746 = vst.msk [vmem:[%s6438_s20 + $0x80] sm:$0xff] %vm3729_vm2, %v3713_v43  ;;  %v5170_v49 = vadd.f32 %v3589_v48, %v2030_v47 }
 0x1f0   : > { %v3716_v50 = vadd.f32 %v5169_v46, %v6433_v52 }
 0x1f1   : > { %v3715_v51 = vadd.f32 %v5170_v49, %v6433_v52  ;;  %v4933_v53 = vpop.f32.mrb[20].mxu1  ;;  %v5133_v54 = vpop.f32.mrb[20].mxu0 }
 0x1f2   : > { %3749 = vst.msk [vmem:[%s6438_s20 + $0x98] sm:$0xff] %vm3729_vm2, %v3716_v50  ;;  %v5171_v56 = vadd.f32 %v5133_v54, %v4933_v53  ;;  %v2040_v58 = vpop.f32.mrb[21].mxu1  ;;  %v3599_v59 = vpop.f32.mrb[21].mxu0 }
 0x1f3   : > { %3748 = vst.msk [vmem:[%s6438_s20 + $0x90] sm:$0xff] %vm3729_vm2, %v3715_v51  ;;  %v5172_v60 = vadd.f32 %v3599_v59, %v2040_v58 }
 0x1f4   : > { %v3718_v62 = vadd.f32 %v5171_v56, %v6433_v52 }
 0x1f5   : > { %v3717_v63 = vadd.f32 %v5172_v60, %v6433_v52  ;;  %v4936_v0 = vpop.f32.mrb[22].mxu1  ;;  %v5136_v2 = vpop.f32.mrb[22].mxu0 }
 0x1f6   : > { %3751 = vst.msk [vmem:[%s6438_s20 + $0xa8] sm:$0xff] %vm3729_vm2, %v3718_v62  ;;  %v5173_v4 = vadd.f32 %v5136_v2, %v4936_v0  ;;  %v2050_v5 = vpop.f32.mrb[23].mxu1  ;;  %v3609_v6 = vpop.f32.mrb[23].mxu0 }
 0x1f7   : > { %3750 = vst.msk [vmem:[%s6438_s20 + $0xa0] sm:$0xff] %vm3729_vm2, %v3717_v63  ;;  %v5174_v7 = vadd.f32 %v3609_v6, %v2050_v5 }
 0x1f8   : > { %v3720_v9 = vadd.f32 %v5173_v4, %v6433_v52 }
 0x1f9   : > { %v3719_v10 = vadd.f32 %v5174_v7, %v6433_v52  ;;  %v4939_v55 = vpop.f32.mrb[24].mxu1  ;;  %v5139_v57 = vpop.f32.mrb[24].mxu0 }
 0x1fa   : > { %3753 = vst.msk [vmem:[%s6438_s20 + $0xb8] sm:$0xff] %vm3729_vm2, %v3720_v9  ;;  %v5175_v28 = vadd.f32 %v5139_v57, %v4939_v55  ;;  %v2060_v24 = vpop.f32.mrb[25].mxu1  ;;  %v3619_v25 = vpop.f32.mrb[25].mxu0 }
 0x1fb   : > { %3752 = vst.msk [vmem:[%s6438_s20 + $0xb0] sm:$0xff] %vm3729_vm2, %v3719_v10  ;;  %v5176_v8 = vadd.f32 %v3619_v25, %v2060_v24 }
 0x1fc   : > { %v3722_v11 = vadd.f32 %v5175_v28, %v6433_v52 }
 0x1fd   : > { %v3721_v13 = vadd.f32 %v5176_v8, %v6433_v52  ;;  %v4942_v15 = vpop.f32.mrb[26].mxu1  ;;  %v5142_v17 = vpop.f32.mrb[26].mxu0 }
 0x1fe   : > { %3755 = vst.msk [vmem:[%s6438_s20 + $0xc8] sm:$0xff] %vm3729_vm2, %v3722_v11  ;;  %v5177_v19 = vadd.f32 %v5142_v17, %v4942_v15  ;;  %v2070_v21 = vpop.f32.mrb[27].mxu1  ;;  %v3629_v22 = vpop.f32.mrb[27].mxu0 }
 0x1ff   : > { %3754 = vst.msk [vmem:[%s6438_s20 + $0xc0] sm:$0xff] %vm3729_vm2, %v3721_v13  ;;  %v5178_v37 = vadd.f32 %v3629_v22, %v2070_v21 }
 0x200   : > { %v3724_v33 = vadd.f32 %v5177_v19, %v6433_v52 }
 0x201   : > { %v3723_v12 = vadd.f32 %v5178_v37, %v6433_v52  ;;  %v4945_v16 = vpop.f32.mrb[28].mxu1  ;;  %v5145_v20 = vpop.f32.mrb[28].mxu0 }
 0x202   : > { %3757 = vst.msk [vmem:[%s6438_s20 + $0xd8] sm:$0xff] %vm3729_vm2, %v3724_v33  ;;  %v5179_v1 = vadd.f32 %v5145_v20, %v4945_v16  ;;  %v2080_v3 = vpop.f32.mrb[29].mxu1  ;;  %v3639_v61 = vpop.f32.mrb[29].mxu0 }
 0x203   : > { %3756 = vst.msk [vmem:[%s6438_s20 + $0xd0] sm:$0xff] %vm3729_vm2, %v3723_v12  ;;  %v5180_v14 = vadd.f32 %v3639_v61, %v2080_v3 }
 0x204   : > { %v3726_v18 = vadd.f32 %v5179_v1, %v6433_v52 }
 0x205   : > { %v3725_v23 = vadd.f32 %v5180_v14, %v6433_v52  ;;  %v4948_v26 = vpop.f32.mrb[30].mxu1  ;;  %v5148_v27 = vpop.f32.mrb[30].mxu0 }
 0x206   : > { %3759 = vst.msk [vmem:[%s6438_s20 + $0xe8] sm:$0xff] %vm3729_vm2, %v3726_v18  ;;  %v5181_v29 = vadd.f32 %v5148_v27, %v4948_v26  ;;  %v2090_v30 = vpop.f32.mrb[31].mxu1  ;;  %v3649_v31 = vpop.f32.mrb[31].mxu0 }
 0x207   : > { %3758 = vst.msk [vmem:[%s6438_s20 + $0xe0] sm:$0xff] %vm3729_vm2, %v3725_v23  ;;  %v5182_v32 = vadd.f32 %v3649_v31, %v2090_v30 }
 0x208   : > { %v3728_v34 = vadd.f32 %v5181_v29, %v6433_v52 }
 0x209   : > { %v3727_v35 = vadd.f32 %v5182_v32, %v6433_v52 }
 0x20a   : > { %3761 = vst.msk [vmem:[%s6438_s20 + $0xf8] sm:$0xff] %vm3729_vm2, %v3728_v34 }
 0x20b   : > { %3760 = vst.msk [vmem:[%s6438_s20 + $0xf0] sm:$0xff] %vm3729_vm2, %v3727_v35 }
 0x20c PF: > { %s13_s14 = sadd.s32 1, %s5454_s14   ;;  %s6659_s12 = smov %s5450_s13 }
 0x20d   : > { %p10_p5 = scmp.ge.s32.totalorder %s13_s14, 4   ;;  %s6660_s13 = smov %s6662_s15 }
 0x20f   :  { %12 = sbr.rel (!%p10_p5) target bundleno = 2 (0x2), region = 71 }

</bundles_post_ra>
